<compile_context>
chip_gen: v5e
topology: v5e:2x2
jax: 0.10.0
libtpu: 0.0.40
codegen_flags: <defaults>
</compile_context>

<pallas_src>
import jax
import jax.numpy as jnp
from jax.experimental import pallas as pl
from jax.experimental.pallas import tpu as pltpu

# ----------------------------- model constants ------------------------------
B_DEF, L_DEF, NUM_NODES, IN_DIM = 2, 12, 8, 3      # history_data: [B, L, N, C]
PATCH_LEN = 3
NUM_PATCH = L_DEF // PATCH_LEN                     # 4
D_MODEL, N_HEADS = 32, 4
D_HEAD = D_MODEL // N_HEADS                        # 8
MLP_DIM = 64
RC, SC, EC = 16, 32, 32                            # residual / skip / end channels
NODE_EMB = 10
HORIZON, OUT_DIM = 12, 1
T_CONV = L_DEF - 1                                 # temporal-conv output length (kernel=2)
NEG_INF = -1e9                                     # additive attention mask value

G_GROUPS = B_DEF * NUM_NODES                       # 16  backend rows (b*N + n)
TOK_ROWS = G_GROUPS * NUM_PATCH                    # 64  encoder token rows (b, n, p)
LC = L_DEF * IN_DIM                                # 36
LRC = L_DEF * RC                                   # 192
TRC = T_CONV * RC                                  # 176
OUT_PAD = 128                                      # lane-dense output width
FG_G_OFF = 256                                     # gate half at 128-aligned lane offset
FG_WIDTH = FG_G_OFF + TRC                          # 432
BIG_LANES = 448                                    # lane width of the "big" weight slab
SMALL_LANES = 128                                  # lane width of the 128-lane weight slab

DATA_ENC_ROWS = TOK_ROWS                           # rows 0..63  : encoder patches [64, 3]
DATA_ROWS = DATA_ENC_ROWS + G_GROUPS               # rows 64..79 : backend slab    [16, 36]


def _pad8(n):
    return -(-n // 8) * 8


# ---- static row offsets inside the 128-lane weight slab (all multiples of 8) ----
OFF_EMBED = 0                                      # W_embed      [3, 32]
OFF_POS = OFF_EMBED + _pad8(PATCH_LEN)             # pos_bias     [64, 32]
OFF_QKV = OFF_POS + TOK_ROWS                       # W_qkv        [32, 96]
OFF_ABIAS = OFF_QKV + D_MODEL                      # attn_bias    [64, 64]
OFF_WO = OFF_ABIAS + TOK_ROWS                      # W_o          [32, 32]
OFF_M1 = OFF_WO + D_MODEL                          # W_m1         [32, 64]
OFF_M2 = OFF_M1 + D_MODEL                          # W_m2         [64, 32]
OFF_SEL = OFF_M2 + MLP_DIM                         # sel_last     [16, 64]
OFF_A = OFF_SEL + G_GROUPS                         # A_big        [16, 16]
OFF_SKIP = OFF_A + G_GROUPS                        # W_skip_big   [176, 32]
OFF_HIS = OFF_SKIP + TRC                           # W_his        [32, 32]
OFF_E1 = OFF_HIS + D_MODEL                         # W_end1       [32, 32]
OFF_E2 = OFF_E1 + SC                               # W_end2_pad   [32, 128]
SLAB128_ROWS = OFF_E2 + EC                         # 600

# ---- static row offsets inside the 448-lane weight slab ----
OFFB_START = 0                                     # W_start_big  [36, 192]
OFFB_FG = _pad8(LC)                                # W_fg_big     [192, 432]
OFFB_GC = OFFB_FG + LRC                            # W_gc_big     [176, 176]
SLABBIG_ROWS = OFFB_GC + TRC                       # 408

# ---- bias slab row indices ([16, 448]) ----
BR_LN1_G, BR_LN1_B, BR_QKV, BR_O = 0, 1, 2, 3
BR_LN2_G, BR_LN2_B, BR_M1, BR_M2 = 4, 5, 6, 7
BR_START, BR_FG, BR_GC, BR_SKIP = 8, 9, 10, 11
BR_HIS, BR_E1, BR_E2 = 12, 13, 14
BIAS_ROWS = 16


# ----------------------------- parameter init -------------------------------
def init_params(key):
    ks = iter(jax.random.split(key, 64))

    def w(shape, scale=0.1):
        return scale * jax.random.normal(next(ks), shape, jnp.float32)

    p = {}
    # ---- MAEST-style frozen encoder ----
    p["W_embed"] = w((PATCH_LEN, D_MODEL))
    p["b_embed"] = jnp.zeros((D_MODEL,), jnp.float32)
    p["pos"] = w((NUM_PATCH, D_MODEL), 0.02)
    p["ln1_g"] = jnp.ones((D_MODEL,), jnp.float32)
    p["ln1_b"] = jnp.zeros((D_MODEL,), jnp.float32)
    p["ln2_g"] = jnp.ones((D_MODEL,), jnp.float32)
    p["ln2_b"] = jnp.zeros((D_MODEL,), jnp.float32)
    for nm in ("q", "k", "v", "o"):
        p[f"W_{nm}"] = w((D_MODEL, D_MODEL))
        p[f"b_{nm}"] = jnp.zeros((D_MODEL,), jnp.float32)
    p["W_m1"] = w((D_MODEL, MLP_DIM))
    p["b_m1"] = jnp.zeros((MLP_DIM,), jnp.float32)
    p["W_m2"] = w((MLP_DIM, D_MODEL))
    p["b_m2"] = jnp.zeros((D_MODEL,), jnp.float32)
    # ---- GWN-style backend predictor ----
    p["W_start"] = w((IN_DIM, RC))
    p["b_start"] = jnp.zeros((RC,), jnp.float32)
    p["W_filt"] = w((2 * RC, RC))
    p["b_filt"] = jnp.zeros((RC,), jnp.float32)
    p["W_gate"] = w((2 * RC, RC))
    p["b_gate"] = jnp.zeros((RC,), jnp.float32)
    p["E1"] = w((NUM_NODES, NODE_EMB), 1.0)
    p["E2"] = w((NUM_NODES, NODE_EMB), 1.0)
    p["W_gc"] = w((RC, RC))
    p["b_gc"] = jnp.zeros((RC,), jnp.float32)
    p["W_skip"] = w((RC, SC))
    p["b_skip"] = jnp.zeros((SC,), jnp.float32)
    p["W_his"] = w((D_MODEL, SC))
    p["b_his"] = jnp.zeros((SC,), jnp.float32)
    p["W_end1"] = w((SC, EC))
    p["b_end1"] = jnp.zeros((EC,), jnp.float32)
    p["W_end2"] = w((EC, HORIZON * OUT_DIM))
    p["b_end2"] = jnp.zeros((HORIZON * OUT_DIM,), jnp.float32)
    return p


# --------------------- one-time frozen-parameter folding ---------------------
def prepare_params(p):
    """Expand + pack frozen parameters ONCE (outside the per-step forward) into three slabs:
         bias_slab [16, 448]          - every bias / LN-gain row
         slab128   [600, 128] f32     - all weights with <=128 lanes
         slab_big  [408, 448] f32     - block-structured backend weights (start / filt+gate / gc)
       Also pre-folds: adaptive adjacency, fused QKV, tiled positional bias, attention block
       mask, last-patch selector, last-time-slice selection (into W_skip), 128-lane-padded
       W_end2, and the fused (lane-aligned) filt|gate temporal-conv weight."""
    f32 = jnp.float32
    eye_l = jnp.eye(L_DEF, dtype=f32)
    eye_t = jnp.eye(T_CONV, dtype=f32)
    sel_t = jnp.eye(L_DEF, T_CONV, dtype=f32)            # l == t
    sel_t1 = jnp.eye(L_DEF, T_CONV, k=-1, dtype=f32)      # l == t + 1

    # adaptive adjacency softmax(relu(E1 E2^T)) is parameter-only -> precompute once
    adj = jax.nn.softmax(jnp.maximum(p["E1"] @ p["E2"].T, 0.0), axis=-1)

    gid = jnp.arange(TOK_ROWS) // NUM_PATCH
    attn_bias = jnp.where(gid[:, None] == gid[None, :], 0.0, NEG_INF).astype(f32)
    sel_last = (jnp.arange(TOK_ROWS)[None, :] ==
                (jnp.arange(G_GROUPS)[:, None] * NUM_PATCH + (NUM_PATCH - 1))).astype(f32)

    pos_bias = jnp.tile(p["pos"], (G_GROUPS, 1)) + p["b_embed"][None, :]        # [64, 32]
    w_qkv = jnp.concatenate([p["W_q"], p["W_k"], p["W_v"]], axis=1)             # [32, 96]
    b_qkv = jnp.concatenate([p["b_q"], p["b_k"], p["b_v"]])                     # [96]

    w_start_big = jnp.kron(eye_l, p["W_start"])                                 # [36, 192]
    w_filt_big = jnp.kron(sel_t, p["W_filt"][:RC]) + jnp.kron(sel_t1, p["W_filt"][RC:])
    w_gate_big = jnp.kron(sel_t, p["W_gate"][:RC]) + jnp.kron(sel_t1, p["W_gate"][RC:])
    # fused filt|gate weight; gate half lives at a 128-aligned lane offset -> free split view
    w_fg_big = jnp.zeros((LRC, FG_WIDTH), f32)
    w_fg_big = w_fg_big.at[:, :TRC].set(w_filt_big)
    w_fg_big = w_fg_big.at[:, FG_G_OFF:FG_G_OFF + TRC].set(w_gate_big)
    w_gc_big = jnp.kron(eye_t, p["W_gc"])                                       # [176, 176]
    a_big = jnp.kron(jnp.eye(B_DEF, dtype=f32), adj)                            # [16, 16]
    # fold "take last time slice" into the skip weight (rows other than the last block = 0)
    w_skip_big = jnp.zeros((TRC, SC), f32).at[(T_CONV - 1) * RC:, :].set(p["W_skip"])
    # lane-dense output head
    w_end2_pad = jnp.zeros((EC, OUT_PAD), f32).at[:, :HORIZON * OUT_DIM].set(p["W_end2"])
    b_end2_pad = jnp.zeros((OUT_PAD,), f32).at[:HORIZON * OUT_DIM].set(p["b_end2"])

    # ---------------- bias slab ----------------
    bias_slab = jnp.zeros((BIAS_ROWS, BIG_LANES), f32)

    def brow(slab, i, vec):
        return slab.at[i, :vec.shape[0]].set(vec)

    bias_slab = brow(bias_slab, BR_LN1_G, p["ln1_g"])
    bias_slab = brow(bias_slab, BR_LN1_B, p["ln1_b"])
    bias_slab = brow(bias_slab, BR_QKV, b_qkv)
    bias_slab = brow(bias_slab, BR_O, p["b_o"])
    bias_slab = brow(bias_slab, BR_LN2_G, p["ln2_g"])
    bias_slab = brow(bias_slab, BR_LN2_B, p["ln2_b"])
    bias_slab = brow(bias_slab, BR_M1, p["b_m1"])
    bias_slab = brow(bias_slab, BR_M2, p["b_m2"])
    bias_slab = brow(bias_slab, BR_START, jnp.tile(p["b_start"], L_DEF))
    b_fg = jnp.zeros((FG_WIDTH,), f32)
    b_fg = b_fg.at[:TRC].set(jnp.tile(p["b_filt"], T_CONV))
    b_fg = b_fg.at[FG_G_OFF:FG_G_OFF + TRC].set(jnp.tile(p["b_gate"], T_CONV))
    bias_slab = brow(bias_slab, BR_FG, b_fg)
    bias_slab = brow(bias_slab, BR_GC, jnp.tile(p["b_gc"], T_CONV))
    bias_slab = brow(bias_slab, BR_SKIP, p["b_skip"])
    bias_slab = brow(bias_slab, BR_HIS, p["b_his"])
    bias_slab = brow(bias_slab, BR_E1, p["b_end1"])
    bias_slab = brow(bias_slab, BR_E2, b_end2_pad)

    # ---------------- 128-lane weight slab ----------------
    slab128 = jnp.zeros((SLAB128_ROWS, SMALL_LANES), f32)

    def place(slab, row, mat):
        return slab.at[row:row + mat.shape[0], :mat.shape[1]].set(mat)

    slab128 = place(slab128, OFF_EMBED, p["W_embed"])
    slab128 = place(slab128, OFF_POS, pos_bias)
    slab128 = place(slab128, OFF_QKV, w_qkv)
    slab128 = place(slab128, OFF_ABIAS, attn_bias)
    slab128 = place(slab128, OFF_WO, p["W_o"])
    slab128 = place(slab128, OFF_M1, p["W_m1"])
    slab128 = place(slab128, OFF_M2, p["W_m2"])
    slab128 = place(slab128, OFF_SEL, sel_last)
    slab128 = place(slab128, OFF_A, a_big)
    slab128 = place(slab128, OFF_SKIP, w_skip_big)
    slab128 = place(slab128, OFF_HIS, p["W_his"])
    slab128 = place(slab128, OFF_E1, p["W_end1"])
    slab128 = place(slab128, OFF_E2, w_end2_pad)

    # ---------------- 448-lane weight slab ----------------
    slab_big = jnp.zeros((SLABBIG_ROWS, BIG_LANES), f32)
    slab_big = place(slab_big, OFFB_START, w_start_big)
    slab_big = place(slab_big, OFFB_FG, w_fg_big)
    slab_big = place(slab_big, OFFB_GC, w_gc_big)

    return (bias_slab, slab128, slab_big)


# ------------------------------- fused kernel --------------------------------
def _enhance_kernel(data_ref, bias_ref, w128_ref, wbig_ref, out_ref):
    """Entire `enhance` forward in one invocation; all intermediates stay in VMEM/vregs."""
    f32 = jnp.float32

    def mm(a, w):
        return jnp.dot(a, w, preferred_element_type=f32)

    def brow(i, width):                      # [1, width] bias / LN-gain row (static view)
        return bias_ref[i:i + 1, 0:width]

    def layer_norm(x, g, b):
        mu = jnp.mean(x, axis=-1, keepdims=True)
        var = jnp.mean((x - mu) ** 2, axis=-1, keepdims=True)
        return (x - mu) * jax.lax.rsqrt(var + 1e-5) * g + b

    # ---------------- frozen MAEST-style encoder ----------------
    enc_x = data_ref[0:DATA_ENC_ROWS, 0:PATCH_LEN]                              # [64, 3]
    w_embed = w128_ref[OFF_EMBED:OFF_EMBED + PATCH_LEN, 0:D_MODEL]
    pos_bias = w128_ref[OFF_POS:OFF_POS + TOK_ROWS, 0:D_MODEL]
    tok = mm(enc_x, w_embed) + pos_bias                                         # [64, 32]

    hn = layer_norm(tok, brow(BR_LN1_G, D_MODEL), brow(BR_LN1_B, D_MODEL))
    w_qkv = w128_ref[OFF_QKV:OFF_QKV + D_MODEL, 0:3 * D_MODEL]
    qkv = mm(hn, w_qkv) + brow(BR_QKV, 3 * D_MODEL)                             # fused QKV
    q = qkv[:, 0:D_MODEL]
    k = qkv[:, D_MODEL:2 * D_MODEL]
    v = qkv[:, 2 * D_MODEL:3 * D_MODEL]

    attn_bias = w128_ref[OFF_ABIAS:OFF_ABIAS + TOK_ROWS, 0:TOK_ROWS]            # block-diag mask
    scale = 1.0 / float(D_HEAD) ** 0.5
    heads = []
    for h in range(N_HEADS):                 # unrolled; all B*N groups per head in one matmul
        sl = slice(h * D_HEAD, (h + 1) * D_HEAD)
        qh, kh, vh = q[:, sl], k[:, sl], v[:, sl]
        s = jax.lax.dot_general(qh, kh, (((1,), (1,)), ((), ())),
                                preferred_element_type=f32) * scale + attn_bias
        m = jnp.max(s, axis=-1, keepdims=True)
        e = jnp.exp(s - m)
        inv = pl.reciprocal(jnp.sum(e, axis=-1, keepdims=True), approx=True)    # EUP slot
        heads.append(mm(e * inv, vh))                                           # [64, 8]
    o_cat = jnp.concatenate(heads, axis=-1)                                     # [64, 32]
    w_o = w128_ref[OFF_WO:OFF_WO + D_MODEL, 0:D_MODEL]
    h1 = tok + mm(o_cat, w_o) + brow(BR_O, D_MODEL)                             # one W_o matmul

    hn2 = layer_norm(h1, brow(BR_LN2_G, D_MODEL), brow(BR_LN2_B, D_MODEL))
    w_m1 = w128_ref[OFF_M1:OFF_M1 + D_MODEL, 0:MLP_DIM]
    mlp = jax.nn.gelu(mm(hn2, w_m1) + brow(BR_M1, MLP_DIM), approximate=True)
    w_m2 = w128_ref[OFF_M2:OFF_M2 + MLP_DIM, 0:D_MODEL]
    henc = h1 + mm(mlp, w_m2) + brow(BR_M2, D_MODEL)                            # [64, 32]
    sel_last = w128_ref[OFF_SEL:OFF_SEL + G_GROUPS, 0:TOK_ROWS]
    feature = mm(sel_last, henc)                                                # [16, 32]

    # ---------------- GWN-style backend ----------------
    bk_x = data_ref[DATA_ENC_ROWS:DATA_ROWS, 0:LC]                              # [16, 36]
    w_start = wbig_ref[OFFB_START:OFFB_START + LC, 0:LRC]
    h0 = mm(bk_x, w_start) + brow(BR_START, LRC)                                # [16, 192]

    w_fg = wbig_ref[OFFB_FG:OFFB_FG + LRC, 0:FG_WIDTH]
    fg = mm(h0, w_fg) + brow(BR_FG, FG_WIDTH)                                   # fused filt|gate
    f = fg[:, 0:TRC]                                                            # lanes   0..175
    g = fg[:, FG_G_OFF:FG_G_OFF + TRC]                                          # lanes 256..431
    ht = jnp.tanh(f) * jax.nn.sigmoid(g)                                        # gated activation

    a_big = w128_ref[OFF_A:OFF_A + G_GROUPS, 0:G_GROUPS]
    ag = mm(a_big, ht)                                                          # graph mixing
    w_gc = wbig_ref[OFFB_GC:OFFB_GC + TRC, 0:TRC]
    z = jnp.maximum(mm(ag, w_gc) + brow(BR_GC, TRC), 0.0)
    ht = ht + z                                                                 # residual

    # last-time-slice selection folded into W_skip_big (zero rows elsewhere)
    w_skip = w128_ref[OFF_SKIP:OFF_SKIP + TRC, 0:SC]
    w_his = w128_ref[OFF_HIS:OFF_HIS + D_MODEL, 0:SC]
    s = (mm(ht, w_skip) + brow(BR_SKIP, SC)
         + mm(feature, w_his) + brow(BR_HIS, SC))
    s = jnp.maximum(s, 0.0)
    w_e1 = w128_ref[OFF_E1:OFF_E1 + SC, 0:EC]
    s = jnp.maximum(mm(s, w_e1) + brow(BR_E1, EC), 0.0)
    w_e2 = w128_ref[OFF_E2:OFF_E2 + EC, 0:OUT_PAD]
    out_ref[...] = mm(s, w_e2) + brow(BR_E2, OUT_PAD)                           # [16, 128] lane-dense


# ------------------------------ forward wrapper -------------------------------
@jax.jit
def enhance_forward(pp, history_data):
    """enhance.forward: feature = pre_trained(history); output = predictor(history, feature)."""
    bias_slab, slab128, slab_big = pp
    B, L, N, C = history_data.shape

    # Single small host-side fusion: pack both input views of the 2.3 KB input into one slab.
    # Encoder consumes channel 0 (target channel) of history_data, patched along time.
    enc_x = jnp.transpose(history_data[..., 0], (0, 2, 1)).reshape(
        B * N * NUM_PATCH, PATCH_LEN)                                           # [64, 3]
    bk_x = jnp.transpose(history_data, (0, 2, 1, 3)).reshape(B * N, L * C)      # [16, 36]
    data = jnp.concatenate(
        [jnp.pad(enc_x, ((0, 0), (0, L * C - PATCH_LEN))), bk_x], axis=0)       # [80, 36]

    vmem = pl.BlockSpec(memory_space=pltpu.MemorySpace.VMEM)
    out2d = pl.pallas_call(
        _enhance_kernel,
        out_shape=jax.ShapeDtypeStruct((B * N, OUT_PAD), jnp.float32),
        in_specs=[vmem, vmem, vmem, vmem],          # 4 whole-array VMEM inputs, no grid,
        out_specs=vmem,                             # no pipelining / double-buffering
    )(data, bias_slab, slab128, slab_big)

    out = out2d[:, :HORIZON * OUT_DIM].reshape(B, N, HORIZON)
    return jnp.transpose(out, (0, 2, 1))[..., None]                             # [B, HORIZON, N, 1]


# ---------------------------------- main -------------------------------------
if __name__ == "__main__":
    key = jax.random.PRNGKey(0)
    history_data = jax.random.normal(
        key, (B_DEF, L_DEF, NUM_NODES, IN_DIM), jnp.float32
    )
    params = init_params(jax.random.PRNGKey(1))
    prepped = prepare_params(params)       # one-time frozen-parameter folding (outside forward)

    out = enhance_forward(prepped, history_data)
    out = jax.block_until_ready(out)

    assert out.shape == (B_DEF, HORIZON, NUM_NODES, OUT_DIM), out.shape
    assert bool(jnp.all(jnp.isfinite(out)))
    print("KERNEL_OK")
</pallas_src>

<mosaic_0001>
module attributes {stable_mosaic.version = 11 : i64} {
  func.func @_enhance_kernel(%arg0: memref<80x36xf32, #tpu.memory_space<vmem>>, %arg1: memref<16x448xf32, #tpu.memory_space<vmem>>, %arg2: memref<600x128xf32, #tpu.memory_space<vmem>>, %arg3: memref<408x448xf32, #tpu.memory_space<vmem>>, %arg4: memref<16x128xf32, #tpu.memory_space<vmem>>) attributes {dimension_semantics = [], scalar_prefetch = 0 : i64, scratch_operands = 0 : i64, tpu.core_type = #tpu.core_type<tc>} {
    %c0 = arith.constant 0 : index
    %c0_0 = arith.constant 0 : index
    %0 = vector.load %arg0[%c0, %c0_0] : memref<80x36xf32, #tpu.memory_space<vmem>>, vector<64x3xf32>
    %c0_1 = arith.constant 0 : index
    %c0_2 = arith.constant 0 : index
    %1 = vector.load %arg2[%c0_1, %c0_2] : memref<600x128xf32, #tpu.memory_space<vmem>>, vector<3x32xf32>
    %c8 = arith.constant 8 : index
    %c0_3 = arith.constant 0 : index
    %2 = vector.load %arg2[%c8, %c0_3] : memref<600x128xf32, #tpu.memory_space<vmem>>, vector<64x32xf32>
    %cst = arith.constant dense<0.000000e+00> : vector<64x32xf32>
    %3 = tpu.matmul %0, %1, %cst {dimension_numbers = #tpu.dot_dimension_numbers<[1], [0], [0], [1], [0, 0, 1, 1], [], []>} : vector<64x3xf32>, vector<3x32xf32>, vector<64x32xf32> -> vector<64x32xf32>
    %4 = arith.addf %3, %2 : vector<64x32xf32>
    %c0_4 = arith.constant 0 : index
    %c0_5 = arith.constant 0 : index
    %5 = vector.load %arg1[%c0_4, %c0_5] : memref<16x448xf32, #tpu.memory_space<vmem>>, vector<1x32xf32>
    %c1 = arith.constant 1 : index
    %c0_6 = arith.constant 0 : index
    %6 = vector.load %arg1[%c1, %c0_6] : memref<16x448xf32, #tpu.memory_space<vmem>>, vector<1x32xf32>
    %cst_7 = arith.constant dense<0.000000e+00> : vector<64xf32>
    %7 = vector.multi_reduction <add>, %4, %cst_7 [1] : vector<64x32xf32> to vector<64xf32>
    %8 = vector.shape_cast %7 : vector<64xf32> to vector<64x1xf32>
    %cst_8 = arith.constant 3.200000e+01 : f32
    %9 = vector.broadcast %cst_8 : f32 to vector<64x1xf32>
    %10 = arith.divf %8, %9 : vector<64x1xf32>
    %11 = vector.broadcast %10 : vector<64x1xf32> to vector<64x32xf32>
    %12 = arith.subf %4, %11 : vector<64x32xf32>
    %13 = arith.mulf %12, %12 : vector<64x32xf32>
    %cst_9 = arith.constant dense<0.000000e+00> : vector<64xf32>
    %14 = vector.multi_reduction <add>, %13, %cst_9 [1] : vector<64x32xf32> to vector<64xf32>
    %15 = vector.shape_cast %14 : vector<64xf32> to vector<64x1xf32>
    %cst_10 = arith.constant 3.200000e+01 : f32
    %16 = vector.broadcast %cst_10 : f32 to vector<64x1xf32>
    %17 = arith.divf %15, %16 : vector<64x1xf32>
    %18 = vector.broadcast %10 : vector<64x1xf32> to vector<64x32xf32>
    %19 = arith.subf %4, %18 : vector<64x32xf32>
    %cst_11 = arith.constant 9.99999974E-6 : f32
    %20 = vector.broadcast %cst_11 : f32 to vector<64x1xf32>
    %21 = arith.addf %17, %20 : vector<64x1xf32>
    %22 = math.rsqrt %21 : vector<64x1xf32>
    %23 = vector.broadcast %22 : vector<64x1xf32> to vector<64x32xf32>
    %24 = arith.mulf %19, %23 : vector<64x32xf32>
    %25 = vector.broadcast %5 : vector<1x32xf32> to vector<64x32xf32>
    %26 = arith.mulf %24, %25 : vector<64x32xf32>
    %27 = vector.broadcast %6 : vector<1x32xf32> to vector<64x32xf32>
    %28 = arith.addf %26, %27 : vector<64x32xf32>
    %c72 = arith.constant 72 : index
    %c0_12 = arith.constant 0 : index
    %29 = vector.load %arg2[%c72, %c0_12] : memref<600x128xf32, #tpu.memory_space<vmem>>, vector<32x96xf32>
    %cst_13 = arith.constant dense<0.000000e+00> : vector<64x96xf32>
    %30 = tpu.matmul %28, %29, %cst_13 {dimension_numbers = #tpu.dot_dimension_numbers<[1], [0], [0], [1], [0, 0, 1, 1], [], []>} : vector<64x32xf32>, vector<32x96xf32>, vector<64x96xf32> -> vector<64x96xf32>
    %c2 = arith.constant 2 : index
    %c0_14 = arith.constant 0 : index
    %31 = vector.load %arg1[%c2, %c0_14] : memref<16x448xf32, #tpu.memory_space<vmem>>, vector<1x96xf32>
    %32 = vector.broadcast %31 : vector<1x96xf32> to vector<64x96xf32>
    %33 = arith.addf %30, %32 : vector<64x96xf32>
    %34 = vector.extract_strided_slice %33 {offsets = [0, 0], sizes = [64, 32], strides = [1, 1]} : vector<64x96xf32> to vector<64x32xf32>
    %35 = vector.extract_strided_slice %33 {offsets = [0, 32], sizes = [64, 32], strides = [1, 1]} : vector<64x96xf32> to vector<64x32xf32>
    %36 = vector.extract_strided_slice %33 {offsets = [0, 64], sizes = [64, 32], strides = [1, 1]} : vector<64x96xf32> to vector<64x32xf32>
    %c104 = arith.constant 104 : index
    %c0_15 = arith.constant 0 : index
    %37 = vector.load %arg2[%c104, %c0_15] : memref<600x128xf32, #tpu.memory_space<vmem>>, vector<64x64xf32>
    %38 = vector.extract_strided_slice %34 {offsets = [0, 0], sizes = [64, 8], strides = [1, 1]} : vector<64x32xf32> to vector<64x8xf32>
    %39 = vector.extract_strided_slice %35 {offsets = [0, 0], sizes = [64, 8], strides = [1, 1]} : vector<64x32xf32> to vector<64x8xf32>
    %40 = vector.extract_strided_slice %36 {offsets = [0, 0], sizes = [64, 8], strides = [1, 1]} : vector<64x32xf32> to vector<64x8xf32>
    %cst_16 = arith.constant dense<0.000000e+00> : vector<64x64xf32>
    %41 = tpu.matmul %38, %39, %cst_16 {dimension_numbers = #tpu.dot_dimension_numbers<[1], [1], [0], [0], [0, 0, 1, 0], [], []>} : vector<64x8xf32>, vector<64x8xf32>, vector<64x64xf32> -> vector<64x64xf32>
    %cst_17 = arith.constant 0.353553385 : f32
    %42 = vector.broadcast %cst_17 : f32 to vector<64x64xf32>
    %43 = arith.mulf %41, %42 : vector<64x64xf32>
    %44 = arith.addf %43, %37 : vector<64x64xf32>
    %cst_18 = arith.constant dense<0xFF800000> : vector<64xf32>
    %45 = vector.multi_reduction <maximumf>, %44, %cst_18 [1] : vector<64x64xf32> to vector<64xf32>
    %46 = vector.shape_cast %45 : vector<64xf32> to vector<64x1xf32>
    %47 = vector.broadcast %46 : vector<64x1xf32> to vector<64x64xf32>
    %48 = arith.subf %44, %47 : vector<64x64xf32>
    %49 = math.exp %48 : vector<64x64xf32>
    %cst_19 = arith.constant dense<0.000000e+00> : vector<64xf32>
    %50 = vector.multi_reduction <add>, %49, %cst_19 [1] : vector<64x64xf32> to vector<64xf32>
    %51 = vector.shape_cast %50 : vector<64xf32> to vector<64x1xf32>
    %52 = tpu.reciprocal %51 {approx = true} : vector<64x1xf32> -> vector<64x1xf32>
    %53 = vector.broadcast %52 : vector<64x1xf32> to vector<64x64xf32>
    %54 = arith.mulf %49, %53 : vector<64x64xf32>
    %cst_20 = arith.constant dense<0.000000e+00> : vector<64x8xf32>
    %55 = tpu.matmul %54, %40, %cst_20 {dimension_numbers = #tpu.dot_dimension_numbers<[1], [0], [0], [1], [0, 0, 1, 1], [], []>} : vector<64x64xf32>, vector<64x8xf32>, vector<64x8xf32> -> vector<64x8xf32>
    %56 = vector.extract_strided_slice %34 {offsets = [0, 8], sizes = [64, 8], strides = [1, 1]} : vector<64x32xf32> to vector<64x8xf32>
    %57 = vector.extract_strided_slice %35 {offsets = [0, 8], sizes = [64, 8], strides = [1, 1]} : vector<64x32xf32> to vector<64x8xf32>
    %58 = vector.extract_strided_slice %36 {offsets = [0, 8], sizes = [64, 8], strides = [1, 1]} : vector<64x32xf32> to vector<64x8xf32>
    %cst_21 = arith.constant dense<0.000000e+00> : vector<64x64xf32>
    %59 = tpu.matmul %56, %57, %cst_21 {dimension_numbers = #tpu.dot_dimension_numbers<[1], [1], [0], [0], [0, 0, 1, 0], [], []>} : vector<64x8xf32>, vector<64x8xf32>, vector<64x64xf32> -> vector<64x64xf32>
    %cst_22 = arith.constant 0.353553385 : f32
    %60 = vector.broadcast %cst_22 : f32 to vector<64x64xf32>
    %61 = arith.mulf %59, %60 : vector<64x64xf32>
    %62 = arith.addf %61, %37 : vector<64x64xf32>
    %cst_23 = arith.constant dense<0xFF800000> : vector<64xf32>
    %63 = vector.multi_reduction <maximumf>, %62, %cst_23 [1] : vector<64x64xf32> to vector<64xf32>
    %64 = vector.shape_cast %63 : vector<64xf32> to vector<64x1xf32>
    %65 = vector.broadcast %64 : vector<64x1xf32> to vector<64x64xf32>
    %66 = arith.subf %62, %65 : vector<64x64xf32>
    %67 = math.exp %66 : vector<64x64xf32>
    %cst_24 = arith.constant dense<0.000000e+00> : vector<64xf32>
    %68 = vector.multi_reduction <add>, %67, %cst_24 [1] : vector<64x64xf32> to vector<64xf32>
    %69 = vector.shape_cast %68 : vector<64xf32> to vector<64x1xf32>
    %70 = tpu.reciprocal %69 {approx = true} : vector<64x1xf32> -> vector<64x1xf32>
    %71 = vector.broadcast %70 : vector<64x1xf32> to vector<64x64xf32>
    %72 = arith.mulf %67, %71 : vector<64x64xf32>
    %cst_25 = arith.constant dense<0.000000e+00> : vector<64x8xf32>
    %73 = tpu.matmul %72, %58, %cst_25 {dimension_numbers = #tpu.dot_dimension_numbers<[1], [0], [0], [1], [0, 0, 1, 1], [], []>} : vector<64x64xf32>, vector<64x8xf32>, vector<64x8xf32> -> vector<64x8xf32>
    %74 = vector.extract_strided_slice %34 {offsets = [0, 16], sizes = [64, 8], strides = [1, 1]} : vector<64x32xf32> to vector<64x8xf32>
    %75 = vector.extract_strided_slice %35 {offsets = [0, 16], sizes = [64, 8], strides = [1, 1]} : vector<64x32xf32> to vector<64x8xf32>
    %76 = vector.extract_strided_slice %36 {offsets = [0, 16], sizes = [64, 8], strides = [1, 1]} : vector<64x32xf32> to vector<64x8xf32>
    %cst_26 = arith.constant dense<0.000000e+00> : vector<64x64xf32>
    %77 = tpu.matmul %74, %75, %cst_26 {dimension_numbers = #tpu.dot_dimension_numbers<[1], [1], [0], [0], [0, 0, 1, 0], [], []>} : vector<64x8xf32>, vector<64x8xf32>, vector<64x64xf32> -> vector<64x64xf32>
    %cst_27 = arith.constant 0.353553385 : f32
    %78 = vector.broadcast %cst_27 : f32 to vector<64x64xf32>
    %79 = arith.mulf %77, %78 : vector<64x64xf32>
    %80 = arith.addf %79, %37 : vector<64x64xf32>
    %cst_28 = arith.constant dense<0xFF800000> : vector<64xf32>
    %81 = vector.multi_reduction <maximumf>, %80, %cst_28 [1] : vector<64x64xf32> to vector<64xf32>
    %82 = vector.shape_cast %81 : vector<64xf32> to vector<64x1xf32>
    %83 = vector.broadcast %82 : vector<64x1xf32> to vector<64x64xf32>
    %84 = arith.subf %80, %83 : vector<64x64xf32>
    %85 = math.exp %84 : vector<64x64xf32>
    %cst_29 = arith.constant dense<0.000000e+00> : vector<64xf32>
    %86 = vector.multi_reduction <add>, %85, %cst_29 [1] : vector<64x64xf32> to vector<64xf32>
    %87 = vector.shape_cast %86 : vector<64xf32> to vector<64x1xf32>
    %88 = tpu.reciprocal %87 {approx = true} : vector<64x1xf32> -> vector<64x1xf32>
    %89 = vector.broadcast %88 : vector<64x1xf32> to vector<64x64xf32>
    %90 = arith.mulf %85, %89 : vector<64x64xf32>
    %cst_30 = arith.constant dense<0.000000e+00> : vector<64x8xf32>
    %91 = tpu.matmul %90, %76, %cst_30 {dimension_numbers = #tpu.dot_dimension_numbers<[1], [0], [0], [1], [0, 0, 1, 1], [], []>} : vector<64x64xf32>, vector<64x8xf32>, vector<64x8xf32> -> vector<64x8xf32>
    %92 = vector.extract_strided_slice %34 {offsets = [0, 24], sizes = [64, 8], strides = [1, 1]} : vector<64x32xf32> to vector<64x8xf32>
    %93 = vector.extract_strided_slice %35 {offsets = [0, 24], sizes = [64, 8], strides = [1, 1]} : vector<64x32xf32> to vector<64x8xf32>
    %94 = vector.extract_strided_slice %36 {offsets = [0, 24], sizes = [64, 8], strides = [1, 1]} : vector<64x32xf32> to vector<64x8xf32>
    %cst_31 = arith.constant dense<0.000000e+00> : vector<64x64xf32>
    %95 = tpu.matmul %92, %93, %cst_31 {dimension_numbers = #tpu.dot_dimension_numbers<[1], [1], [0], [0], [0, 0, 1, 0], [], []>} : vector<64x8xf32>, vector<64x8xf32>, vector<64x64xf32> -> vector<64x64xf32>
    %cst_32 = arith.constant 0.353553385 : f32
    %96 = vector.broadcast %cst_32 : f32 to vector<64x64xf32>
    %97 = arith.mulf %95, %96 : vector<64x64xf32>
    %98 = arith.addf %97, %37 : vector<64x64xf32>
    %cst_33 = arith.constant dense<0xFF800000> : vector<64xf32>
    %99 = vector.multi_reduction <maximumf>, %98, %cst_33 [1] : vector<64x64xf32> to vector<64xf32>
    %100 = vector.shape_cast %99 : vector<64xf32> to vector<64x1xf32>
    %101 = vector.broadcast %100 : vector<64x1xf32> to vector<64x64xf32>
    %102 = arith.subf %98, %101 : vector<64x64xf32>
    %103 = math.exp %102 : vector<64x64xf32>
    %cst_34 = arith.constant dense<0.000000e+00> : vector<64xf32>
    %104 = vector.multi_reduction <add>, %103, %cst_34 [1] : vector<64x64xf32> to vector<64xf32>
    %105 = vector.shape_cast %104 : vector<64xf32> to vector<64x1xf32>
    %106 = tpu.reciprocal %105 {approx = true} : vector<64x1xf32> -> vector<64x1xf32>
    %107 = vector.broadcast %106 : vector<64x1xf32> to vector<64x64xf32>
    %108 = arith.mulf %103, %107 : vector<64x64xf32>
    %cst_35 = arith.constant dense<0.000000e+00> : vector<64x8xf32>
    %109 = tpu.matmul %108, %94, %cst_35 {dimension_numbers = #tpu.dot_dimension_numbers<[1], [0], [0], [1], [0, 0, 1, 1], [], []>} : vector<64x64xf32>, vector<64x8xf32>, vector<64x8xf32> -> vector<64x8xf32>
    %110 = tpu.concatenate %55, %73, %91, %109 in 1 : vector<64x8xf32>, vector<64x8xf32>, vector<64x8xf32>, vector<64x8xf32> -> vector<64x32xf32>
    %c168 = arith.constant 168 : index
    %c0_36 = arith.constant 0 : index
    %111 = vector.load %arg2[%c168, %c0_36] : memref<600x128xf32, #tpu.memory_space<vmem>>, vector<32x32xf32>
    %cst_37 = arith.constant dense<0.000000e+00> : vector<64x32xf32>
    %112 = tpu.matmul %110, %111, %cst_37 {dimension_numbers = #tpu.dot_dimension_numbers<[1], [0], [0], [1], [0, 0, 1, 1], [], []>} : vector<64x32xf32>, vector<32x32xf32>, vector<64x32xf32> -> vector<64x32xf32>
    %113 = arith.addf %4, %112 : vector<64x32xf32>
    %c3 = arith.constant 3 : index
    %c0_38 = arith.constant 0 : index
    %114 = vector.load %arg1[%c3, %c0_38] : memref<16x448xf32, #tpu.memory_space<vmem>>, vector<1x32xf32>
    %115 = vector.broadcast %114 : vector<1x32xf32> to vector<64x32xf32>
    %116 = arith.addf %113, %115 : vector<64x32xf32>
    %c4 = arith.constant 4 : index
    %c0_39 = arith.constant 0 : index
    %117 = vector.load %arg1[%c4, %c0_39] : memref<16x448xf32, #tpu.memory_space<vmem>>, vector<1x32xf32>
    %c5 = arith.constant 5 : index
    %c0_40 = arith.constant 0 : index
    %118 = vector.load %arg1[%c5, %c0_40] : memref<16x448xf32, #tpu.memory_space<vmem>>, vector<1x32xf32>
    %cst_41 = arith.constant dense<0.000000e+00> : vector<64xf32>
    %119 = vector.multi_reduction <add>, %116, %cst_41 [1] : vector<64x32xf32> to vector<64xf32>
    %120 = vector.shape_cast %119 : vector<64xf32> to vector<64x1xf32>
    %cst_42 = arith.constant 3.200000e+01 : f32
    %121 = vector.broadcast %cst_42 : f32 to vector<64x1xf32>
    %122 = arith.divf %120, %121 : vector<64x1xf32>
    %123 = vector.broadcast %122 : vector<64x1xf32> to vector<64x32xf32>
    %124 = arith.subf %116, %123 : vector<64x32xf32>
    %125 = arith.mulf %124, %124 : vector<64x32xf32>
    %cst_43 = arith.constant dense<0.000000e+00> : vector<64xf32>
    %126 = vector.multi_reduction <add>, %125, %cst_43 [1] : vector<64x32xf32> to vector<64xf32>
    %127 = vector.shape_cast %126 : vector<64xf32> to vector<64x1xf32>
    %cst_44 = arith.constant 3.200000e+01 : f32
    %128 = vector.broadcast %cst_44 : f32 to vector<64x1xf32>
    %129 = arith.divf %127, %128 : vector<64x1xf32>
    %130 = vector.broadcast %122 : vector<64x1xf32> to vector<64x32xf32>
    %131 = arith.subf %116, %130 : vector<64x32xf32>
    %cst_45 = arith.constant 9.99999974E-6 : f32
    %132 = vector.broadcast %cst_45 : f32 to vector<64x1xf32>
    %133 = arith.addf %129, %132 : vector<64x1xf32>
    %134 = math.rsqrt %133 : vector<64x1xf32>
    %135 = vector.broadcast %134 : vector<64x1xf32> to vector<64x32xf32>
    %136 = arith.mulf %131, %135 : vector<64x32xf32>
    %137 = vector.broadcast %117 : vector<1x32xf32> to vector<64x32xf32>
    %138 = arith.mulf %136, %137 : vector<64x32xf32>
    %139 = vector.broadcast %118 : vector<1x32xf32> to vector<64x32xf32>
    %140 = arith.addf %138, %139 : vector<64x32xf32>
    %c200 = arith.constant 200 : index
    %c0_46 = arith.constant 0 : index
    %141 = vector.load %arg2[%c200, %c0_46] : memref<600x128xf32, #tpu.memory_space<vmem>>, vector<32x64xf32>
    %cst_47 = arith.constant dense<0.000000e+00> : vector<64x64xf32>
    %142 = tpu.matmul %140, %141, %cst_47 {dimension_numbers = #tpu.dot_dimension_numbers<[1], [0], [0], [1], [0, 0, 1, 1], [], []>} : vector<64x32xf32>, vector<32x64xf32>, vector<64x64xf32> -> vector<64x64xf32>
    %c6 = arith.constant 6 : index
    %c0_48 = arith.constant 0 : index
    %143 = vector.load %arg1[%c6, %c0_48] : memref<16x448xf32, #tpu.memory_space<vmem>>, vector<1x64xf32>
    %144 = vector.broadcast %143 : vector<1x64xf32> to vector<64x64xf32>
    %145 = arith.addf %142, %144 : vector<64x64xf32>
    %146 = arith.mulf %145, %145 : vector<64x64xf32>
    %147 = arith.mulf %145, %146 : vector<64x64xf32>
    %cst_49 = arith.constant 4.471500e-02 : f32
    %148 = vector.broadcast %cst_49 : f32 to vector<64x64xf32>
    %149 = arith.mulf %148, %147 : vector<64x64xf32>
    %150 = arith.addf %145, %149 : vector<64x64xf32>
    %cst_50 = arith.constant 0.797884583 : f32
    %151 = vector.broadcast %cst_50 : f32 to vector<64x64xf32>
    %152 = arith.mulf %151, %150 : vector<64x64xf32>
    %153 = math.tanh %152 : vector<64x64xf32>
    %cst_51 = arith.constant 1.000000e+00 : f32
    %154 = vector.broadcast %cst_51 : f32 to vector<64x64xf32>
    %155 = arith.addf %154, %153 : vector<64x64xf32>
    %cst_52 = arith.constant 5.000000e-01 : f32
    %156 = vector.broadcast %cst_52 : f32 to vector<64x64xf32>
    %157 = arith.mulf %156, %155 : vector<64x64xf32>
    %158 = arith.mulf %145, %157 : vector<64x64xf32>
    %c232 = arith.constant 232 : index
    %c0_53 = arith.constant 0 : index
    %159 = vector.load %arg2[%c232, %c0_53] : memref<600x128xf32, #tpu.memory_space<vmem>>, vector<64x32xf32>
    %cst_54 = arith.constant dense<0.000000e+00> : vector<64x32xf32>
    %160 = tpu.matmul %158, %159, %cst_54 {dimension_numbers = #tpu.dot_dimension_numbers<[1], [0], [0], [1], [0, 0, 1, 1], [], []>} : vector<64x64xf32>, vector<64x32xf32>, vector<64x32xf32> -> vector<64x32xf32>
    %161 = arith.addf %116, %160 : vector<64x32xf32>
    %c7 = arith.constant 7 : index
    %c0_55 = arith.constant 0 : index
    %162 = vector.load %arg1[%c7, %c0_55] : memref<16x448xf32, #tpu.memory_space<vmem>>, vector<1x32xf32>
    %163 = vector.broadcast %162 : vector<1x32xf32> to vector<64x32xf32>
    %164 = arith.addf %161, %163 : vector<64x32xf32>
    %c296 = arith.constant 296 : index
    %c0_56 = arith.constant 0 : index
    %165 = vector.load %arg2[%c296, %c0_56] : memref<600x128xf32, #tpu.memory_space<vmem>>, vector<16x64xf32>
    %cst_57 = arith.constant dense<0.000000e+00> : vector<16x32xf32>
    %166 = tpu.matmul %165, %164, %cst_57 {dimension_numbers = #tpu.dot_dimension_numbers<[1], [0], [0], [1], [0, 0, 1, 1], [], []>} : vector<16x64xf32>, vector<64x32xf32>, vector<16x32xf32> -> vector<16x32xf32>
    %c64 = arith.constant 64 : index
    %c0_58 = arith.constant 0 : index
    %167 = vector.load %arg0[%c64, %c0_58] : memref<80x36xf32, #tpu.memory_space<vmem>>, vector<16x36xf32>
    %c0_59 = arith.constant 0 : index
    %c0_60 = arith.constant 0 : index
    %168 = vector.load %arg3[%c0_59, %c0_60] : memref<408x448xf32, #tpu.memory_space<vmem>>, vector<36x192xf32>
    %cst_61 = arith.constant dense<0.000000e+00> : vector<16x192xf32>
    %169 = tpu.matmul %167, %168, %cst_61 {dimension_numbers = #tpu.dot_dimension_numbers<[1], [0], [0], [1], [0, 0, 1, 1], [], []>} : vector<16x36xf32>, vector<36x192xf32>, vector<16x192xf32> -> vector<16x192xf32>
    %c8_62 = arith.constant 8 : index
    %c0_63 = arith.constant 0 : index
    %170 = vector.load %arg1[%c8_62, %c0_63] : memref<16x448xf32, #tpu.memory_space<vmem>>, vector<1x192xf32>
    %171 = vector.broadcast %170 : vector<1x192xf32> to vector<16x192xf32>
    %172 = arith.addf %169, %171 : vector<16x192xf32>
    %c40 = arith.constant 40 : index
    %c0_64 = arith.constant 0 : index
    %173 = vector.load %arg3[%c40, %c0_64] : memref<408x448xf32, #tpu.memory_space<vmem>>, vector<192x432xf32>
    %cst_65 = arith.constant dense<0.000000e+00> : vector<16x432xf32>
    %174 = tpu.matmul %172, %173, %cst_65 {dimension_numbers = #tpu.dot_dimension_numbers<[1], [0], [0], [1], [0, 0, 1, 1], [], []>} : vector<16x192xf32>, vector<192x432xf32>, vector<16x432xf32> -> vector<16x432xf32>
    %c9 = arith.constant 9 : index
    %c0_66 = arith.constant 0 : index
    %175 = vector.load %arg1[%c9, %c0_66] : memref<16x448xf32, #tpu.memory_space<vmem>>, vector<1x432xf32>
    %176 = vector.broadcast %175 : vector<1x432xf32> to vector<16x432xf32>
    %177 = arith.addf %174, %176 : vector<16x432xf32>
    %178 = vector.extract_strided_slice %177 {offsets = [0, 0], sizes = [16, 176], strides = [1, 1]} : vector<16x432xf32> to vector<16x176xf32>
    %179 = vector.extract_strided_slice %177 {offsets = [0, 256], sizes = [16, 176], strides = [1, 1]} : vector<16x432xf32> to vector<16x176xf32>
    %180 = math.tanh %178 : vector<16x176xf32>
    %181 = arith.negf %179 : vector<16x176xf32>
    %182 = math.exp %181 : vector<16x176xf32>
    %cst_67 = arith.constant 1.000000e+00 : f32
    %183 = vector.broadcast %cst_67 : f32 to vector<16x176xf32>
    %184 = arith.addf %183, %182 : vector<16x176xf32>
    %185 = arith.divf %183, %184 : vector<16x176xf32>
    %186 = arith.mulf %180, %185 : vector<16x176xf32>
    %c312 = arith.constant 312 : index
    %c0_68 = arith.constant 0 : index
    %187 = vector.load %arg2[%c312, %c0_68] : memref<600x128xf32, #tpu.memory_space<vmem>>, vector<16x16xf32>
    %cst_69 = arith.constant dense<0.000000e+00> : vector<16x176xf32>
    %188 = tpu.matmul %187, %186, %cst_69 {dimension_numbers = #tpu.dot_dimension_numbers<[1], [0], [0], [1], [0, 0, 1, 1], [], []>} : vector<16x16xf32>, vector<16x176xf32>, vector<16x176xf32> -> vector<16x176xf32>
    %c232_70 = arith.constant 232 : index
    %c0_71 = arith.constant 0 : index
    %189 = vector.load %arg3[%c232_70, %c0_71] : memref<408x448xf32, #tpu.memory_space<vmem>>, vector<176x176xf32>
    %cst_72 = arith.constant dense<0.000000e+00> : vector<16x176xf32>
    %190 = tpu.matmul %188, %189, %cst_72 {dimension_numbers = #tpu.dot_dimension_numbers<[1], [0], [0], [1], [0, 0, 1, 1], [], []>} : vector<16x176xf32>, vector<176x176xf32>, vector<16x176xf32> -> vector<16x176xf32>
    %c10 = arith.constant 10 : index
    %c0_73 = arith.constant 0 : index
    %191 = vector.load %arg1[%c10, %c0_73] : memref<16x448xf32, #tpu.memory_space<vmem>>, vector<1x176xf32>
    %192 = vector.broadcast %191 : vector<1x176xf32> to vector<16x176xf32>
    %193 = arith.addf %190, %192 : vector<16x176xf32>
    %cst_74 = arith.constant 0.000000e+00 : f32
    %194 = vector.broadcast %cst_74 : f32 to vector<16x176xf32>
    %195 = arith.maximumf %193, %194 : vector<16x176xf32>
    %196 = arith.addf %186, %195 : vector<16x176xf32>
    %c328 = arith.constant 328 : index
    %c0_75 = arith.constant 0 : index
    %197 = vector.load %arg2[%c328, %c0_75] : memref<600x128xf32, #tpu.memory_space<vmem>>, vector<176x32xf32>
    %c504 = arith.constant 504 : index
    %c0_76 = arith.constant 0 : index
    %198 = vector.load %arg2[%c504, %c0_76] : memref<600x128xf32, #tpu.memory_space<vmem>>, vector<32x32xf32>
    %cst_77 = arith.constant dense<0.000000e+00> : vector<16x32xf32>
    %199 = tpu.matmul %196, %197, %cst_77 {dimension_numbers = #tpu.dot_dimension_numbers<[1], [0], [0], [1], [0, 0, 1, 1], [], []>} : vector<16x176xf32>, vector<176x32xf32>, vector<16x32xf32> -> vector<16x32xf32>
    %c11 = arith.constant 11 : index
    %c0_78 = arith.constant 0 : index
    %200 = vector.load %arg1[%c11, %c0_78] : memref<16x448xf32, #tpu.memory_space<vmem>>, vector<1x32xf32>
    %201 = vector.broadcast %200 : vector<1x32xf32> to vector<16x32xf32>
    %202 = arith.addf %199, %201 : vector<16x32xf32>
    %cst_79 = arith.constant dense<0.000000e+00> : vector<16x32xf32>
    %203 = tpu.matmul %166, %198, %cst_79 {dimension_numbers = #tpu.dot_dimension_numbers<[1], [0], [0], [1], [0, 0, 1, 1], [], []>} : vector<16x32xf32>, vector<32x32xf32>, vector<16x32xf32> -> vector<16x32xf32>
    %204 = arith.addf %202, %203 : vector<16x32xf32>
    %c12 = arith.constant 12 : index
    %c0_80 = arith.constant 0 : index
    %205 = vector.load %arg1[%c12, %c0_80] : memref<16x448xf32, #tpu.memory_space<vmem>>, vector<1x32xf32>
    %206 = vector.broadcast %205 : vector<1x32xf32> to vector<16x32xf32>
    %207 = arith.addf %204, %206 : vector<16x32xf32>
    %cst_81 = arith.constant 0.000000e+00 : f32
    %208 = vector.broadcast %cst_81 : f32 to vector<16x32xf32>
    %209 = arith.maximumf %207, %208 : vector<16x32xf32>
    %c536 = arith.constant 536 : index
    %c0_82 = arith.constant 0 : index
    %210 = vector.load %arg2[%c536, %c0_82] : memref<600x128xf32, #tpu.memory_space<vmem>>, vector<32x32xf32>
    %cst_83 = arith.constant dense<0.000000e+00> : vector<16x32xf32>
    %211 = tpu.matmul %209, %210, %cst_83 {dimension_numbers = #tpu.dot_dimension_numbers<[1], [0], [0], [1], [0, 0, 1, 1], [], []>} : vector<16x32xf32>, vector<32x32xf32>, vector<16x32xf32> -> vector<16x32xf32>
    %c13 = arith.constant 13 : index
    %c0_84 = arith.constant 0 : index
    %212 = vector.load %arg1[%c13, %c0_84] : memref<16x448xf32, #tpu.memory_space<vmem>>, vector<1x32xf32>
    %213 = vector.broadcast %212 : vector<1x32xf32> to vector<16x32xf32>
    %214 = arith.addf %211, %213 : vector<16x32xf32>
    %cst_85 = arith.constant 0.000000e+00 : f32
    %215 = vector.broadcast %cst_85 : f32 to vector<16x32xf32>
    %216 = arith.maximumf %214, %215 : vector<16x32xf32>
    %c568 = arith.constant 568 : index
    %c0_86 = arith.constant 0 : index
    %217 = vector.load %arg2[%c568, %c0_86] : memref<600x128xf32, #tpu.memory_space<vmem>>, vector<32x128xf32>
    %cst_87 = arith.constant dense<0.000000e+00> : vector<16x128xf32>
    %218 = tpu.matmul %216, %217, %cst_87 {dimension_numbers = #tpu.dot_dimension_numbers<[1], [0], [0], [1], [0, 0, 1, 1], [], []>} : vector<16x32xf32>, vector<32x128xf32>, vector<16x128xf32> -> vector<16x128xf32>
    %c14 = arith.constant 14 : index
    %c0_88 = arith.constant 0 : index
    %219 = vector.load %arg1[%c14, %c0_88] : memref<16x448xf32, #tpu.memory_space<vmem>>, vector<1x128xf32>
    %220 = vector.broadcast %219 : vector<1x128xf32> to vector<16x128xf32>
    %221 = arith.addf %218, %220 : vector<16x128xf32>
    %c0_89 = arith.constant 0 : index
    %c0_90 = arith.constant 0 : index
    %222 = vector.load %arg4[%c0_89, %c0_90] : memref<16x128xf32, #tpu.memory_space<vmem>>, vector<16x128xf32>
    tpu.vector_store %arg4[%c0_89, %c0_90], %221 {strides = array<i32>} : memref<16x128xf32, #tpu.memory_space<vmem>>, vector<16x128xf32>,
    return
  }
}

</mosaic_0001>

<bundles_post_ra>
// kernel: enhance_forward.1
= control target key start
LH: loop header
LB: loop body
LE: loop exit
PB: predicated region body
PF: predicated region fallthrough
CT: control target
= control target key end

     0   :  { %9 = vsyncpa [#allocation3], 0  ;;  %s5086_s0 = inlined_call_operand.vmem [shape: f32[80,36], index: 0, kind: input, shape index: {}]   ;;  %s5087_s1 = inlined_call_operand.vmem [shape: f32[16,448], index: 1, kind: input, shape index: {}]   ;;  %s5088_s2 = inlined_call_operand.hbm [shape: f32[600,128], index: 2, kind: input, shape index: {}]   ;;  %s5089_s3 = inlined_call_operand.hbm [shape: f32[408,448], index: 3, kind: input, shape index: {}]   ;;  %s5090_s4 = inlined_call_operand.hbm [shape: f32[16,128], index: 4, kind: output, shape index: {}]  }
   0x1   :  { %10 = vsyncpa [#allocation6], 0 }
   0x2   :  { %11 = vsyncpa [#allocation4], 0  ;;  %s20_s17 = sshll.u32 %s5088_s2, 4  ;;  %s3708_s18 = smov [#allocation2]   ;;  %s21_s17 = int_to_ptr.hbm [resolvable:$true] %s20_s17 }
   0x3   :  { %s22_s19 = sshll.u32 %s3708_s18, 4  ;;  %s33_s22 = sshll.u32 %s5089_s3, 4  ;;  %s23_s19 = int_to_ptr.vmem [resolvable:$true] %s22_s19  ;;  %s34_s22 = int_to_ptr.hbm [resolvable:$true] %s33_s22 }
   0x4   :  { %s3709_s23 = smov 128   ;;  %s3710_s24 = smov 8  }
   0x5   :  { %28 = dma.hbm_to_vmem [thread:$0]  %s21_s17, 9600, %s23_s19, [#allocation3], %s3709_s23, %s3709_s23, %s3710_s24  }
   0x6   :  { %s3711_s25 = smov [#allocation5]   ;;  %s3712_s27 = smov 512  }
   0x7   :  { %s35_s26 = sshll.u32 %s3711_s25, 4  ;;  %s3713_s2 = smov 32   ;;  %s36_s26 = int_to_ptr.vmem [resolvable:$true] %s35_s26 }
   0x8   :  { %41 = dma.hbm_to_vmem [thread:$0]  %s34_s22, 26112, %s36_s26, [#allocation6], %s3712_s27, %s3712_s27, %s3713_s2  }
   0x9   :  { %3702 = dma.done.wait [#allocation3], 9600  }
   0xa   :  { %3703 = vsyncadd [#allocation3], 4294957696 }
   0xb   :  { %3704 = dma.done.wait [#allocation6], 26112  }
   0xc   :  { %3705 = vsyncadd [#allocation6], 4294941184  ;;  %vm92_vm0 = vcmask 1042432   ;;  %vm67_vm1 = vcmask 23552   ;;  %v58_v0 = vld [vmem:[#allocation2] sm:$0x7] }
   0xd   :  { %v50_v1 = vld [vmem:[%s5086_s0] sm:$0xff]  ;;  %3147 = vmatpush.msk.msra.mxu0 %vm92_vm0, %v58_v0  ;;  %v51_v2 = vld [vmem:[%s5086_s0 + $0x8] sm:$0xff]  ;;  %v52_v3 = vld [vmem:[%s5086_s0 + $0x10] sm:$0xff]  ;;  %vm139_vm2 = vcmask 261120   ;;  %v3714_v37 = vmov 32.0   ;;  %s3715_s25 = smov 96  }
   0xe   :  { %3148 = vmatmul.msk.f32.vlgmr.msra.gmra.mxu0 %vm67_vm1, %v50_v1  ;;  %v53_v4 = vld [vmem:[%s5086_s0 + $0x18] sm:$0xff]  ;;  %v54_v5 = vld [vmem:[%s5086_s0 + $0x20] sm:$0xff]  ;;  %v55_v6 = vld [vmem:[%s5086_s0 + $0x28] sm:$0xff]  ;;  %3428 = vrcp.f32 %v3714_v37  ;;  %s3716_s26 = smov 64   ;;  %s3717_s27 = smov 88  }
   0xf   :  { %v56_v7 = vld [vmem:[%s5086_s0 + $0x30] sm:$0xff]  ;;  %v57_v8 = vld [vmem:[%s5086_s0 + $0x38] sm:$0xff]  ;;  %v59_v9 = vld [vmem:[#allocation2 + $0x8] sm:$0xff]  ;;  %s3718_s2 = smov 120   ;;  %s3719_s3 = smov 80  }
  0x10   :  { %v60_v13 = vld [vmem:[#allocation2 + $0x10] sm:$0xff]  ;;  %v61_v17 = vld [vmem:[#allocation2 + $0x18] sm:$0xff]  ;;  %v62_v21 = vld [vmem:[#allocation2 + $0x20] sm:$0xff]  ;;  %s3720_s28 = smov 72   ;;  %s3721_s29 = smov 112  }
  0x11   :  { %v63_v25 = vld [vmem:[#allocation2 + $0x28] sm:$0xff]  ;;  %v64_v29 = vld [vmem:[#allocation2 + $0x30] sm:$0xff]  ;;  %v65_v33 = vld [vmem:[#allocation2 + $0x38] sm:$0xff]  ;;  %s3722_s30 = smov 104   ;;  %s3723_s5 = smov 56  }
  0x12   :  { %v66_v48 = vld [vmem:[#allocation2 + $0x40] sm:$0xff]  ;;  %s3724_s6 = smov 48   ;;  %s3725_s7 = smov 40  }
  0x13   :  { %s3726_s8 = smov 24   ;;  %s3727_s9 = smov 16  }
  0x14   :  { %v3429_v38 = vpop.eup %3428  ;;  %s3728_s11 = smov [#allocation7]   ;;  %s3133_s15 = sshll.u32 %s5090_s4, 4  ;;  %s3134_s15 = int_to_ptr.hbm [resolvable:$true] %s3133_s15 }
  0x15   :  { %v165_v39 = vmul.f32 32.0, %v3429_v38  ;;  %vm169_vm3 = vweird.f32 %v3429_v38  ;;  %s3131_s12 = sshll.u32 %s3728_s11, 4  ;;  %s3132_s12 = int_to_ptr.vmem [resolvable:$true] %s3131_s12 }
  0x16   :  { %3149 = vmatmul.msk.f32.gmra.mxu0 %vm67_vm1, %v51_v2 }
  0x17   :  { %v166_v40 = vsub.f32 1.0, %v165_v39 }
  0x19   :  { %v167_v41 = vmul.f32 %v3429_v38, %v166_v40 }
  0x1b   :  { %v168_v42 = vadd.f32 %v3429_v38, %v167_v41 }
  0x1d   :  { %v3823_v43 = vsel %vm169_vm3, %v3429_v38, %v168_v42 }
  0x1e   :  { %3150 = vmatmul.msk.f32.gmra.mxu0 %vm67_vm1, %v52_v3  ;;  %5098 = vst [vmem:[#allocation13_spill] sm:$0xff] %v3823_v43 }
  0x26   :  { %3151 = vmatmul.msk.f32.gmra.mxu0 %vm67_vm1, %v53_v4 }
  0x2e   :  { %3152 = vmatmul.msk.f32.gmra.mxu0 %vm67_vm1, %v54_v5 }
  0x36   :  { %3153 = vmatmul.msk.f32.gmra.mxu0 %vm67_vm1, %v55_v6 }
  0x3e   :  { %3154 = vmatmul.msk.f32.gmra.mxu0 %vm67_vm1, %v56_v7 }
  0x46   :  { %3155 = vmatmul.msk.f32.gmra.mxu0 %vm67_vm1, %v57_v8 }
  0x8b   :  { %v113_v10 = vpop.f32.mrf.mxu0 }
  0x8c   :  { %v3795_v11 = vadd.f32 %v113_v10, %v59_v9 }
  0x8e   :  { %v140_v12 = vsel %vm139_vm2, %v3795_v11, 0.0 }
  0x8f   :  { %141 = vadd.xlane.f32.xlu0 %v140_v12 }
  0x93   :  { %v116_v14 = vpop.f32.mrf.mxu0 }
  0x94   :  { %v3799_v15 = vadd.f32 %v116_v14, %v60_v13 }
  0x96   :  { %v143_v16 = vsel %vm139_vm2, %v3799_v15, 0.0 }
  0x97   :  { %144 = vadd.xlane.f32.xlu0 %v143_v16 }
  0x9b   :  { %v119_v18 = vpop.f32.mrf.mxu0 }
  0x9c   :  { %v3803_v19 = vadd.f32 %v119_v18, %v61_v17 }
  0x9e   :  { %v146_v20 = vsel %vm139_vm2, %v3803_v19, 0.0 }
  0x9f   :  { %147 = vadd.xlane.f32.xlu1 %v146_v20 }
  0xa3   :  { %v122_v22 = vpop.f32.mrf.mxu0 }
  0xa4   :  { %v3807_v23 = vadd.f32 %v122_v22, %v62_v21  ;;  %v342_v22 = vld [vmem:[#allocation2 + $0x60] sm:$0xff] }
  0xa5   :  { %380 = vmatpush.msra.mxu1 %v342_v22 }
  0xa6   :  { %v149_v24 = vsel %vm139_vm2, %v3807_v23, 0.0 }
  0xa7   :  { %150 = vadd.xlane.f32.xlu1 %v149_v24  ;;  %v341_v24 = vld [vmem:[#allocation2 + $0x58] sm:$0xff] }
  0xa8   :  { %381 = vmatpush.msra.mxu1 %v341_v24 }
  0xab   :  { %v125_v26 = vpop.f32.mrf.mxu0 }
  0xac   :  { %v3811_v27 = vadd.f32 %v125_v26, %v63_v25  ;;  %v340_v25 = vld [vmem:[#allocation2 + $0x50] sm:$0xff]  ;;  %v339_v26 = vld [vmem:[#allocation2 + $0x48] sm:$0xff] }
  0xad   :  { %382 = vmatpush.msra.mxu1 %v340_v25 }
  0xae   :  { %v152_v28 = vsel %vm139_vm2, %v3811_v27, 0.0 }
  0xaf   :  { %153 = vadd.xlane.f32.xlu2 %v152_v28  ;;  %383 = vmatpush.msra.mxu1 %v339_v26 }
  0xb3   :  { %v128_v30 = vpop.f32.mrf.mxu0 }
  0xb4   :  { %v3815_v31 = vadd.f32 %v128_v30, %v64_v29 }
  0xb6   :  { %5096 = vst [vmem:[#allocation11_spill] sm:$0xff] %v3815_v31  ;;  %v155_v32 = vsel %vm139_vm2, %v3815_v31, 0.0 }
  0xb7   :  { %156 = vadd.xlane.f32.xlu2 %v155_v32 }
  0xbb   :  { %v131_v34 = vpop.f32.mrf.mxu0 }
  0xbc   :  { %v3819_v35 = vadd.f32 %v131_v34, %v65_v33 }
  0xbe   :  { %5097 = vst [vmem:[#allocation12_spill] sm:$0xff] %v3819_v35  ;;  %v158_v36 = vsel %vm139_vm2, %v3819_v35, 0.0 }
  0xbf   :  { %159 = vadd.xlane.f32.xlu1 %v158_v36 }
  0xc3   :  { %v134_v49 = vpop.f32.mrf.mxu0 }
  0xc4   :  { %v3833_v53 = vadd.f32 %v134_v49, %v66_v48 }
  0xc6   :  { %5099 = vst [vmem:[#allocation14_spill] sm:$0xff] %v3833_v53  ;;  %v161_v55 = vsel %vm139_vm2, %v3833_v53, 0.0 }
 0x102   :  { %v142_v44 = vpop.xlane.xlu0 %141 }
 0x103   :  { %v171_v45 = vmul.f32 %v3823_v43, %v142_v44 }
 0x105   :  { %v3827_v46 = vsub.f32 %v3795_v11, %v171_v45 }
 0x107   :  { %v187_v47 = vmul.f32 %v3827_v46, %v3827_v46 }
 0x109   :  { %v195_v50 = vsel %vm139_vm2, %v187_v47, 0.0 }
 0x10a   :  { %196 = vadd.xlane.f32.xlu0 %v195_v50  ;;  %v145_v51 = vpop.xlane.xlu0 %144 }
 0x10b   :  { %v172_v52 = vmul.f32 %v3823_v43, %v145_v51 }
 0x10d   :  { %v3836_v54 = vsub.f32 %v3799_v15, %v172_v52 }
 0x10f   :  { %v188_v56 = vmul.f32 %v3836_v54, %v3836_v54 }
 0x111   :  { %v198_v57 = vsel %vm139_vm2, %v188_v56, 0.0 }
 0x112   :  { %v148_v58 = vpop.xlane.xlu1 %147  ;;  %162 = vadd.xlane.f32.xlu0 %v161_v55  ;;  %199 = vadd.xlane.f32.xlu2 %v198_v57  ;;  %v3891_v57 = vld [vmem:[%s5087_s1] ss:$0 sm:$0xff] }
 0x113   :  { %v173_v59 = vmul.f32 %v3823_v43, %v148_v58 }
 0x115   :  { %v3845_v60 = vsub.f32 %v3803_v19, %v173_v59 }
 0x117   :  { %v189_v61 = vmul.f32 %v3845_v60, %v3845_v60 }
 0x119   :  { %v201_v62 = vsel %vm139_vm2, %v189_v61, 0.0 }
 0x11a   :  { %202 = vadd.xlane.f32.xlu1 %v201_v62  ;;  %v151_v63 = vpop.xlane.xlu1 %150 }
 0x11b   :  { %v174_v0 = vmul.f32 %v3823_v43, %v151_v63  ;;  %v3897_v63 = vld [vmem:[%s5087_s1 + $0x1] ss:$0 sm:$0xff] }
 0x11d   :  { %v3852_v1 = vsub.f32 %v3807_v23, %v174_v0 }
 0x11f   :  { %v190_v2 = vmul.f32 %v3852_v1, %v3852_v1 }
 0x121   :  { %v204_v3 = vsel %vm139_vm2, %v190_v2, 0.0 }
 0x122   :  { %v154_v4 = vpop.xlane.xlu2 %153  ;;  %205 = vadd.xlane.f32.xlu2 %v204_v3 }
 0x123   :  { %v175_v5 = vmul.f32 %v3823_v43, %v154_v4 }
 0x125   :  { %v3859_v6 = vsub.f32 %v3811_v27, %v175_v5 }
 0x127   :  { %v191_v7 = vmul.f32 %v3859_v6, %v3859_v6 }
 0x129   :  { %v207_v8 = vsel %vm139_vm2, %v191_v7, 0.0 }
 0x12a   :  { %v157_v9 = vpop.xlane.xlu2 %156  ;;  %208 = vadd.xlane.f32.xlu0 %v207_v8 }
 0x12b   :  { %v176_v10 = vmul.f32 %v3823_v43, %v157_v9 }
 0x12d   :  { %v3866_v12 = vsub.f32 %v3815_v31, %v176_v10 }
 0x12f   :  { %v192_v13 = vmul.f32 %v3866_v12, %v3866_v12 }
 0x131   :  { %v210_v14 = vsel %vm139_vm2, %v192_v13, 0.0 }
 0x132   :  { %211 = vadd.xlane.f32.xlu1 %v210_v14  ;;  %v160_v16 = vpop.xlane.xlu1 %159 }
 0x133   :  { %v177_v17 = vmul.f32 %v3823_v43, %v160_v16 }
 0x135   :  { %v3873_v18 = vsub.f32 %v3819_v35, %v177_v17 }
 0x137   :  { %v193_v20 = vmul.f32 %v3873_v18, %v3873_v18 }
 0x139   :  { %v213_v21 = vsel %vm139_vm2, %v193_v20, 0.0 }
 0x13a   :  { %214 = vadd.xlane.f32.xlu2 %v213_v21 }
 0x17d   :  { %v197_v28 = vpop.xlane.xlu0 %196 }
 0x17e   :  { %v219_v29 = vmul.f32 %v197_v28, %v3823_v43 }
 0x180   :  { %v227_v30 = vadd.f32 1e-05, %v219_v29 }
 0x182   :  { %3430 = vrsqrt.f32 %v227_v30  ;;  %vm241_vm5 = vweird.f32 %v227_v30 }
 0x185   :  { %v200_v32 = vpop.xlane.xlu2 %199  ;;  %v163_v33 = vpop.xlane.xlu0 %162 }
 0x186   :  { %v220_v34 = vmul.f32 %v200_v32, %v3823_v43  ;;  %v178_v36 = vmul.f32 %v3823_v43, %v163_v33 }
 0x188   :  { %v3431_v37 = vpop.eup %3430  ;;  %v228_v38 = vadd.f32 1e-05, %v220_v34  ;;  %v3882_v39 = vsub.f32 %v3833_v53, %v178_v36 }
 0x189   :  { %v236_v40 = vmul.f32 %v3431_v37, %v227_v30  ;;  %vm242_vm4 = vweird.f32 %v3431_v37 }
 0x18a   :  { %3432 = vrsqrt.f32 %v228_v38  ;;  %v194_v41 = vmul.f32 %v3882_v39, %v3882_v39  ;;  %vm243_vm6 = vmor %vm241_vm5, %vm242_vm4  ;;  %vm251_vm8 = vweird.f32 %v228_v38 }
 0x18b   :  { %v237_v42 = vmul.f32 %v3431_v37, %v236_v40 }
 0x18c   :  { %v216_v44 = vsel %vm139_vm2, %v194_v41, 0.0 }
 0x18d   :  { %v238_v45 = vmul.f32 0.5, %v237_v42  ;;  %v203_v47 = vpop.xlane.xlu1 %202  ;;  %217 = vadd.xlane.f32.xlu0 %v216_v44 }
 0x18e   :  { %v221_v48 = vmul.f32 %v203_v47, %v3823_v43 }
 0x18f   :  { %v239_v49 = vsub.f32 1.5, %v238_v45 }
 0x190   :  { %v3433_v50 = vpop.eup %3432  ;;  %v229_v51 = vadd.f32 1e-05, %v221_v48 }
 0x191   :  { %v240_v52 = vmul.f32 %v3431_v37, %v239_v49  ;;  %v246_v55 = vmul.f32 %v3433_v50, %v228_v38  ;;  %vm252_vm7 = vweird.f32 %v3433_v50 }
 0x192   :  { %3434 = vrsqrt.f32 %v229_v51  ;;  %vm253_vm9 = vmor %vm251_vm8, %vm252_vm7  ;;  %vm261_vm11 = vweird.f32 %v229_v51 }
 0x193   :  { %v247_v56 = vmul.f32 %v3433_v50, %v246_v55  ;;  %v244_v58 = vsel %vm243_vm6, %v3431_v37, %v240_v52 }
 0x194   :  { %v315_v59 = vmul.f32 %v244_v58, %v3827_v46 }
 0x195   :  { %v248_v61 = vmul.f32 0.5, %v247_v56  ;;  %v206_v62 = vpop.xlane.xlu2 %205 }
 0x196   :  { %v222_v0 = vmul.f32 %v206_v62, %v3823_v43  ;;  %v323_v2 = vmul.f32 %v315_v59, %v3891_v57 }
 0x197   :  { %v249_v3 = vsub.f32 1.5, %v248_v61 }
 0x198   :  { %v3435_v4 = vpop.eup %3434  ;;  %v230_v5 = vadd.f32 1e-05, %v222_v0  ;;  %v331_v7 = vadd.f32 %v323_v2, %v3897_v63 }
 0x199   :  { %v250_v8 = vmul.f32 %v3433_v50, %v249_v3  ;;  %v256_v46 = vmul.f32 %v3435_v4, %v229_v51  ;;  %vm262_vm10 = vweird.f32 %v3435_v4 }
 0x19a   :  { %3436 = vrsqrt.f32 %v230_v5  ;;  %3156 = vmatmul.msk.f32.vlgmr.msra.gmra.mxu1 %vm139_vm2, %v331_v7  ;;  %vm263_vm12 = vmor %vm261_vm11, %vm262_vm10  ;;  %vm271_vm14 = vweird.f32 %v230_v5 }
 0x19b   :  { %v257_v9 = vmul.f32 %v3435_v4, %v256_v46  ;;  %v254_v10 = vsel %vm253_vm9, %v3433_v50, %v250_v8 }
 0x19c   :  { %v316_v13 = vmul.f32 %v254_v10, %v3836_v54 }
 0x19d   :  { %v258_v14 = vmul.f32 0.5, %v257_v9  ;;  %v209_v16 = vpop.xlane.xlu0 %208 }
 0x19e   :  { %v223_v17 = vmul.f32 %v209_v16, %v3823_v43  ;;  %v324_v20 = vmul.f32 %v316_v13, %v3891_v57 }
 0x19f   :  { %v259_v21 = vsub.f32 1.5, %v258_v14 }
 0x1a0   :  { %v3437_v22 = vpop.eup %3436  ;;  %v231_v24 = vadd.f32 1e-05, %v223_v17  ;;  %v332_v25 = vadd.f32 %v324_v20, %v3897_v63 }
 0x1a1   :  { %v260_v26 = vmul.f32 %v3435_v4, %v259_v21  ;;  %v266_v28 = vmul.f32 %v3437_v22, %v230_v5  ;;  %vm272_vm13 = vweird.f32 %v3437_v22 }
 0x1a2   :  { %3438 = vrsqrt.f32 %v231_v24  ;;  %3157 = vmatmul.msk.f32.gmra.mxu1 %vm139_vm2, %v332_v25  ;;  %vm273_vm15 = vmor %vm271_vm14, %vm272_vm13  ;;  %vm281_vm1 = vweird.f32 %v231_v24  ;;  %vm441_vm13 = vcmask 64512   ;;  %vm531_vm14 = vcmask 523264  }
 0x1a3   :  { %v267_v54 = vmul.f32 %v3437_v22, %v266_v28  ;;  %v264_v29 = vsel %vm263_vm12, %v3435_v4, %v260_v26 }
 0x1a4   :  { %v317_v30 = vmul.f32 %v264_v29, %v3845_v60 }
 0x1a5   :  { %v268_v32 = vmul.f32 0.5, %v267_v54  ;;  %v212_v33 = vpop.xlane.xlu1 %211 }
 0x1a6   :  { %v224_v34 = vmul.f32 %v212_v33, %v3823_v43  ;;  %v325_v36 = vmul.f32 %v317_v30, %v3891_v57 }
 0x1a7   :  { %v269_v37 = vsub.f32 1.5, %v268_v32 }
 0x1a8   :  { %v3439_v38 = vpop.eup %3438  ;;  %v232_v40 = vadd.f32 1e-05, %v224_v34  ;;  %v333_v41 = vadd.f32 %v325_v36, %v3897_v63 }
 0x1a9   :  { %v270_v42 = vmul.f32 %v3437_v22, %v269_v37  ;;  %v276_v44 = vmul.f32 %v3439_v38, %v231_v24  ;;  %vm282_vm0 = vweird.f32 %v3439_v38 }
 0x1aa   :  { %3440 = vrsqrt.f32 %v232_v40  ;;  %3158 = vmatmul.msk.f32.gmra.mxu1 %vm139_vm2, %v333_v41  ;;  %vm283_vm3 = vmor %vm281_vm1, %vm282_vm0  ;;  %vm291_vm5 = vweird.f32 %v232_v40  ;;  %vm1716_vm0 = vcmask 195584  }
 0x1ab   :  { %v277_v60 = vmul.f32 %v3439_v38, %v276_v44  ;;  %v274_v45 = vsel %vm273_vm15, %v3437_v22, %v270_v42  ;;  %vm1707_vm15 = vcmask 130048  }
 0x1ac   :  { %v318_v47 = vmul.f32 %v274_v45, %v3852_v1  ;;  %v343_v45 = vld [vmem:[%s5087_s1 + $0x2] ss:$0 sm:$0xff] }
 0x1ad   :  { %v278_v48 = vmul.f32 0.5, %v277_v60  ;;  %v215_v49 = vpop.xlane.xlu2 %214 }
 0x1ae   :  { %v225_v50 = vmul.f32 %v215_v49, %v3823_v43  ;;  %v326_v51 = vmul.f32 %v318_v47, %v3891_v57 }
 0x1af   :  { %v279_v52 = vsub.f32 1.5, %v278_v48 }
 0x1b0   :  { %v3441_v55 = vpop.eup %3440  ;;  %v233_v56 = vadd.f32 1e-05, %v225_v50  ;;  %v334_v58 = vadd.f32 %v326_v51, %v3897_v63 }
 0x1b1   :  { %v280_v59 = vmul.f32 %v3439_v38, %v279_v52  ;;  %v286_v61 = vmul.f32 %v3441_v55, %v232_v40  ;;  %vm292_vm4 = vweird.f32 %v3441_v55 }
 0x1b2   :  { %3442 = vrsqrt.f32 %v233_v56  ;;  %3159 = vmatmul.msk.f32.gmra.mxu1 %vm139_vm2, %v334_v58  ;;  %vm293_vm6 = vmor %vm291_vm5, %vm292_vm4  ;;  %vm301_vm8 = vweird.f32 %v233_v56 }
 0x1b3   :  { %v287_v1 = vmul.f32 %v3441_v55, %v286_v61  ;;  %v284_v62 = vsel %vm283_vm3, %v3439_v38, %v280_v59 }
 0x1b4   :  { %v319_v0 = vmul.f32 %v284_v62, %v3859_v6 }
 0x1b5   :  { %v288_v2 = vmul.f32 0.5, %v287_v1 }
 0x1b6   :  { %v327_v3 = vmul.f32 %v319_v0, %v3891_v57 }
 0x1b7   :  { %v289_v4 = vsub.f32 1.5, %v288_v2 }
 0x1b8   :  { %v3443_v5 = vpop.eup %3442  ;;  %v335_v7 = vadd.f32 %v327_v3, %v3897_v63 }
 0x1b9   :  { %v290_v8 = vmul.f32 %v3441_v55, %v289_v4  ;;  %v296_v46 = vmul.f32 %v3443_v5, %v233_v56  ;;  %vm302_vm7 = vweird.f32 %v3443_v5 }
 0x1ba   :  { %3160 = vmatmul.msk.f32.gmra.mxu1 %vm139_vm2, %v335_v7  ;;  %vm303_vm9 = vmor %vm301_vm8, %vm302_vm7 }
 0x1bb   :  { %v297_v9 = vmul.f32 %v3443_v5, %v296_v46  ;;  %v294_v10 = vsel %vm293_vm6, %v3441_v55, %v290_v8 }
 0x1bc   :  { %v320_v13 = vmul.f32 %v294_v10, %v3866_v12 }
 0x1bd   :  { %v298_v14 = vmul.f32 0.5, %v297_v9 }
 0x1be   :  { %v328_v6 = vmul.f32 %v320_v13, %v3891_v57 }
 0x1bf   :  { %v299_v16 = vsub.f32 1.5, %v298_v14 }
 0x1c0   :  { %v336_v17 = vadd.f32 %v328_v6, %v3897_v63 }
 0x1c1   :  { %v300_v20 = vmul.f32 %v3443_v5, %v299_v16 }
 0x1c2   :  { %3161 = vmatmul.msk.f32.gmra.mxu1 %vm139_vm2, %v336_v17 }
 0x1c3   :  { %v304_v21 = vsel %vm303_vm9, %v3443_v5, %v300_v20 }
 0x1c4   :  { %v321_v22 = vmul.f32 %v304_v21, %v3873_v18 }
 0x1c6   :  { %v329_v24 = vmul.f32 %v321_v22, %v3891_v57 }
 0x1c8   :  { %v337_v25 = vadd.f32 %v329_v24, %v3897_v63 }
 0x1ca   :  { %3162 = vmatmul.msk.f32.gmra.mxu1 %vm139_vm2, %v337_v25 }
 0x200   :  { %v218_v12 = vpop.xlane.xlu0 %217 }
 0x201   :  { %v226_v26 = vmul.f32 %v218_v12, %v3823_v43 }
 0x203   :  { %v234_v28 = vadd.f32 1e-05, %v226_v26 }
 0x205   :  { %3444 = vrsqrt.f32 %v234_v28  ;;  %vm311_vm11 = vweird.f32 %v234_v28 }
 0x20b   :  { %v3445_v54 = vpop.eup %3444 }
 0x20c   :  { %v306_v29 = vmul.f32 %v3445_v54, %v234_v28  ;;  %vm312_vm10 = vweird.f32 %v3445_v54 }
 0x20d   :  { %vm313_vm12 = vmor %vm311_vm11, %vm312_vm10 }
 0x20e   :  { %v307_v30 = vmul.f32 %v3445_v54, %v306_v29 }
 0x210   :  { %v308_v32 = vmul.f32 0.5, %v307_v30 }
 0x212   :  { %v309_v33 = vsub.f32 1.5, %v308_v32 }
 0x214   :  { %v310_v34 = vmul.f32 %v3445_v54, %v309_v33 }
 0x216   :  { %v314_v18 = vsel %vm313_vm12, %v3445_v54, %v310_v34 }
 0x217   :  { %v385_v36 = vpop.f32.mrf.mxu1  ;;  %v322_v37 = vmul.f32 %v314_v18, %v3882_v39 }
 0x218   :  { %v3980_v56 = vadd.f32 %v385_v36, %v343_v45 }
 0x219   :  { %v330_v38 = vmul.f32 %v322_v37, %v3891_v57 }
 0x21b   :  { %v338_v40 = vadd.f32 %v330_v38, %v3897_v63 }
 0x21d   :  { %3163 = vmatmul.msk.f32.gmra.mxu1 %vm139_vm2, %v338_v40 }
 0x21f   :  { %v388_v41 = vpop.f32.mrf.mxu1 }
 0x220   :  { %v3960_v51 = vadd.f32 %v388_v41, %v343_v45 }
 0x222   :  { %v3984_v58 = vpack.i.bf16 %v3980_v56, %v3960_v51 }
 0x227   :  { %v391_v42 = vpop.f32.mrf.mxu1 }
 0x228   :  { %v3942_v57 = vadd.f32 %v391_v42, %v343_v45 }
 0x22f   :  { %v394_v44 = vpop.f32.mrf.mxu1 }
 0x230   :  { %v3966_v52 = vadd.f32 %v394_v44, %v343_v45 }
 0x232   :  { %v3970_v55 = vpack.i.bf16 %v3942_v57, %v3966_v52 }
 0x237   :  { %v397_v60 = vpop.f32.mrf.mxu1 }
 0x238   :  { %v3950_v49 = vadd.f32 %v397_v60, %v343_v45 }
 0x23f   :  { %v400_v47 = vpop.f32.mrf.mxu1 }
 0x240   :  { %v3938_v48 = vadd.f32 %v400_v47, %v343_v45 }
 0x242   :  { %435 = vrot.lane.b32.xlu0 %v3938_v48, %s3715_s25  ;;  %v3954_v50 = vpack.i.bf16 %v3950_v49, %v3938_v48 }
 0x247   :  { %v403_v39 = vpop.f32.mrf.mxu1 }
 0x248   :  { %v3944_v63 = vadd.f32 %v403_v39, %v343_v45 }
 0x24a   :  { %437 = vrot.lane.b32.xlu2 %v3944_v63, %s3715_s25  ;;  %429 = vrot.lane.b32.xlu0 %v3942_v57, %s3715_s25 }
 0x252   :  { %3349 = vrot.lane.b32.xlu0 %v3954_v50, %s3716_s26  ;;  %433 = vrot.lane.b32.xlu2 %v3950_v49, %s3715_s25 }
 0x25a   :  { %735 = vrot.lane.b32.xlu0 %v3938_v48, %s3717_s27  ;;  %427 = vrot.lane.b32.xlu2 %v3960_v51, %s3715_s25 }
 0x262   :  { %3354 = vrot.lane.b32.xlu0 %v3970_v55, %s3716_s26  ;;  %731 = vrot.lane.b32.xlu2 %v3966_v52, %s3717_s27 }
 0x26a   :  { %733 = vrot.lane.b32.xlu0 %v3950_v49, %s3717_s27  ;;  %713 = vrot.lane.b32.xlu2 %v3942_v57, %s3718_s2 }
 0x272   :  { %3359 = vrot.lane.b32.xlu0 %v3984_v58, %s3716_s26  ;;  %717 = vrot.lane.b32.xlu2 %v3950_v49, %s3718_s2 }
 0x27a   :  { %727 = vrot.lane.b32.xlu0 %v3960_v51, %s3717_s27  ;;  %1029 = vrot.lane.b32.xlu2 %v3966_v52, %s3719_s3 }
 0x282   :  { %711 = vrot.lane.b32.xlu0 %v3960_v51, %s3718_s2  ;;  %719 = vrot.lane.b32.xlu2 %v3938_v48, %s3718_s2 }
 0x28a   :  { %715 = vrot.lane.b32.xlu0 %v3966_v52, %s3718_s2  ;;  %1027 = vrot.lane.b32.xlu2 %v3942_v57, %s3719_s3 }
 0x292   :  { %1333 = vrot.lane.b32.xlu0 %v3944_v63, %s3720_s28  ;;  %1329 = vrot.lane.b32.xlu2 %v3950_v49, %s3720_s28 }
 0x29a   :  { %1331 = vrot.lane.b32.xlu0 %v3938_v48, %s3720_s28  ;;  %1023 = vrot.lane.b32.xlu2 %v3980_v56, %s3719_s3  ;;  %v406_v59 = vpop.f32.mrf.mxu1 }
 0x29b   :  { %v4010_v61 = vadd.f32 %v406_v59, %v343_v45 }
 0x29d   :  { %439 = vrot.lane.b32.xlu1 %v4010_v61, %s3715_s25  ;;  %v4054_v8 = vpack.i.bf16 %v3944_v63, %v4010_v61 }
 0x2a2   :  { %721 = vrot.lane.b32.xlu0 %v3944_v63, %s3718_s2  ;;  %1007 = vrot.lane.b32.xlu2 %v3980_v56, %s3721_s29 }
 0x2a4   :  { %v438_v1 = vpop.permute.xlu2 %437 }
 0x2a5   :  { %431 = vrot.lane.b32.xlu1 %v3966_v52, %s3715_s25 }
 0x2aa   :  { %1327 = vrot.lane.b32.xlu0 %v3966_v52, %s3720_s28  ;;  %1321 = vrot.lane.b32.xlu2 %v3980_v56, %s3720_s28 }
 0x2ac   :  { %v434_v62 = vpop.permute.xlu2 %433 }
 0x2ad   :  { %425 = vrot.lane.b32.xlu1 %v3980_v56, %s3715_s25 }
 0x2b2   :  { %1325 = vrot.lane.b32.xlu0 %v3942_v57, %s3720_s28  ;;  %1307 = vrot.lane.b32.xlu2 %v3960_v51, %s3722_s30 }
 0x2b4   :  { %v4030_v0 = vpop.permute.xlu2 %427  ;;  %v436_v2 = vpop.permute.xlu0 %435 }
 0x2b5   :  { %737 = vrot.lane.b32.xlu1 %v3944_v63, %s3717_s27 }
 0x2ba   :  { %1009 = vrot.lane.b32.xlu0 %v3960_v51, %s3721_s29  ;;  %1015 = vrot.lane.b32.xlu2 %v3950_v49, %s3721_s29 }
 0x2bc   :  { %v4038_v3 = vpop.permute.xlu2 %731  ;;  %v430_v4 = vpop.permute.xlu0 %429 }
 0x2bd   :  { %729 = vrot.lane.b32.xlu1 %v3942_v57, %s3717_s27 }
 0x2c2   :  { %1011 = vrot.lane.b32.xlu0 %v3942_v57, %s3721_s29  ;;  %1313 = vrot.lane.b32.xlu2 %v3950_v49, %s3722_s30 }
 0x2c4   :  { %v4046_v5 = vpop.permute.xlu2 %713  ;;  %v4048_v7 = vpop.permute.xlu0 %3349 }
 0x2c5   :  { %725 = vrot.lane.b32.xlu1 %v3980_v56, %s3717_s27  ;;  %v3351_v60 = vunpack.i.l.bf16 %v4048_v7  ;;  %v3352_v45 = vunpack.i.h.bf16 %v4048_v7 }
 0x2ca   :  { %1309 = vrot.lane.b32.xlu0 %v3942_v57, %s3722_s30  ;;  %3364 = vrot.lane.b32.xlu2 %v4054_v8, %s3716_s26 }
 0x2cc   :  { %v4060_v46 = vpop.permute.xlu2 %717  ;;  %v4062_v9 = vpop.permute.xlu0 %735 }
 0x2cd   :  { %709 = vrot.lane.b32.xlu1 %v3980_v56, %s3718_s2 }
 0x2d2   :  { %1017 = vrot.lane.b32.xlu0 %v3938_v48, %s3721_s29  ;;  %1335 = vrot.lane.b32.xlu2 %v4010_v61, %s3720_s28 }
 0x2d4   :  { %v4070_v10 = vpop.permute.xlu2 %1029  ;;  %v3355_v13 = vpop.permute.xlu0 %3354 }
 0x2d5   :  { %1035 = vrot.lane.b32.xlu1 %v3944_v63, %s3719_s3  ;;  %v3356_v39 = vunpack.i.l.bf16 %v3355_v13 }
 0x2da   :  { %723 = vrot.lane.b32.xlu2 %v4010_v61, %s3718_s2  ;;  %739 = vrot.lane.b32.xlu0 %v4010_v61, %s3717_s27 }
 0x2dc   :  { %v4078_v14 = vpop.permute.xlu2 %719  ;;  %v4080_v6 = vpop.permute.xlu0 %733 }
 0x2dd   :  { %1033 = vrot.lane.b32.xlu1 %v3938_v48, %s3719_s3 }
 0x2e4   :  { %v4084_v16 = vpop.permute.xlu2 %1027  ;;  %v3360_v17 = vpop.permute.xlu0 %3359 }
 0x2e5   :  { %1031 = vrot.lane.b32.xlu1 %v3950_v49, %s3719_s3 }
 0x2ec   :  { %v4088_v20 = vpop.permute.xlu2 %1329  ;;  %v4090_v21 = vpop.permute.xlu0 %727 }
 0x2ed   :  { %1025 = vrot.lane.b32.xlu1 %v3960_v51, %s3719_s3 }
 0x2f4   :  { %v4094_v22 = vpop.permute.xlu2 %1023  ;;  %v4096_v24 = vpop.permute.xlu0 %711 }
 0x2f5   :  { %1323 = vrot.lane.b32.xlu1 %v3960_v51, %s3720_s28 }
 0x2fc   :  { %v4100_v25 = vpop.permute.xlu2 %1007  ;;  %v4102_v12 = vpop.permute.xlu0 %715 }
 0x2fd   :  { %1305 = vrot.lane.b32.xlu1 %v3980_v56, %s3722_s30 }
 0x304   :  { %v4106_v26 = vpop.permute.xlu2 %1321  ;;  %v4108_v28 = vpop.permute.xlu0 %1333 }
 0x305   :  { %1013 = vrot.lane.b32.xlu1 %v3966_v52, %s3721_s29 }
 0x30c   :  { %v4112_v54 = vpop.permute.xlu2 %1307  ;;  %v4114_v29 = vpop.permute.xlu0 %1331 }
 0x30d   :  { %1311 = vrot.lane.b32.xlu1 %v3966_v52, %s3722_s30 }
 0x30f   :  { %v440_v30 = vpop.permute.xlu1 %439 }
 0x310   :  { %3164 = vmatpush.xpose.msk.msra.mxu2 %vm441_vm13, %v440_v30 }
 0x314   :  { %v4119_v32 = vpop.permute.xlu2 %1015  ;;  %3165 = vmatpush.xpose.msk.msra.mxu2 %vm441_vm13, %v438_v1  ;;  %v4122_v33 = vpop.permute.xlu0 %721  ;;  %v3357_v1 = vunpack.i.h.bf16 %v3355_v13 }
 0x315   :  { %1037 = vrot.lane.b32.xlu1 %v4010_v61, %s3719_s3 }
 0x317   :  { %v432_v34 = vpop.permute.xlu1 %431 }
 0x318   :  { %3166 = vmatpush.xpose.msk.msra.mxu2 %vm441_vm13, %v436_v2 }
 0x31c   :  { %v4127_v18 = vpop.permute.xlu2 %1313  ;;  %3167 = vmatpush.xpose.msk.msra.mxu2 %vm441_vm13, %v434_v62  ;;  %v4130_v36 = vpop.permute.xlu0 %1327  ;;  %v3361_v62 = vunpack.i.l.bf16 %v3360_v17 }
 0x31f   :  { %v426_v37 = vpop.permute.xlu1 %425 }
 0x320   :  { %3168 = vmatpush.xpose.msk.msra.mxu2 %vm441_vm13, %v432_v34 }
 0x324   :  { %v3365_v38 = vpop.permute.xlu2 %3364  ;;  %3169 = vmatpush.xpose.msk.msra.mxu2 %vm441_vm13, %v430_v4  ;;  %v1326_v40 = vpop.permute.xlu0 %1325 }
 0x325   :  { %v3366_v41 = vunpack.i.l.bf16 %v3365_v38  ;;  %v3367_v44 = vunpack.i.h.bf16 %v3365_v38 }
 0x327   :  { %676 = vmatpush.msra.mxu3 %v3366_v41  ;;  %v738_v42 = vpop.permute.xlu1 %737 }
 0x328   :  { %3170 = vmatpush.xpose.msk.msra.mxu2 %vm441_vm13, %v4030_v0  ;;  %v3362_v0 = vunpack.i.h.bf16 %v3360_v17 }
 0x329   :  { %677 = vmatpush.msra.mxu3 %v3367_v44 }
 0x32b   :  { %678 = vmatpush.msra.mxu3 %v3351_v60 }
 0x32c   :  { %3171 = vmatpush.xpose.msk.msra.mxu2 %vm441_vm13, %v426_v37  ;;  %v4139_v47 = vpop.permute.xlu0 %1009 }
 0x32d   :  { %679 = vmatpush.msra.mxu3 %v3352_v45  ;;  %v4239_v45 = vld [vmem:[#allocation2 + $0x88] sm:$0xff] }
 0x32f   :  { %v730_v59 = vpop.permute.xlu1 %729  ;;  %3172 = vmatmul.msk.f32.vlgmr.msra.gmra.mxu2 %vm441_vm13, %v3980_v56  ;;  %680 = vmatpush.msra.mxu3 %v3356_v39 }
 0x331   :  { %681 = vmatpush.msra.mxu3 %v3357_v1 }
 0x333   :  { %682 = vmatpush.msra.mxu3 %v3361_v62 }
 0x334   :  { %v4143_v2 = vpop.permute.xlu0 %1011 }
 0x335   :  { %683 = vmatpush.msra.mxu3 %v3362_v0  ;;  %v4247_v0 = vld [vmem:[#allocation2 + $0x90] sm:$0xff] }
 0x337   :  { %v726_v4 = vpop.permute.xlu1 %725  ;;  %3173 = vmatmul.msk.f32.gmra.mxu2 %vm441_vm13, %v3960_v51 }
 0x33c   :  { %v4147_v7 = vpop.permute.xlu0 %1309 }
 0x33f   :  { %v710_v30 = vpop.permute.xlu1 %709  ;;  %3174 = vmatmul.msk.f32.gmra.mxu2 %vm441_vm13, %v3942_v57 }
 0x344   :  { %v4151_v56 = vpop.permute.xlu0 %1017 }
 0x347   :  { %v1036_v13 = vpop.permute.xlu1 %1035  ;;  %3175 = vmatmul.msk.f32.gmra.mxu2 %vm441_vm13, %v3966_v52  ;;  %v1336_v52 = vpop.permute.xlu2 %1335 }
 0x34c   :  { %v740_v17 = vpop.permute.xlu0 %739 }
 0x34d   :  { %3188 = vmatpush.xpose.msk.msrb.mxu0 %vm441_vm13, %v740_v17  ;;  %v4251_v17 = vld [vmem:[#allocation2 + $0x98] sm:$0xff] }
 0x34f   :  { %v1034_v34 = vpop.permute.xlu1 %1033  ;;  %3176 = vmatmul.msk.f32.gmra.mxu2 %vm441_vm13, %v3950_v49 }
 0x351   :  { %3189 = vmatpush.xpose.msk.msrb.mxu0 %vm441_vm13, %v738_v42 }
 0x355   :  { %3190 = vmatpush.xpose.msk.msrb.mxu0 %vm441_vm13, %v4062_v9 }
 0x357   :  { %v1032_v51 = vpop.permute.xlu1 %1031  ;;  %3177 = vmatmul.msk.f32.gmra.mxu2 %vm441_vm13, %v3938_v48 }
 0x359   :  { %3191 = vmatpush.xpose.msk.msrb.mxu0 %vm441_vm13, %v4080_v6 }
 0x35d   :  { %3192 = vmatpush.xpose.msk.msrb.mxu0 %vm441_vm13, %v4038_v3 }
 0x35f   :  { %v1026_v57 = vpop.permute.xlu1 %1025  ;;  %3178 = vmatmul.msk.f32.gmra.mxu2 %vm441_vm13, %v3944_v63 }
 0x361   :  { %3193 = vmatpush.xpose.msk.msrb.mxu0 %vm441_vm13, %v730_v59 }
 0x365   :  { %3194 = vmatpush.xpose.msk.msrb.mxu0 %vm441_vm13, %v4090_v21 }
 0x367   :  { %v1324_v49 = vpop.permute.xlu1 %1323  ;;  %3179 = vmatmul.msk.f32.gmra.mxu2 %vm441_vm13, %v4010_v61 }
 0x369   :  { %3195 = vmatpush.xpose.msk.msrb.mxu0 %vm441_vm13, %v726_v4 }
 0x36c   :  { %3196 = vmatmul.msk.f32.vlgmr.msrb.gmra.mxu0 %vm441_vm13, %v710_v30 }
 0x36d   :  { %3236 = vmatpush.xpose.msk.msra.mxu0 %vm441_vm13, %v1336_v52 }
 0x36f   :  { %v1306_v3 = vpop.permute.xlu1 %1305 }
 0x371   :  { %3237 = vmatpush.xpose.msk.msra.mxu0 %vm441_vm13, %v4108_v28 }
 0x374   :  { %3197 = vmatmul.msk.f32.gmra.mxu0 %vm441_vm13, %v4096_v24 }
 0x375   :  { %3238 = vmatpush.xpose.msk.msra.mxu0 %vm441_vm13, %v4114_v29 }
 0x377   :  { %v4185_v9 = vpop.permute.xlu1 %1013 }
 0x379   :  { %3239 = vmatpush.xpose.msk.msra.mxu0 %vm441_vm13, %v4088_v20 }
 0x37c   :  { %3198 = vmatmul.msk.f32.gmra.mxu0 %vm441_vm13, %v4046_v5  ;;  %v724_v5 = vpop.permute.xlu2 %723 }
 0x37d   :  { %3240 = vmatpush.xpose.msk.msra.mxu0 %vm441_vm13, %v4130_v36 }
 0x37f   :  { %v1312_v6 = vpop.permute.xlu1 %1311 }
 0x381   :  { %3241 = vmatpush.xpose.msk.msra.mxu0 %vm441_vm13, %v1326_v40  ;;  %v4233_v40 = vld [vmem:[#allocation2 + $0x80] sm:$0xff] }
 0x384   :  { %3199 = vmatmul.msk.f32.gmra.mxu0 %vm441_vm13, %v4102_v12  ;;  %v4222_v12 = vld [vmem:[#allocation2 + $0x70] sm:$0xff] }
 0x385   :  { %3242 = vmatpush.xpose.msk.msra.mxu0 %vm441_vm13, %v1324_v49 }
 0x387   :  { %v1038_v20 = vpop.permute.xlu1 %1037 }
 0x388   :  { %3212 = vmatpush.xpose.msk.msrb.mxu3 %vm441_vm13, %v1038_v20 }
 0x389   :  { %3243 = vmatpush.xpose.msk.msra.mxu0 %vm441_vm13, %v4106_v26 }
 0x38c   :  { %3200 = vmatmul.msk.f32.gmra.mxu0 %vm441_vm13, %v4060_v46  ;;  %3213 = vmatpush.xpose.msk.msrb.mxu3 %vm441_vm13, %v1036_v13 }
 0x390   :  { %3214 = vmatpush.xpose.msk.msrb.mxu3 %vm441_vm13, %v1034_v34 }
 0x394   :  { %3201 = vmatmul.msk.f32.gmra.mxu0 %vm441_vm13, %v4078_v14  ;;  %3215 = vmatpush.xpose.msk.msrb.mxu3 %vm441_vm13, %v1032_v51  ;;  %v4216_v14 = vld [vmem:[#allocation2 + $0x68] sm:$0xff] }
 0x398   :  { %3216 = vmatpush.xpose.msk.msrb.mxu3 %vm441_vm13, %v4070_v10 }
 0x39c   :  { %3202 = vmatmul.msk.f32.gmra.mxu0 %vm441_vm13, %v4122_v33  ;;  %3217 = vmatpush.xpose.msk.msrb.mxu3 %vm441_vm13, %v4084_v16 }
 0x3a0   :  { %3218 = vmatpush.xpose.msk.msrb.mxu3 %vm441_vm13, %v1026_v57 }
 0x3a4   :  { %3203 = vmatmul.msk.f32.gmra.mxu0 %vm441_vm13, %v724_v5  ;;  %3219 = vmatpush.xpose.msk.msrb.mxu3 %vm441_vm13, %v4094_v22 }
 0x3ac   :  { %3244 = vmatmul.msk.f32.vlgmr.msra.gmra.mxu0 %vm441_vm13, %v1306_v3 }
 0x3b2   :  { %v491_v46 = vpop.f32.mrf.mxu2 }
 0x3b3   :  { %v515_v10 = vmul.f32 0.35355338, %v491_v46 }
 0x3b4   :  { %3245 = vmatmul.msk.f32.gmra.mxu0 %vm441_vm13, %v4112_v54  ;;  %v4228_v54 = vld [vmem:[#allocation2 + $0x78] sm:$0xff] }
 0x3b5   :  { %v523_v16 = vadd.f32 %v515_v10, %v4216_v14 }
 0x3b7   :  { %v532_v21 = vsel %vm531_vm14, %v523_v16, -inf }
 0x3b8   :  { %533 = vmax.xlane.f32.xlu0 %v532_v21 }
 0x3ba   :  { %v494_v24 = vpop.f32.mrf.mxu2 }
 0x3bb   :  { %v516_v26 = vmul.f32 0.35355338, %v494_v24 }
 0x3bc   :  { %3246 = vmatmul.msk.f32.gmra.mxu0 %vm441_vm13, %v4147_v7 }
 0x3bd   :  { %v524_v22 = vadd.f32 %v516_v26, %v4222_v12 }
 0x3bf   :  { %v535_v28 = vsel %vm531_vm14, %v524_v22, -inf }
 0x3c0   :  { %536 = vmax.xlane.f32.xlu2 %v535_v28 }
 0x3c2   :  { %v497_v29 = vpop.f32.mrf.mxu2 }
 0x3c3   :  { %v517_v33 = vmul.f32 0.35355338, %v497_v29 }
 0x3c4   :  { %3247 = vmatmul.msk.f32.gmra.mxu0 %vm441_vm13, %v1312_v6 }
 0x3c5   :  { %v525_v36 = vadd.f32 %v517_v33, %v4228_v54 }
 0x3c7   :  { %v538_v37 = vsel %vm531_vm14, %v525_v36, -inf }
 0x3c8   :  { %539 = vmax.xlane.f32.xlu1 %v538_v37 }
 0x3ca   :  { %v500_v38 = vpop.f32.mrf.mxu2 }
 0x3cb   :  { %v518_v41 = vmul.f32 0.35355338, %v500_v38 }
 0x3cc   :  { %3248 = vmatmul.msk.f32.gmra.mxu0 %vm441_vm13, %v4127_v18 }
 0x3cd   :  { %v526_v42 = vadd.f32 %v518_v41, %v4233_v40 }
 0x3cf   :  { %v541_v44 = vsel %vm531_vm14, %v526_v42, -inf }
 0x3d0   :  { %542 = vmax.xlane.f32.xlu0 %v541_v44 }
 0x3d2   :  { %v503_v60 = vpop.f32.mrf.mxu2 }
 0x3d3   :  { %v519_v39 = vmul.f32 0.35355338, %v503_v60 }
 0x3d5   :  { %v527_v59 = vadd.f32 %v519_v39, %v4239_v45 }
 0x3d7   :  { %v544_v1 = vsel %vm531_vm14, %v527_v59, -inf }
 0x3d8   :  { %545 = vmax.xlane.f32.xlu2 %v544_v1 }
 0x3da   :  { %v506_v18 = vpop.f32.mrf.mxu2 }
 0x3db   :  { %v520_v62 = vmul.f32 0.35355338, %v506_v18 }
 0x3dd   :  { %v528_v7 = vadd.f32 %v520_v62, %v4247_v0 }
 0x3df   :  { %v547_v13 = vsel %vm531_vm14, %v528_v7, -inf }
 0x3e1   :  { %1019 = vrot.lane.b32.xlu1 %v3944_v63, %s3721_s29 }
 0x3e2   :  { %v509_v4 = vpop.f32.mrf.mxu2 }
 0x3e3   :  { %v521_v30 = vmul.f32 0.35355338, %v509_v4 }
 0x3e4   :  { %1315 = vrot.lane.b32.xlu0 %v3938_v48, %s3722_s30  ;;  %v4255_v48 = vld [vmem:[#allocation2 + $0xa0] sm:$0xff] }
 0x3e5   :  { %v529_v34 = vadd.f32 %v521_v30, %v4251_v17 }
 0x3e7   :  { %v550_v49 = vsel %vm531_vm14, %v529_v34, -inf }
 0x3ea   :  { %v512_v51 = vpop.f32.mrf.mxu2 }
 0x3eb   :  { %v522_v57 = vmul.f32 0.35355338, %v512_v51 }
 0x3ed   :  { %v530_v52 = vadd.f32 %v522_v57, %v4255_v48 }
 0x3ef   :  { %v553_v3 = vsel %vm531_vm14, %v530_v52, -inf }
 0x40b   :  { %548 = vmax.xlane.f32.xlu1 %v547_v13 }
 0x413   :  { %551 = vmax.xlane.f32.xlu1 %v550_v49 }
 0x41b   :  { %554 = vmax.xlane.f32.xlu1 %v553_v3 }
 0x42b   :  { %v534_v6 = vpop.xlane.xlu0 %533 }
 0x42c   :  { %v556_v20 = vsub.f32 %v523_v16, %v534_v6 }
 0x42e   :  { %v564_v5 = vmul.f32 1.442695, %v556_v20 }
 0x430   :  { %3446 = vpow2.f32 %v564_v5 }
 0x433   :  { %v537_v46 = vpop.xlane.xlu2 %536 }
 0x434   :  { %v557_v10 = vsub.f32 %v524_v22, %v537_v46 }
 0x436   :  { %v3447_v21 = vpop.eup %3446  ;;  %v566_v24 = vmul.f32 1.442695, %v557_v10 }
 0x437   :  { %v580_v26 = vsel %vm531_vm14, %v3447_v21, 0.0 }
 0x438   :  { %3448 = vpow2.f32 %v566_v24  ;;  %581 = vadd.xlane.f32.xlu2 %v580_v26 }
 0x43b   :  { %v540_v28 = vpop.xlane.xlu1 %539 }
 0x43c   :  { %v558_v29 = vsub.f32 %v525_v36, %v540_v28 }
 0x43e   :  { %v3449_v33 = vpop.eup %3448  ;;  %v568_v37 = vmul.f32 1.442695, %v558_v29  ;;  %v790_v29 = vpop.f32.mrf.mxu0 }
 0x43f   :  { %v583_v38 = vsel %vm531_vm14, %v3449_v33, 0.0 }
 0x440   :  { %3450 = vpow2.f32 %v568_v37  ;;  %584 = vadd.xlane.f32.xlu0 %v583_v38 }
 0x443   :  { %v543_v41 = vpop.xlane.xlu0 %542 }
 0x444   :  { %v559_v16 = vsub.f32 %v526_v42, %v543_v41 }
 0x446   :  { %v3451_v44 = vpop.eup %3450  ;;  %v570_v60 = vmul.f32 1.442695, %v559_v16 }
 0x447   :  { %v586_v22 = vsel %vm531_vm14, %v3451_v44, 0.0 }
 0x448   :  { %3452 = vpow2.f32 %v570_v60  ;;  %587 = vadd.xlane.f32.xlu2 %v586_v22 }
 0x44b   :  { %v546_v39 = vpop.xlane.xlu2 %545 }
 0x44c   :  { %v560_v1 = vsub.f32 %v527_v59, %v546_v39 }
 0x44e   :  { %v4262_v18 = vpop.eup %3452  ;;  %v572_v62 = vmul.f32 1.442695, %v560_v1 }
 0x44f   :  { %v589_v36 = vsel %vm531_vm14, %v4262_v18, 0.0 }
 0x450   :  { %3454 = vpow2.f32 %v572_v62  ;;  %590 = vadd.xlane.f32.xlu1 %v589_v36  ;;  %v814_v36 = vmul.f32 0.35355338, %v790_v29 }
 0x453   :  { %v4271_v13 = vpop.permute.xlu1 %1019 }
 0x456   :  { %v4266_v4 = vpop.eup %3454  ;;  %v1316_v30 = vpop.permute.xlu0 %1315 }
 0x457   :  { %3249 = vmatmul.msk.f32.gmra.mxu0 %vm441_vm13, %v1316_v30  ;;  %v592_v42 = vsel %vm531_vm14, %v4266_v4, 0.0 }
 0x458   :  { %593 = vadd.xlane.f32.xlu0 %v592_v42 }
 0x47e   :  { %v549_v59 = vpop.xlane.xlu1 %548 }
 0x47f   :  { %v561_v51 = vsub.f32 %v528_v7, %v549_v59  ;;  %v4295_v59 = vadd.f32 %v814_v36, %v4216_v14 }
 0x481   :  { %v574_v57 = vmul.f32 1.442695, %v561_v51 }
 0x483   :  { %3456 = vpow2.f32 %v574_v57 }
 0x486   :  { %v552_v49 = vpop.xlane.xlu1 %551 }
 0x487   :  { %v562_v3 = vsub.f32 %v529_v34, %v552_v49 }
 0x489   :  { %v4273_v6 = vpop.eup %3456  ;;  %v576_v20 = vmul.f32 1.442695, %v562_v3 }
 0x48a   :  { %v595_v5 = vsel %vm531_vm14, %v4273_v6, 0.0 }
 0x48b   :  { %3458 = vpow2.f32 %v576_v20  ;;  %596 = vadd.xlane.f32.xlu2 %v595_v5 }
 0x48e   :  { %v555_v46 = vpop.xlane.xlu1 %554 }
 0x48f   :  { %v563_v10 = vsub.f32 %v530_v52, %v555_v46  ;;  %v793_v52 = vpop.f32.mrf.mxu0 }
 0x491   :  { %v4277_v24 = vpop.eup %3458  ;;  %v578_v26 = vmul.f32 1.442695, %v563_v10 }
 0x492   :  { %v598_v7 = vsel %vm531_vm14, %v4277_v24, 0.0 }
 0x493   :  { %3460 = vpow2.f32 %v578_v26  ;;  %599 = vadd.xlane.f32.xlu0 %v598_v7 }
 0x497   :  { %v796_v41 = vpop.f32.mrf.mxu0 }
 0x499   :  { %v4281_v28 = vpop.eup %3460 }
 0x49a   :  { %v601_v34 = vsel %vm531_vm14, %v4281_v28, 0.0 }
 0x49b   :  { %602 = vadd.xlane.f32.xlu1 %v601_v34  ;;  %v815_v34 = vmul.f32 0.35355338, %v793_v52 }
 0x49f   :  { %v799_v62 = vpop.f32.mrf.mxu0 }
 0x4a0   :  { %v817_v57 = vmul.f32 0.35355338, %v799_v62 }
 0x4a2   :  { %v4305_v20 = vadd.f32 %v817_v57, %v4233_v40 }
 0x4a3   :  { %1021 = vrot.lane.b32.xlu2 %v4010_v61, %s3721_s29 }
 0x4a7   :  { %1319 = vrot.lane.b32.xlu0 %v4010_v61, %s3722_s30 }
 0x4ab   :  { %v582_v37 = vpop.xlane.xlu2 %581 }
 0x4ac   :  { %3462 = vrcp.f32 %v582_v37  ;;  %v4317_v37 = vadd.f32 %v815_v34, %v4222_v12 }
 0x4b2   :  { %v3463_v38 = vpop.eup %3462 }
 0x4b3   :  { %v585_v16 = vpop.xlane.xlu0 %584  ;;  %v612_v60 = vmul.f32 %v3463_v38, %v3447_v21  ;;  %v802_v21 = vpop.f32.mrf.mxu0 }
 0x4b4   :  { %3464 = vrcp.f32 %v585_v16  ;;  %1317 = vrot.lane.b32.xlu1 %v3944_v63, %s3722_s30  ;;  %v816_v63 = vmul.f32 0.35355338, %v796_v41  ;;  %v818_v41 = vmul.f32 0.35355338, %v802_v21  ;;  %v833_v16 = vsel %vm531_vm14, %v4317_v37, -inf }
 0x4b5   :  { %3180 = vmatmul.msk.f32.vlgmr.msra.gmra.mxu3 %vm531_vm14, %v612_v60 }
 0x4ba   :  { %v3465_v22 = vpop.eup %3464 }
 0x4bb   :  { %v588_v39 = vpop.xlane.xlu2 %587  ;;  %v613_v1 = vmul.f32 %v3465_v22, %v3449_v33  ;;  %v830_v33 = vsel %vm531_vm14, %v4295_v59, -inf  ;;  %v805_v5 = vpop.f32.mrf.mxu0 }
 0x4bc   :  { %3466 = vrcp.f32 %v588_v39  ;;  %v819_v26 = vmul.f32 0.35355338, %v805_v5 }
 0x4bd   :  { %3181 = vmatmul.msk.f32.gmra.mxu3 %vm531_vm14, %v613_v1 }
 0x4be   :  { %v4314_v29 = vadd.f32 %v819_v26, %v4247_v0 }
 0x4c0   :  { %v845_v38 = vsel %vm531_vm14, %v4314_v29, -inf }
 0x4c2   :  { %v3467_v61 = vpop.eup %3466 }
 0x4c3   :  { %v591_v30 = vpop.xlane.xlu1 %590  ;;  %v614_v42 = vmul.f32 %v3467_v61, %v3451_v44  ;;  %v4301_v44 = vadd.f32 %v816_v63, %v4228_v54  ;;  %v808_v52 = vpop.f32.mrf.mxu0 }
 0x4c4   :  { %3468 = vrcp.f32 %v591_v30  ;;  %v820_v60 = vmul.f32 0.35355338, %v808_v52 }
 0x4c5   :  { %3182 = vmatmul.msk.f32.gmra.mxu3 %vm531_vm14, %v614_v42  ;;  %v836_v46 = vsel %vm531_vm14, %v4301_v44, -inf }
 0x4c6   :  { %v4331_v39 = vadd.f32 %v820_v60, %v4251_v17 }
 0x4c8   :  { %v848_v1 = vsel %vm531_vm14, %v4331_v39, -inf }
 0x4ca   :  { %v3469_v51 = vpop.eup %3468 }
 0x4cb   :  { %v594_v49 = vpop.xlane.xlu0 %593  ;;  %v615_v3 = vmul.f32 %v3469_v51, %v4262_v18  ;;  %v839_v18 = vsel %vm531_vm14, %v4305_v20, -inf  ;;  %v811_v61 = vpop.f32.mrf.mxu0 }
 0x4cc   :  { %3470 = vrcp.f32 %v594_v49  ;;  %831 = vmax.xlane.f32.xlu2 %v830_v33  ;;  %v821_v30 = vmul.f32 0.35355338, %v811_v61 }
 0x4cd   :  { %3183 = vmatmul.msk.f32.gmra.mxu3 %vm531_vm14, %v615_v3 }
 0x4ce   :  { %v4340_v51 = vadd.f32 %v821_v30, %v4255_v48 }
 0x4d0   :  { %v851_v3 = vsel %vm531_vm14, %v4340_v51, -inf }
 0x4d1   :  { %837 = vmax.xlane.f32.xlu0 %v836_v46 }
 0x4d2   :  { %v3471_v10 = vpop.eup %3470 }
 0x4d3   :  { %v616_v7 = vmul.f32 %v3471_v10, %v4266_v4  ;;  %v4324_v4 = vadd.f32 %v818_v41, %v4239_v45  ;;  %v1386_v63 = vpop.f32.mrf.mxu0 }
 0x4d4   :  { %840 = vmax.xlane.f32.xlu2 %v839_v18  ;;  %v1410_v49 = vmul.f32 0.35355338, %v1386_v63 }
 0x4d5   :  { %3184 = vmatmul.msk.f32.gmra.mxu3 %vm531_vm14, %v616_v7  ;;  %v842_v22 = vsel %vm531_vm14, %v4324_v4, -inf }
 0x4db   :  { %v1389_v46 = vpop.f32.mrf.mxu0 }
 0x4dc   :  { %846 = vmax.xlane.f32.xlu2 %v845_v38  ;;  %v1411_v26 = vmul.f32 0.35355338, %v1389_v46 }
 0x4de   :  { %834 = vmax.xlane.f32.xlu1 %v833_v16 }
 0x4e5   :  { %3369 = vrot.lane.b32.xlu0 %v4054_v8, %s3723_s5 }
 0x4e6   :  { %843 = vmax.xlane.f32.xlu1 %v842_v22 }
 0x4ee   :  { %849 = vmax.xlane.f32.xlu1 %v848_v1 }
 0x4f4   :  { %3374 = vrot.lane.b32.xlu2 %v3954_v50, %s3723_s5 }
 0x4fe   :  { %v597_v62 = vpop.xlane.xlu2 %596 }
 0x4ff   :  { %3472 = vrcp.f32 %v597_v62 }
 0x505   :  { %v3473_v36 = vpop.eup %3472 }
 0x506   :  { %v600_v42 = vpop.xlane.xlu0 %599  ;;  %v617_v21 = vmul.f32 %v3473_v36, %v4273_v6  ;;  %v4347_v6 = vadd.f32 %v1410_v49, %v4216_v14  ;;  %v1022_v41 = vpop.permute.xlu2 %1021 }
 0x507   :  { %3474 = vrcp.f32 %v600_v42 }
 0x508   :  { %3185 = vmatmul.msk.f32.gmra.mxu3 %vm531_vm14, %v617_v21  ;;  %v1426_v18 = vsel %vm531_vm14, %v4347_v6, -inf }
 0x50d   :  { %v3475_v57 = vpop.eup %3474 }
 0x50e   :  { %v603_v33 = vpop.xlane.xlu1 %602  ;;  %v618_v5 = vmul.f32 %v3475_v57, %v4277_v24  ;;  %v4354_v24 = vadd.f32 %v1411_v26, %v4222_v12 }
 0x50f   :  { %3476 = vrcp.f32 %v603_v33  ;;  %852 = vmax.xlane.f32.xlu0 %v851_v3 }
 0x510   :  { %3186 = vmatmul.msk.f32.gmra.mxu3 %vm531_vm14, %v618_v5  ;;  %v1429_v34 = vsel %vm531_vm14, %v4354_v24, -inf }
 0x515   :  { %v3477_v10 = vpop.eup %3476 }
 0x516   :  { %v619_v7 = vmul.f32 %v3477_v10, %v4281_v28 }
 0x517   :  { %1427 = vmax.xlane.f32.xlu0 %v1426_v18 }
 0x518   :  { %3187 = vmatmul.msk.f32.gmra.mxu3 %vm531_vm14, %v619_v7 }
 0x519   :  { %v1320_v28 = vpop.permute.xlu0 %1319 }
 0x51f   :  { %1430 = vmax.xlane.f32.xlu0 %v1429_v34 }
 0x520   :  { %3220 = vmatmul.msk.f32.vlgmr.msrb.gmra.mxu3 %vm441_vm13, %v4100_v25 }
 0x526   :  { %v1318_v38 = vpop.permute.xlu1 %1317 }
 0x527   :  { %3250 = vmatmul.msk.f32.gmra.mxu0 %vm441_vm13, %v1318_v38 }
 0x528   :  { %3221 = vmatmul.msk.f32.gmra.mxu3 %vm441_vm13, %v4139_v47 }
 0x52f   :  { %3251 = vmatmul.msk.f32.gmra.mxu0 %vm441_vm13, %v1320_v28 }
 0x530   :  { %3222 = vmatmul.msk.f32.gmra.mxu3 %vm441_vm13, %v4143_v2  ;;  %v1392_v2 = vpop.f32.mrf.mxu0 }
 0x531   :  { %v1412_v36 = vmul.f32 0.35355338, %v1392_v2 }
 0x533   :  { %v4390_v63 = vadd.f32 %v1412_v36, %v4228_v54 }
 0x538   :  { %3223 = vmatmul.msk.f32.gmra.mxu3 %vm441_vm13, %v4185_v9  ;;  %v1395_v42 = vpop.f32.mrf.mxu0  ;;  %v4396_v26 = vpop.f32.mrf.mxu3 }
 0x539   :  { %v1413_v49 = vmul.f32 0.35355338, %v1395_v42 }
 0x53b   :  { %v4400_v38 = vadd.f32 %v1413_v49, %v4233_v40 }
 0x53f   :  { %v832_v16 = vpop.xlane.xlu2 %831 }
 0x540   :  { %v854_v52 = vsub.f32 %v4295_v59, %v832_v16  ;;  %3224 = vmatmul.msk.f32.gmra.mxu3 %vm441_vm13, %v4119_v32  ;;  %v1398_v28 = vpop.f32.mrf.mxu0 }
 0x541   :  { %v1414_v16 = vmul.f32 0.35355338, %v1398_v28 }
 0x542   :  { %v862_v25 = vmul.f32 1.442695, %v854_v52 }
 0x544   :  { %3478 = vpow2.f32 %v862_v25  ;;  %v838_v60 = vpop.xlane.xlu0 %837 }
 0x545   :  { %v856_v47 = vsub.f32 %v4301_v44, %v838_v60 }
 0x547   :  { %v866_v22 = vmul.f32 1.442695, %v856_v47  ;;  %v841_v1 = vpop.xlane.xlu2 %840  ;;  %v4408_v47 = vadd.f32 %v1414_v16, %v4239_v45 }
 0x548   :  { %v857_v62 = vsub.f32 %v4305_v20, %v841_v1  ;;  %3225 = vmatmul.msk.f32.gmra.mxu3 %vm441_vm13, %v4151_v56 }
 0x549   :  { %3480 = vpow2.f32 %v866_v22  ;;  %v4410_v22 = vpop.f32.mrf.mxu3  ;;  %v1438_v2 = vsel %vm531_vm14, %v4408_v47, -inf }
 0x54a   :  { %v4375_v9 = vpop.eup %3478  ;;  %v868_v59 = vmul.f32 1.442695, %v857_v62 }
 0x54b   :  { %v878_v32 = vsel %vm531_vm14, %v4375_v9, 0.0 }
 0x54c   :  { %3482 = vpow2.f32 %v868_v59  ;;  %879 = vadd.xlane.f32.xlu1 %v878_v32 }
 0x54f   :  { %v4379_v61 = vpop.eup %3480  ;;  %v847_v44 = vpop.xlane.xlu2 %846 }
 0x550   :  { %3226 = vmatmul.msk.f32.gmra.mxu3 %vm441_vm13, %v4271_v13  ;;  %v884_v56 = vsel %vm531_vm14, %v4379_v61, 0.0  ;;  %v1432_v13 = vsel %vm531_vm14, %v4390_v63, -inf  ;;  %v859_v18 = vsub.f32 %v4314_v29, %v847_v44 }
 0x551   :  { %v835_v20 = vpop.xlane.xlu1 %834  ;;  %885 = vadd.xlane.f32.xlu2 %v884_v56  ;;  %v4424_v32 = vpop.f32.mrf.mxu3 }
 0x552   :  { %v4385_v30 = vpop.eup %3482  ;;  %v872_v52 = vmul.f32 1.442695, %v859_v18 }
 0x553   :  { %v887_v21 = vsel %vm531_vm14, %v4385_v30, 0.0 }
 0x554   :  { %888 = vadd.xlane.f32.xlu0 %v887_v21  ;;  %v855_v21 = vsub.f32 %v4317_v37, %v835_v20 }
 0x557   :  { %v3370_v57 = vpop.permute.xlu0 %3369  ;;  %v3375_v3 = vpop.permute.xlu2 %3374 }
 0x558   :  { %3227 = vmatmul.msk.f32.gmra.mxu3 %vm441_vm13, %v1022_v41  ;;  %v3371_v33 = vunpack.i.l.bf16 %v3370_v57  ;;  %v3372_v10 = vunpack.i.h.bf16 %v3370_v57  ;;  %v3376_v34 = vunpack.i.l.bf16 %v3375_v3  ;;  %v3377_v41 = vunpack.i.h.bf16 %v3375_v3  ;;  %v1401_v3 = vpop.f32.mrf.mxu0 }
 0x559   :  { %v844_v5 = vpop.xlane.xlu1 %843  ;;  %1433 = vmax.xlane.f32.xlu2 %v1432_v13  ;;  %v4430_v56 = vpop.f32.mrf.mxu3  ;;  %v864_v57 = vmul.f32 1.442695, %v855_v21  ;;  %v1415_v37 = vmul.f32 0.35355338, %v1401_v3 }
 0x55a   :  { %v858_v46 = vsub.f32 %v4324_v4, %v844_v5  ;;  %974 = vmatpush.msrb.mxu1 %v3371_v33  ;;  %v1435_v4 = vsel %vm531_vm14, %v4400_v38, -inf }
 0x55c   :  { %v870_v7 = vmul.f32 1.442695, %v858_v46  ;;  %975 = vmatpush.msrb.mxu1 %v3372_v10  ;;  %v4451_v10 = vadd.f32 %v1415_v37, %v4247_v0 }
 0x55e   :  { %3484 = vpow2.f32 %v870_v7  ;;  %976 = vmatpush.msrb.mxu1 %v3376_v34  ;;  %v1441_v7 = vsel %vm531_vm14, %v4451_v10, -inf }
 0x55f   :  { %3486 = vpow2.f32 %v872_v52 }
 0x560   :  { %977 = vmatpush.msrb.mxu1 %v3377_v41 }
 0x561   :  { %v850_v25 = vpop.xlane.xlu1 %849  ;;  %1436 = vmax.xlane.f32.xlu2 %v1435_v4  ;;  %v4434_v42 = vpop.f32.mrf.mxu3 }
 0x562   :  { %v860_v29 = vsub.f32 %v4331_v39, %v850_v25 }
 0x564   :  { %v4404_v60 = vpop.eup %3484  ;;  %v874_v62 = vmul.f32 1.442695, %v860_v29 }
 0x565   :  { %3379 = vrot.lane.b32.xlu1 %v3970_v55, %s3723_s5  ;;  %v890_v1 = vsel %vm531_vm14, %v4404_v60, 0.0  ;;  %v4418_v59 = vpop.eup %3486 }
 0x566   :  { %891 = vadd.xlane.f32.xlu0 %v890_v1  ;;  %3488 = vpow2.f32 %v874_v62  ;;  %v893_v39 = vsel %vm531_vm14, %v4418_v59, 0.0 }
 0x567   :  { %3490 = vpow2.f32 %v864_v57 }
 0x569   :  { %1439 = vmax.xlane.f32.xlu2 %v1438_v2 }
 0x56c   :  { %v4426_v44 = vpop.eup %3488 }
 0x56d   :  { %3384 = vrot.lane.b32.xlu1 %v3984_v58, %s3723_s5  ;;  %v896_v36 = vsel %vm531_vm14, %v4426_v44, 0.0  ;;  %v4443_v33 = vpop.eup %3490 }
 0x56e   :  { %894 = vadd.xlane.f32.xlu0 %v893_v39  ;;  %v881_v20 = vsel %vm531_vm14, %v4443_v33, 0.0 }
 0x576   :  { %897 = vadd.xlane.f32.xlu0 %v896_v36 }
 0x581   :  { %3389 = vrot.lane.b32.xlu2 %v4054_v8, %s3724_s6 }
 0x582   :  { %v853_v13 = vpop.xlane.xlu0 %852 }
 0x583   :  { %v861_v46 = vsub.f32 %v4340_v51, %v853_v13 }
 0x589   :  { %3399 = vrot.lane.b32.xlu2 %v4054_v8, %s3725_s7  ;;  %v876_v8 = vmul.f32 1.442695, %v861_v46 }
 0x58a   :  { %3394 = vrot.lane.b32.xlu0 %v3954_v50, %s3724_s6 }
 0x58b   :  { %v4441_v49 = vpop.f32.mrf.mxu3  ;;  %3492 = vpow2.f32 %v876_v8 }
 0x591   :  { %v4457_v34 = vpop.eup %3492 }
 0x592   :  { %v899_v41 = vsel %vm531_vm14, %v4457_v34, 0.0 }
 0x593   :  { %v4445_v5 = vpop.f32.mrf.mxu3 }
 0x597   :  { %882 = vadd.xlane.f32.xlu1 %v881_v20 }
 0x59b   :  { %v4453_v18 = vpop.f32.mrf.mxu3 }
 0x59f   :  { %1442 = vmax.xlane.f32.xlu1 %v1441_v7  ;;  %v4488_v7 = vpop.xlane.xlu0 %1427 }
 0x5a3   :  { %v1088_v28 = vpop.f32.mrf.mxu3 }
 0x5a4   :  { %v1404_v51 = vpop.f32.mrf.mxu0  ;;  %v1112_v1 = vmul.f32 0.35355338, %v1088_v28 }
 0x5a5   :  { %v1416_v16 = vmul.f32 0.35355338, %v1404_v51 }
 0x5a6   :  { %v4472_v36 = vadd.f32 %v1112_v1, %v4216_v14 }
 0x5a7   :  { %900 = vadd.xlane.f32.xlu1 %v899_v41  ;;  %v4462_v25 = vadd.f32 %v1416_v16, %v4251_v17  ;;  %v4496_v16 = vpop.xlane.xlu0 %1430 }
 0x5a8   :  { %v1128_v57 = vsel %vm531_vm14, %v4472_v36, -inf }
 0x5a9   :  { %v1444_v62 = vsel %vm531_vm14, %v4462_v25, -inf }
 0x5ab   :  { %v1091_v52 = vpop.f32.mrf.mxu3 }
 0x5ac   :  { %v1113_v4 = vmul.f32 0.35355338, %v1091_v52  ;;  %v1407_v3 = vpop.f32.mrf.mxu0 }
 0x5ad   :  { %v1417_v46 = vmul.f32 0.35355338, %v1407_v3 }
 0x5ae   :  { %v4465_v29 = vadd.f32 %v1113_v4, %v4222_v12 }
 0x5af   :  { %v4486_v8 = vadd.f32 %v1417_v46, %v4255_v48 }
 0x5b0   :  { %v1131_v39 = vsel %vm531_vm14, %v4465_v29, -inf }
 0x5b2   :  { %1445 = vmax.xlane.f32.xlu2 %v1444_v62 }
 0x5b3   :  { %v1094_v2 = vpop.f32.mrf.mxu3 }
 0x5b4   :  { %1132 = vmax.xlane.f32.xlu0 %v1131_v39  ;;  %v1114_v21 = vmul.f32 0.35355338, %v1094_v2 }
 0x5b6   :  { %v4477_v13 = vadd.f32 %v1114_v21, %v4228_v54  ;;  %v1447_v54 = vsel %vm531_vm14, %v4486_v8, -inf }
 0x5b8   :  { %v1134_v37 = vsel %vm531_vm14, %v4477_v13, -inf }
 0x5ba   :  { %1129 = vmax.xlane.f32.xlu2 %v1128_v57 }
 0x5bb   :  { %v1097_v12 = vpop.f32.mrf.mxu3 }
 0x5bc   :  { %v1115_v31 = vmul.f32 0.35355338, %v1097_v12  ;;  %v1450_v12 = vsub.f32 %v4347_v6, %v4488_v7  ;;  %v1451_v6 = vsub.f32 %v4354_v24, %v4496_v16 }
 0x5bf   :  { %v880_v41 = vpop.xlane.xlu1 %879 }
 0x5c0   :  { %3404 = vrot.lane.b32.xlu1 %v3970_v55, %s3724_s6  ;;  %3494 = vrcp.f32 %v880_v41 }
 0x5c2   :  { %1135 = vmax.xlane.f32.xlu2 %v1134_v37 }
 0x5c3   :  { %v1100_v14 = vpop.f32.mrf.mxu3 }
 0x5c4   :  { %v4483_v20 = vpop.xlane.xlu2 %885 }
 0x5c7   :  { %v4505_v2 = vpop.xlane.xlu0 %888 }
 0x5c8   :  { %3409 = vrot.lane.b32.xlu1 %v3954_v50, %s3725_s7 }
 0x5ca   :  { %1448 = vmax.xlane.f32.xlu2 %v1447_v54 }
 0x5cb   :  { %v1103_v28 = vpop.f32.mrf.mxu3 }
 0x5cc   :  { %v4494_v51 = vpop.xlane.xlu2 %1433 }
 0x5d0   :  { %3414 = vrot.lane.b32.xlu1 %v3984_v58, %s3724_s6 }
 0x5d3   :  { %v1106_v52 = vpop.f32.mrf.mxu3 }
 0x5d4   :  { %v1118_v4 = vmul.f32 0.35355338, %v1106_v52  ;;  %v4500_v1 = vpop.xlane.xlu2 %1436  ;;  %v3495_v52 = vpop.eup %3494 }
 0x5d6   :  { %v4503_v62 = vadd.f32 %v1118_v4, %v4251_v17 }
 0x5d7   :  { %v3380_v50 = vpop.permute.xlu1 %3379 }
 0x5d8   :  { %v1146_v39 = vsel %vm531_vm14, %v4503_v62, -inf  ;;  %v3381_v21 = vunpack.i.l.bf16 %v3380_v50  ;;  %v3382_v57 = vunpack.i.h.bf16 %v3380_v50  ;;  %v910_v50 = vmul.f32 %v3495_v52, %v4375_v9 }
 0x5d9   :  { %1147 = vmax.xlane.f32.xlu0 %v1146_v39  ;;  %v4512_v4 = vpop.xlane.xlu0 %891  ;;  %v1116_v9 = vmul.f32 0.35355338, %v1100_v14 }
 0x5da   :  { %978 = vmatpush.msrb.mxu1 %v3381_v21 }
 0x5db   :  { %v1109_v3 = vpop.f32.mrf.mxu3 }
 0x5dc   :  { %v1119_v46 = vmul.f32 0.35355338, %v1109_v3  ;;  %v1440_v37 = vpop.xlane.xlu2 %1439  ;;  %979 = vmatpush.msrb.mxu1 %v3382_v57 }
 0x5de   :  { %v4510_v54 = vadd.f32 %v1119_v46, %v4255_v48 }
 0x5df   :  { %v3385_v17 = vpop.permute.xlu1 %3384 }
 0x5e0   :  { %v1149_v53 = vsel %vm531_vm14, %v4510_v54, -inf  ;;  %v3386_v43 = vunpack.i.l.bf16 %v3385_v17  ;;  %v3387_v41 = vunpack.i.h.bf16 %v3385_v17 }
 0x5e1   :  { %1150 = vmax.xlane.f32.xlu0 %v1149_v53  ;;  %v4518_v57 = vpop.xlane.xlu0 %894  ;;  %v4525_v53 = vadd.f32 %v1115_v31, %v4233_v40 }
 0x5e2   :  { %980 = vmatpush.msrb.mxu1 %v3386_v43 }
 0x5e3   :  { %v1137_v17 = vsel %vm531_vm14, %v4525_v53, -inf }
 0x5e4   :  { %v3390_v39 = vpop.permute.xlu2 %3389  ;;  %981 = vmatpush.msrb.mxu1 %v3387_v41 }
 0x5e5   :  { %3204 = vmatmul.msk.f32.vlgmr.msrb.gmra.mxu1 %vm531_vm14, %v910_v50  ;;  %v3391_v21 = vunpack.i.l.bf16 %v3390_v39  ;;  %v3392_v48 = vunpack.i.h.bf16 %v3390_v39  ;;  %v4530_v50 = vadd.f32 %v1116_v9, %v4239_v45  ;;  %v1117_v39 = vmul.f32 0.35355338, %v1103_v28 }
 0x5e7   :  { %1272 = vmatpush.msrb.mxu2 %v3391_v21  ;;  %v1140_v31 = vsel %vm531_vm14, %v4530_v50, -inf  ;;  %v4537_v40 = vadd.f32 %v1117_v39, %v4247_v0  ;;  %v1460_v21 = vmul.f32 1.442695, %v1451_v6 }
 0x5e9   :  { %1273 = vmatpush.msrb.mxu2 %v3392_v48  ;;  %v4520_v43 = vpop.xlane.xlu0 %897  ;;  %v1143_v45 = vsel %vm531_vm14, %v4537_v40, -inf }
 0x5ec   :  { %v3400_v3 = vpop.permute.xlu2 %3399 }
 0x5ed   :  { %v3401_v46 = vunpack.i.l.bf16 %v3400_v3  ;;  %v3402_v35 = vunpack.i.h.bf16 %v3400_v3  ;;  %v1454_v3 = vsub.f32 %v4408_v47, %v1440_v37 }
 0x5ef   :  { %1570 = vmatpush.msra.mxu1 %v3401_v46  ;;  %v1466_v24 = vmul.f32 1.442695, %v1454_v3 }
 0x5f1   :  { %1571 = vmatpush.msra.mxu1 %v3402_v35 }
 0x5f5   :  { %3419 = vrot.lane.b32.xlu0 %v3970_v55, %s3725_s7  ;;  %v1458_v55 = vmul.f32 1.442695, %v1450_v12 }
 0x5f7   :  { %3496 = vpow2.f32 %v1458_v55 }
 0x5fa   :  { %1138 = vmax.xlane.f32.xlu1 %v1137_v17 }
 0x5fc   :  { %v3395_v52 = vpop.permute.xlu0 %3394 }
 0x5fd   :  { %v3396_v41 = vunpack.i.l.bf16 %v3395_v52  ;;  %v3397_v35 = vunpack.i.h.bf16 %v3395_v52  ;;  %v4543_v7 = vpop.eup %3496 }
 0x5fe   :  { %v1474_v0 = vsel %vm531_vm14, %v4543_v7, 0.0 }
 0x5ff   :  { %1274 = vmatpush.msrb.mxu2 %v3396_v41 }
 0x601   :  { %1275 = vmatpush.msrb.mxu2 %v3397_v35 }
 0x602   :  { %1141 = vmax.xlane.f32.xlu1 %v1140_v31 }
 0x60a   :  { %v883_v14 = vpop.xlane.xlu1 %882  ;;  %1144 = vmax.xlane.f32.xlu1 %v1143_v45 }
 0x60b   :  { %3498 = vrcp.f32 %v883_v14 }
 0x60c   :  { %3500 = vrcp.f32 %v4483_v20 }
 0x60d   :  { %3502 = vpow2.f32 %v1460_v21 }
 0x60e   :  { %3504 = vrcp.f32 %v4505_v2 }
 0x60f   :  { %3506 = vpow2.f32 %v1466_v24 }
 0x610   :  { %3508 = vrcp.f32 %v4512_v4 }
 0x611   :  { %v3499_v28 = vpop.eup %3498 }
 0x612   :  { %1475 = vadd.xlane.f32.xlu1 %v1474_v0  ;;  %v911_v48 = vmul.f32 %v3499_v28, %v4443_v33  ;;  %v3501_v46 = vpop.eup %3500  ;;  %v1443_v16 = vpop.xlane.xlu1 %1442 }
 0x613   :  { %v912_v9 = vmul.f32 %v3501_v46, %v4379_v61  ;;  %v4553_v17 = vpop.eup %3502  ;;  %v1455_v20 = vsub.f32 %v4451_v10, %v1443_v16 }
 0x614   :  { %3205 = vmatmul.msk.f32.gmra.mxu1 %vm531_vm14, %v911_v48  ;;  %v1477_v33 = vsel %vm531_vm14, %v4553_v17, 0.0  ;;  %v3505_v52 = vpop.eup %3504 }
 0x615   :  { %v1468_v47 = vmul.f32 1.442695, %v1455_v20  ;;  %v913_v2 = vmul.f32 %v3505_v52, %v4385_v30  ;;  %v4561_v37 = vpop.eup %3506 }
 0x616   :  { %v1486_v10 = vsel %vm531_vm14, %v4561_v37, 0.0  ;;  %v3509_v35 = vpop.eup %3508 }
 0x617   :  { %3510 = vpow2.f32 %v1468_v47  ;;  %v914_v55 = vmul.f32 %v3509_v35, %v4404_v60 }
 0x618   :  { %3512 = vrcp.f32 %v4518_v57  ;;  %v1453_v57 = vsub.f32 %v4400_v38, %v4500_v1 }
 0x61a   :  { %v901_v30 = vpop.xlane.xlu1 %900  ;;  %v1464_v46 = vmul.f32 1.442695, %v1453_v57 }
 0x61c   :  { %3206 = vmatmul.msk.f32.gmra.mxu1 %vm531_vm14, %v912_v9 }
 0x61d   :  { %v4570_v45 = vpop.eup %3510 }
 0x61e   :  { %v1489_v6 = vsel %vm531_vm14, %v4570_v45, 0.0 }
 0x61f   :  { %1478 = vadd.xlane.f32.xlu0 %v1477_v33 }
 0x624   :  { %3207 = vmatmul.msk.f32.gmra.mxu1 %vm531_vm14, %v913_v2 }
 0x625   :  { %v1446_v61 = vpop.xlane.xlu2 %1445 }
 0x626   :  { %v1456_v41 = vsub.f32 %v4462_v25, %v1446_v61 }
 0x627   :  { %v1133_v12 = vpop.xlane.xlu0 %1132  ;;  %1487 = vadd.xlane.f32.xlu0 %v1486_v10 }
 0x628   :  { %v1153_v39 = vsub.f32 %v4465_v29, %v1133_v12  ;;  %v1470_v4 = vmul.f32 1.442695, %v1456_v41  ;;  %v3513_v29 = vpop.eup %3512 }
 0x629   :  { %v915_v0 = vmul.f32 %v3513_v29, %v4418_v59 }
 0x62a   :  { %v1162_v31 = vmul.f32 1.442695, %v1153_v39 }
 0x62c   :  { %3514 = vpow2.f32 %v1162_v31  ;;  %3208 = vmatmul.msk.f32.gmra.mxu1 %vm531_vm14, %v914_v55 }
 0x62d   :  { %3516 = vpow2.f32 %v1470_v4  ;;  %v1130_v25 = vpop.xlane.xlu2 %1129 }
 0x62e   :  { %v1152_v14 = vsub.f32 %v4472_v36, %v1130_v25  ;;  %3518 = vrcp.f32 %v4520_v43 }
 0x62f   :  { %1490 = vadd.xlane.f32.xlu0 %v1489_v6 }
 0x630   :  { %v1160_v28 = vmul.f32 1.442695, %v1152_v14 }
 0x632   :  { %v4579_v60 = vpop.eup %3514  ;;  %3520 = vpow2.f32 %v1160_v28  ;;  %v3405_v21 = vpop.permute.xlu1 %3404 }
 0x633   :  { %v4582_v48 = vpop.eup %3516  ;;  %v1179_v36 = vsel %vm531_vm14, %v4579_v60, 0.0  ;;  %v3406_v3 = vunpack.i.l.bf16 %v3405_v21  ;;  %v3407_v1 = vunpack.i.h.bf16 %v3405_v21  ;;  %3522 = vpow2.f32 %v1464_v46 }
 0x634   :  { %3209 = vmatmul.msk.f32.gmra.mxu1 %vm531_vm14, %v915_v0  ;;  %1180 = vadd.xlane.f32.xlu2 %v1179_v36  ;;  %v1492_v43 = vsel %vm531_vm14, %v4582_v48, 0.0  ;;  %v3519_v24 = vpop.eup %3518  ;;  %3524 = vrcp.f32 %v901_v30 }
 0x635   :  { %1276 = vmatpush.msrb.mxu2 %v3406_v3  ;;  %v1136_v38 = vpop.xlane.xlu2 %1135  ;;  %v916_v33 = vmul.f32 %v3519_v24, %v4426_v44 }
 0x636   :  { %v1154_v16 = vsub.f32 %v4477_v13, %v1136_v38 }
 0x637   :  { %1277 = vmatpush.msrb.mxu2 %v3407_v1  ;;  %1493 = vadd.xlane.f32.xlu0 %v1492_v43 }
 0x638   :  { %v4589_v59 = vpop.eup %3520  ;;  %v1164_v47 = vmul.f32 1.442695, %v1154_v16 }
 0x639   :  { %v1176_v9 = vsel %vm531_vm14, %v4589_v59, 0.0  ;;  %v4596_v61 = vpop.eup %3522 }
 0x63a   :  { %v3410_v20 = vpop.permute.xlu1 %3409  ;;  %1177 = vadd.xlane.f32.xlu1 %v1176_v9  ;;  %v3525_v41 = vpop.eup %3524  ;;  %3526 = vpow2.f32 %v1164_v47  ;;  %v1483_v13 = vsel %vm531_vm14, %v4596_v61, 0.0 }
 0x63b   :  { %v3411_v52 = vunpack.i.l.bf16 %v3410_v20  ;;  %v3412_v2 = vunpack.i.h.bf16 %v3410_v20  ;;  %v917_v35 = vmul.f32 %v3525_v41, %v4457_v34  ;;  %v1452_v34 = vsub.f32 %v4390_v63, %v4494_v51 }
 0x63c   :  { %3210 = vmatmul.msk.f32.gmra.mxu1 %vm531_vm14, %v916_v33 }
 0x63d   :  { %1572 = vmatpush.msra.mxu1 %v3411_v52  ;;  %v1462_v25 = vmul.f32 1.442695, %v1452_v34  ;;  %v1449_v52 = vpop.xlane.xlu2 %1448 }
 0x63f   :  { %1573 = vmatpush.msra.mxu1 %v3412_v2  ;;  %3528 = vpow2.f32 %v1462_v25  ;;  %v1457_v2 = vsub.f32 %v4486_v8, %v1449_v52 }
 0x640   :  { %v4602_v39 = vpop.eup %3526 }
 0x641   :  { %v1182_v4 = vsel %vm531_vm14, %v4602_v39, 0.0  ;;  %v1472_v41 = vmul.f32 1.442695, %v1457_v2 }
 0x642   :  { %v3415_v10 = vpop.permute.xlu1 %3414  ;;  %1484 = vadd.xlane.f32.xlu1 %v1483_v13 }
 0x643   :  { %v3416_v12 = vunpack.i.l.bf16 %v3415_v10  ;;  %v3417_v44 = vunpack.i.h.bf16 %v3415_v10 }
 0x644   :  { %3211 = vmatmul.msk.f32.gmra.mxu1 %vm531_vm14, %v917_v35 }
 0x645   :  { %1278 = vmatpush.msrb.mxu2 %v3416_v12  ;;  %v4613_v36 = vpop.eup %3528 }
 0x646   :  { %v1480_v63 = vsel %vm531_vm14, %v4613_v36, 0.0 }
 0x647   :  { %1279 = vmatpush.msrb.mxu2 %v3417_v44 }
 0x64a   :  { %1183 = vadd.xlane.f32.xlu1 %v1182_v4 }
 0x64c   :  { %3424 = vrot.lane.b32.xlu2 %v3984_v58, %s3725_s7  ;;  %v1148_v30 = vpop.xlane.xlu0 %1147 }
 0x654   :  { %v1151_v31 = vpop.xlane.xlu0 %1150 }
 0x655   :  { %v1159_v57 = vsub.f32 %v4510_v54, %v1151_v31 }
 0x657   :  { %v1174_v21 = vmul.f32 1.442695, %v1159_v57 }
 0x662   :  { %v983_v55 = vpop.f32.mrf.mxu1 }
 0x663   :  { %1611 = vrot.lane.b32.xlu0 %v983_v55, %s3710_s24 }
 0x667   :  { %v3420_v14 = vpop.permute.xlu0 %3419 }
 0x668   :  { %v3421_v6 = vunpack.i.l.bf16 %v3420_v14  ;;  %v3422_v29 = vunpack.i.h.bf16 %v3420_v14 }
 0x66a   :  { %1574 = vmatpush.msra.mxu1 %v3421_v6 }
 0x66c   :  { %1575 = vmatpush.msra.mxu1 %v3422_v29 }
 0x66d   :  { %v1139_v28 = vpop.xlane.xlu1 %1138 }
 0x66e   :  { %v1155_v58 = vsub.f32 %v4525_v53, %v1139_v28 }
 0x670   :  { %v1166_v0 = vmul.f32 1.442695, %v1155_v58 }
 0x672   :  { %3530 = vpow2.f32 %v1166_v0 }
 0x673   :  { %3532 = vpow2.f32 %v1174_v21 }
 0x675   :  { %1481 = vadd.xlane.f32.xlu2 %v1480_v63  ;;  %v1142_v51 = vpop.xlane.xlu1 %1141 }
 0x676   :  { %v1156_v3 = vsub.f32 %v4530_v50, %v1142_v51  ;;  %v1158_v50 = vsub.f32 %v4503_v62, %v1148_v30 }
 0x678   :  { %v4618_v46 = vpop.eup %3530  ;;  %v1168_v54 = vmul.f32 1.442695, %v1156_v3  ;;  %v1172_v33 = vmul.f32 1.442695, %v1158_v50 }
 0x679   :  { %v4620_v38 = vpop.eup %3532  ;;  %v1185_v53 = vsel %vm531_vm14, %v4618_v46, 0.0 }
 0x67a   :  { %3534 = vpow2.f32 %v1168_v54  ;;  %1186 = vadd.xlane.f32.xlu1 %v1185_v53  ;;  %v1197_v1 = vsel %vm531_vm14, %v4620_v38, 0.0 }
 0x67d   :  { %v1145_v43 = vpop.xlane.xlu1 %1144  ;;  %1198 = vadd.xlane.f32.xlu2 %v1197_v1 }
 0x67e   :  { %v1157_v24 = vsub.f32 %v4537_v40, %v1145_v43 }
 0x680   :  { %v4627_v16 = vpop.eup %3534  ;;  %v1170_v9 = vmul.f32 1.442695, %v1157_v24 }
 0x681   :  { %v1188_v20 = vsel %vm531_vm14, %v4627_v16, 0.0 }
 0x682   :  { %3536 = vpow2.f32 %v1170_v9  ;;  %1189 = vadd.xlane.f32.xlu1 %v1188_v20 }
 0x683   :  { %3538 = vpow2.f32 %v1172_v33 }
 0x684   :  { %3540 = vpow2.f32 %v1472_v41 }
 0x685   :  { %v1476_v12 = vpop.xlane.xlu1 %1475 }
 0x686   :  { %3542 = vrcp.f32 %v1476_v12 }
 0x688   :  { %v4632_v47 = vpop.eup %3536 }
 0x689   :  { %v1191_v40 = vsel %vm531_vm14, %v4632_v47, 0.0  ;;  %v4637_v13 = vpop.eup %3538 }
 0x68a   :  { %1192 = vadd.xlane.f32.xlu1 %v1191_v40  ;;  %v1194_v10 = vsel %vm531_vm14, %v4637_v13, 0.0  ;;  %v4642_v35 = vpop.eup %3540 }
 0x68b   :  { %v1495_v8 = vsel %vm531_vm14, %v4642_v35, 0.0 }
 0x68c   :  { %v3543_v55 = vpop.eup %3542 }
 0x68d   :  { %v1506_v14 = vmul.f32 %v3543_v55, %v4543_v7 }
 0x691   :  { %v986_v62 = vpop.f32.mrf.mxu1 }
 0x692   :  { %1195 = vadd.xlane.f32.xlu1 %v1194_v10  ;;  %1613 = vrot.lane.b32.xlu0 %v986_v62, %s3710_s24  ;;  %v1479_v30 = vpop.xlane.xlu0 %1478 }
 0x69a   :  { %1496 = vadd.xlane.f32.xlu1 %v1495_v8 }
 0x6a7   :  { %v1181_v44 = vpop.xlane.xlu2 %1180 }
 0x6ad   :  { %v1178_v4 = vpop.xlane.xlu1 %1177 }
 0x6ae   :  { %3544 = vrcp.f32 %v1178_v4 }
 0x6af   :  { %v3425_v31 = vpop.permute.xlu2 %3424  ;;  %3546 = vrcp.f32 %v1479_v30 }
 0x6b0   :  { %v3426_v34 = vunpack.i.l.bf16 %v3425_v31  ;;  %v3427_v25 = vunpack.i.h.bf16 %v3425_v31  ;;  %3548 = vrcp.f32 %v1181_v44 }
 0x6b2   :  { %1576 = vmatpush.msra.mxu1 %v3426_v34 }
 0x6b4   :  { %v3545_v6 = vpop.eup %3544  ;;  %1577 = vmatpush.msra.mxu1 %v3427_v25 }
 0x6b5   :  { %v1485_v29 = vpop.xlane.xlu1 %1484  ;;  %3252 = vmatmul.msk.f32.vlgmr.msra.gmra.mxu1 %vm531_vm14, %v1506_v14  ;;  %v1208_v57 = vmul.f32 %v3545_v6, %v4589_v59  ;;  %v3547_v28 = vpop.eup %3546 }
 0x6b6   :  { %v3549_v58 = vpop.eup %3548  ;;  %v1507_v21 = vmul.f32 %v3547_v28, %v4553_v17  ;;  %v1488_v17 = vpop.xlane.xlu0 %1487 }
 0x6b7   :  { %3228 = vmatmul.msk.f32.vlgmr.msrb.gmra.mxu2 %vm531_vm14, %v1208_v57  ;;  %v1209_v63 = vmul.f32 %v3549_v58, %v4579_v60  ;;  %v1728_v58 = vld [vmem:[#allocation2 + $0xc0] sm:$0xff] }
 0x6b8   :  { %1765 = vmatpush.msra.mxu3 %v1728_v58 }
 0x6bd   :  { %v1184_v0 = vpop.xlane.xlu1 %1183  ;;  %3253 = vmatmul.msk.f32.gmra.mxu1 %vm531_vm14, %v1507_v21 }
 0x6be   :  { %3550 = vrcp.f32 %v1184_v0  ;;  %v1491_v9 = vpop.xlane.xlu0 %1490  ;;  %v1727_v0 = vld [vmem:[#allocation2 + $0xb8] sm:$0xff] }
 0x6bf   :  { %3229 = vmatmul.msk.f32.gmra.mxu2 %vm531_vm14, %v1209_v63  ;;  %v1726_v63 = vld [vmem:[#allocation2 + $0xb0] sm:$0xff]  ;;  %1766 = vmatpush.msra.mxu3 %v1727_v0 }
 0x6c1   :  { %1767 = vmatpush.msra.mxu3 %v1726_v63 }
 0x6c4   :  { %v3551_v7 = vpop.eup %3550 }
 0x6c5   :  { %v1210_v51 = vmul.f32 %v3551_v7, %v4602_v39  ;;  %v989_v39 = vpop.f32.mrf.mxu1 }
 0x6c6   :  { %v1494_v41 = vpop.xlane.xlu0 %1493 }
 0x6c7   :  { %3230 = vmatmul.msk.f32.gmra.mxu2 %vm531_vm14, %v1210_v51 }
 0x6cd   :  { %v992_v2 = vpop.f32.mrf.mxu1 }
 0x6e8   :  { %v1482_v59 = vpop.xlane.xlu2 %1481 }
 0x6e9   :  { %3552 = vrcp.f32 %v1482_v59  ;;  %v1725_v59 = vld [vmem:[#allocation2 + $0xa8] sm:$0xff] }
 0x6ea   :  { %1768 = vmatpush.msra.mxu3 %v1725_v59 }
 0x6ed   :  { %v1187_v3 = vpop.xlane.xlu1 %1186 }
 0x6ee   :  { %3554 = vrcp.f32 %v1187_v3 }
 0x6ef   :  { %v3553_v54 = vpop.eup %3552  ;;  %3556 = vrcp.f32 %v1485_v29 }
 0x6f0   :  { %v1508_v53 = vmul.f32 %v3553_v54, %v4613_v36  ;;  %v1199_v8 = vpop.xlane.xlu2 %1198 }
 0x6f2   :  { %3254 = vmatmul.msk.f32.gmra.mxu1 %vm531_vm14, %v1508_v53 }
 0x6f4   :  { %v3555_v60 = vpop.eup %3554 }
 0x6f5   :  { %v3557_v1 = vpop.eup %3556  ;;  %v1190_v43 = vpop.xlane.xlu1 %1189  ;;  %v1211_v24 = vmul.f32 %v3555_v60, %v4618_v46 }
 0x6f6   :  { %3558 = vrcp.f32 %v1190_v43  ;;  %v1509_v50 = vmul.f32 %v3557_v1, %v4596_v61  ;;  %v1612_v43 = vpop.permute.xlu0 %1611 }
 0x6f7   :  { %3560 = vrcp.f32 %v1488_v17  ;;  %3231 = vmatmul.msk.f32.gmra.mxu2 %vm531_vm14, %v1211_v24 }
 0x6fa   :  { %3255 = vmatmul.msk.f32.gmra.mxu1 %vm531_vm14, %v1509_v50 }
 0x6fc   :  { %v3559_v20 = vpop.eup %3558 }
 0x6fd   :  { %v3561_v33 = vpop.eup %3560  ;;  %v1193_v36 = vpop.xlane.xlu1 %1192  ;;  %v1212_v52 = vmul.f32 %v3559_v20, %v4627_v16 }
 0x6fe   :  { %3562 = vrcp.f32 %v1193_v36  ;;  %v1510_v46 = vmul.f32 %v3561_v33, %v4561_v37  ;;  %v995_v37 = vpop.f32.mrf.mxu1 }
 0x6ff   :  { %3564 = vrcp.f32 %v1491_v9  ;;  %3232 = vmatmul.msk.f32.gmra.mxu2 %vm531_vm14, %v1212_v52 }
 0x702   :  { %3256 = vmatmul.msk.f32.gmra.mxu1 %vm531_vm14, %v1510_v46 }
 0x704   :  { %v3563_v40 = vpop.eup %3562  ;;  %v1614_v20 = vpop.permute.xlu0 %1613 }
 0x705   :  { %v3565_v61 = vpop.eup %3564  ;;  %v1196_v62 = vpop.xlane.xlu1 %1195  ;;  %v1213_v10 = vmul.f32 %v3563_v40, %v4632_v47  ;;  %v1700_v52 = vsel %vm441_vm13, %v4410_v22, %v1614_v20 }
 0x706   :  { %3566 = vrcp.f32 %v1196_v62  ;;  %v1511_v16 = vmul.f32 %v3565_v61, %v4570_v45  ;;  %v998_v34 = vpop.f32.mrf.mxu1 }
 0x707   :  { %3568 = vrcp.f32 %v1494_v41  ;;  %3233 = vmatmul.msk.f32.gmra.mxu2 %vm531_vm14, %v1213_v10 }
 0x708   :  { %3570 = vrcp.f32 %v1199_v8 }
 0x70a   :  { %3257 = vmatmul.msk.f32.gmra.mxu1 %vm531_vm14, %v1511_v16 }
 0x70c   :  { %v3567_v12 = vpop.eup %3566 }
 0x70d   :  { %v3569_v44 = vpop.eup %3568  ;;  %v1497_v4 = vpop.xlane.xlu1 %1496  ;;  %v1214_v30 = vmul.f32 %v3567_v12, %v4637_v13 }
 0x70e   :  { %3572 = vrcp.f32 %v1497_v4  ;;  %v1512_v47 = vmul.f32 %v3569_v44, %v4582_v48  ;;  %v3571_v31 = vpop.eup %3570  ;;  %v1001_v14 = vpop.f32.mrf.mxu1 }
 0x70f   :  { %3234 = vmatmul.msk.f32.gmra.mxu2 %vm531_vm14, %v1214_v30  ;;  %v1215_v45 = vmul.f32 %v3571_v31, %v4620_v38 }
 0x712   :  { %3258 = vmatmul.msk.f32.gmra.mxu1 %vm531_vm14, %v1512_v47 }
 0x714   :  { %v3573_v55 = vpop.eup %3572 }
 0x715   :  { %v1513_v25 = vmul.f32 %v3573_v55, %v4642_v35 }
 0x716   :  { %v1004_v13 = vpop.f32.mrf.mxu1 }
 0x717   :  { %3235 = vmatmul.msk.f32.gmra.mxu2 %vm531_vm14, %v1215_v45 }
 0x71a   :  { %3259 = vmatmul.msk.f32.gmra.mxu1 %vm531_vm14, %v1513_v25 }
 0x732   :  { %v1579_v6 = vpop.f32.mrf.mxu1 }
 0x733   :  { %1675 = vrot.lane.b32.xlu1 %v1579_v6, %s3726_s8 }
 0x73a   :  { %v1281_v48 = vpop.f32.mrf.mxu2  ;;  %v1582_v29 = vpop.f32.mrf.mxu1 }
 0x73b   :  { %1643 = vrot.lane.b32.xlu2 %v1281_v48, %s3727_s9  ;;  %1615 = vrot.lane.b32.xlu1 %v989_v39, %s3710_s24  ;;  %v1699_v39 = vsel %vm441_vm13, %v4396_v26, %v1612_v43 }
 0x73c   :  { %1677 = vrot.lane.b32.xlu0 %v1582_v29, %s3726_s8 }
 0x742   :  { %v1284_v38 = vpop.f32.mrf.mxu2 }
 0x743   :  { %1645 = vrot.lane.b32.xlu2 %v1284_v38, %s3727_s9  ;;  %1617 = vrot.lane.b32.xlu1 %v992_v2, %s3710_s24 }
 0x74a   :  { %v1287_v35 = vpop.f32.mrf.mxu2 }
 0x74b   :  { %1647 = vrot.lane.b32.xlu2 %v1287_v35, %s3727_s9  ;;  %1619 = vrot.lane.b32.xlu1 %v995_v37, %s3710_s24 }
 0x753   :  { %1621 = vrot.lane.b32.xlu1 %v998_v34, %s3710_s24 }
 0x75b   :  { %1623 = vrot.lane.b32.xlu1 %v1001_v14, %s3710_s24 }
 0x763   :  { %1625 = vrot.lane.b32.xlu1 %v1004_v13, %s3710_s24 }
 0x76f   :  { %v1585_v57 = vpop.f32.mrf.mxu1 }
 0x770   :  { %1679 = vrot.lane.b32.xlu0 %v1585_v57, %s3726_s8 }
 0x777   :  { %v1588_v28 = vpop.f32.mrf.mxu1 }
 0x778   :  { %1681 = vrot.lane.b32.xlu0 %v1588_v28, %s3726_s8 }
 0x77a   :  { %v1290_v21 = vpop.f32.mrf.mxu2 }
 0x77b   :  { %1649 = vrot.lane.b32.xlu2 %v1290_v21, %s3727_s9 }
 0x77f   :  { %v1591_v7 = vpop.f32.mrf.mxu1 }
 0x780   :  { %1683 = vrot.lane.b32.xlu0 %v1591_v7, %s3726_s8  ;;  %v1802_v7 = vld [vmem:[%s5087_s1 + $0x3] ss:$0 sm:$0xff] }
 0x782   :  { %v1293_v51 = vpop.f32.mrf.mxu2 }
 0x783   :  { %1651 = vrot.lane.b32.xlu2 %v1293_v51, %s3727_s9 }
 0x787   :  { %v1594_v3 = vpop.f32.mrf.mxu1 }
 0x788   :  { %1685 = vrot.lane.b32.xlu0 %v1594_v3, %s3726_s8 }
 0x78a   :  { %v1296_v54 = vpop.f32.mrf.mxu2 }
 0x78b   :  { %1653 = vrot.lane.b32.xlu2 %v1296_v54, %s3727_s9 }
 0x78f   :  { %v1597_v17 = vpop.f32.mrf.mxu1 }
 0x790   :  { %1687 = vrot.lane.b32.xlu0 %v1597_v17, %s3726_s8 }
 0x792   :  { %v1299_v53 = vpop.f32.mrf.mxu2 }
 0x793   :  { %1655 = vrot.lane.b32.xlu2 %v1299_v53, %s3727_s9 }
 0x795   :  { %v1644_v24 = vpop.permute.xlu2 %1643 }
 0x796   :  { %v1708_v50 = vsel %vm1707_vm15, %v1699_v39, %v1644_v24 }
 0x797   :  { %v1600_v60 = vpop.f32.mrf.mxu1 }
 0x798   :  { %1689 = vrot.lane.b32.xlu0 %v1600_v60, %s3726_s8 }
 0x79a   :  { %v1302_v1 = vpop.f32.mrf.mxu2 }
 0x79b   :  { %1657 = vrot.lane.b32.xlu2 %v1302_v1, %s3727_s9 }
 0x79d   :  { %v1646_v36 = vpop.permute.xlu2 %1645 }
 0x79e   :  { %v1709_v46 = vsel %vm1707_vm15, %v1700_v52, %v1646_v36  ;;  %v5100_v52 = vld [vmem:[#allocation11_spill] sm:$0xff] }
 0x7a5   :  { %v1676_v9 = vpop.permute.xlu1 %1675  ;;  %v1648_v41 = vpop.permute.xlu2 %1647 }
 0x7a6   :  { %v1717_v33 = vsel %vm1716_vm0, %v1708_v50, %v1676_v9 }
 0x7a7   :  { %3260 = vmatmul.msk.f32.vlgmr.msra.gmra.mxu3 %vm139_vm2, %v1717_v33 }
 0x7ad   :  { %v1616_v26 = vpop.permute.xlu1 %1615 }
 0x7ae   :  { %v1678_v2 = vpop.permute.xlu0 %1677  ;;  %v1701_v62 = vsel %vm441_vm13, %v4424_v32, %v1616_v26  ;;  %v5101_v26 = vld [vmem:[#allocation12_spill] sm:$0xff] }
 0x7af   :  { %v1718_v40 = vsel %vm1716_vm0, %v1709_v46, %v1678_v2  ;;  %v1710_v8 = vsel %vm1707_vm15, %v1701_v62, %v1648_v41 }
 0x7b0   :  { %3261 = vmatmul.msk.f32.gmra.mxu3 %vm139_vm2, %v1718_v40 }
 0x7b5   :  { %v1618_v61 = vpop.permute.xlu1 %1617 }
 0x7b6   :  { %v1702_v37 = vsel %vm441_vm13, %v4430_v56, %v1618_v61 }
 0x7bd   :  { %v1620_v22 = vpop.permute.xlu1 %1619 }
 0x7be   :  { %v1703_v32 = vsel %vm441_vm13, %v4434_v42, %v1620_v22 }
 0x7c5   :  { %v1622_v31 = vpop.permute.xlu1 %1621 }
 0x7c6   :  { %v1704_v56 = vsel %vm441_vm13, %v4441_v49, %v1622_v31 }
 0x7cd   :  { %v1624_v48 = vpop.permute.xlu1 %1623 }
 0x7ce   :  { %v1705_v29 = vsel %vm441_vm13, %v4445_v5, %v1624_v48 }
 0x7d5   :  { %v1650_v10 = vpop.permute.xlu2 %1649  ;;  %v1626_v49 = vpop.permute.xlu1 %1625 }
 0x7d6   :  { %v1711_v4 = vsel %vm1707_vm15, %v1702_v37, %v1650_v10  ;;  %v1706_v58 = vsel %vm441_vm13, %v4453_v18, %v1626_v49  ;;  %v5102_v10 = vld [vmem:[#allocation13_spill] sm:$0xff]  ;;  %v5103_v37 = vld [vmem:[#allocation14_spill] sm:$0xff] }
 0x7dd   :  { %v1652_v44 = vpop.permute.xlu2 %1651 }
 0x7de   :  { %v1712_v55 = vsel %vm1707_vm15, %v1703_v32, %v1652_v44 }
 0x7e2   :  { %v1680_v16 = vpop.permute.xlu0 %1679 }
 0x7e3   :  { %v1719_v12 = vsel %vm1716_vm0, %v1710_v8, %v1680_v16 }
 0x7e4   :  { %3262 = vmatmul.msk.f32.gmra.mxu3 %vm139_vm2, %v1719_v12 }
 0x7e5   :  { %v1654_v34 = vpop.permute.xlu2 %1653 }
 0x7e6   :  { %v1713_v14 = vsel %vm1707_vm15, %v1704_v56, %v1654_v34 }
 0x7ea   :  { %v1682_v30 = vpop.permute.xlu0 %1681 }
 0x7eb   :  { %v1720_v47 = vsel %vm1716_vm0, %v1711_v4, %v1682_v30 }
 0x7ec   :  { %3263 = vmatmul.msk.f32.gmra.mxu3 %vm139_vm2, %v1720_v47 }
 0x7ed   :  { %v1656_v42 = vpop.permute.xlu2 %1655 }
 0x7ee   :  { %v1714_v38 = vsel %vm1707_vm15, %v1705_v29, %v1656_v42 }
 0x7f2   :  { %v1684_v45 = vpop.permute.xlu0 %1683 }
 0x7f3   :  { %v1721_v25 = vsel %vm1716_vm0, %v1712_v55, %v1684_v45 }
 0x7f4   :  { %3264 = vmatmul.msk.f32.gmra.mxu3 %vm139_vm2, %v1721_v25 }
 0x7f5   :  { %v1658_v28 = vpop.permute.xlu2 %1657 }
 0x7f6   :  { %v1715_v21 = vsel %vm1707_vm15, %v1706_v58, %v1658_v28 }
 0x7fa   :  { %v1686_v13 = vpop.permute.xlu0 %1685 }
 0x7fb   :  { %v1722_v6 = vsel %vm1716_vm0, %v1713_v14, %v1686_v13 }
 0x7fc   :  { %3265 = vmatmul.msk.f32.gmra.mxu3 %vm139_vm2, %v1722_v6 }
 0x802   :  { %v1688_v35 = vpop.permute.xlu0 %1687 }
 0x803   :  { %v1723_v57 = vsel %vm1716_vm0, %v1714_v38, %v1688_v35 }
 0x804   :  { %3266 = vmatmul.msk.f32.gmra.mxu3 %vm139_vm2, %v1723_v57 }
 0x80a   :  { %v1690_v0 = vpop.permute.xlu0 %1689 }
 0x80b   :  { %v1724_v63 = vsel %vm1716_vm0, %v1715_v21, %v1690_v0 }
 0x80c   :  { %3267 = vmatmul.msk.f32.gmra.mxu3 %vm139_vm2, %v1724_v63 }
 0x82a   :  { %v1770_v5 = vpop.f32.mrf.mxu3 }
 0x82b   :  { %v1794_v51 = vadd.f32 %v1770_v5, %v3795_v11 }
 0x82d   :  { %v4744_v59 = vadd.f32 %v1802_v7, %v1794_v51 }
 0x82f   :  { %v1813_v3 = vsel %vm139_vm2, %v4744_v59, 0.0 }
 0x830   :  { %1814 = vadd.xlane.f32.xlu1 %v1813_v3 }
 0x833   :  { %v1773_v18 = vpop.f32.mrf.mxu3 }
 0x834   :  { %v1795_v54 = vadd.f32 %v1773_v18, %v3799_v15 }
 0x836   :  { %v4749_v17 = vadd.f32 %v1802_v7, %v1795_v54 }
 0x838   :  { %v1816_v53 = vsel %vm139_vm2, %v4749_v17, 0.0 }
 0x839   :  { %1817 = vadd.xlane.f32.xlu2 %v1816_v53 }
 0x867   :  { %v1776_v60 = vpop.f32.mrf.mxu3 }
 0x868   :  { %v1796_v1 = vadd.f32 %v1776_v60, %v3803_v19 }
 0x86a   :  { %v4754_v43 = vadd.f32 %v1802_v7, %v1796_v1  ;;  %v2008_v1 = vld [vmem:[#allocation2 + $0xe0] sm:$0xff] }
 0x86b   :  { %2046 = vmatpush.msra.mxu2 %v2008_v1 }
 0x86c   :  { %v1819_v11 = vsel %vm139_vm2, %v4754_v43, 0.0 }
 0x86d   :  { %1820 = vadd.xlane.f32.xlu0 %v1819_v11  ;;  %v2007_v11 = vld [vmem:[#allocation2 + $0xd8] sm:$0xff] }
 0x86e   :  { %2047 = vmatpush.msra.mxu2 %v2007_v11 }
 0x86f   :  { %v1779_v24 = vpop.f32.mrf.mxu3 }
 0x870   :  { %v1797_v39 = vadd.f32 %v1779_v24, %v3807_v23  ;;  %v2006_v24 = vld [vmem:[#allocation2 + $0xd0] sm:$0xff] }
 0x871   :  { %2048 = vmatpush.msra.mxu2 %v2006_v24 }
 0x872   :  { %v4759_v50 = vadd.f32 %v1802_v7, %v1797_v39  ;;  %v2005_v39 = vld [vmem:[#allocation2 + $0xc8] sm:$0xff] }
 0x873   :  { %2049 = vmatpush.msra.mxu2 %v2005_v39 }
 0x874   :  { %v1822_v15 = vsel %vm139_vm2, %v4759_v50, 0.0 }
 0x875   :  { %1823 = vadd.xlane.f32.xlu1 %v1822_v15 }
 0x877   :  { %v1782_v9 = vpop.f32.mrf.mxu3 }
 0x878   :  { %v1798_v20 = vadd.f32 %v1782_v9, %v3811_v27 }
 0x87a   :  { %v4764_v33 = vadd.f32 %v1802_v7, %v1798_v20 }
 0x87c   :  { %v1825_v19 = vsel %vm139_vm2, %v4764_v33, 0.0 }
 0x87d   :  { %1826 = vadd.xlane.f32.xlu2 %v1825_v19 }
 0x87f   :  { %v1785_v36 = vpop.f32.mrf.mxu3 }
 0x880   :  { %v1799_v46 = vadd.f32 %v1785_v36, %v5100_v52 }
 0x882   :  { %v4769_v2 = vadd.f32 %v1802_v7, %v1799_v46 }
 0x884   :  { %v1828_v23 = vsel %vm139_vm2, %v4769_v2, 0.0 }
 0x885   :  { %1829 = vadd.xlane.f32.xlu0 %v1828_v23 }
 0x887   :  { %v1788_v40 = vpop.f32.mrf.mxu3 }
 0x888   :  { %v1800_v41 = vadd.f32 %v1788_v40, %v5101_v26 }
 0x88a   :  { %v4774_v61 = vadd.f32 %v1802_v7, %v1800_v41 }
 0x88c   :  { %v1831_v27 = vsel %vm139_vm2, %v4774_v61, 0.0 }
 0x88d   :  { %1832 = vadd.xlane.f32.xlu2 %v1831_v27 }
 0x88f   :  { %v1791_v12 = vpop.f32.mrf.mxu3 }
 0x890   :  { %v1801_v44 = vadd.f32 %v1791_v12, %v5103_v37 }
 0x892   :  { %v4787_v32 = vadd.f32 %v1802_v7, %v1801_v44 }
 0x894   :  { %v1834_v45 = vsel %vm139_vm2, %v4787_v32, 0.0 }
 0x8a3   :  { %v1815_v62 = vpop.xlane.xlu1 %1814 }
 0x8a4   :  { %v1837_v16 = vmul.f32 %v1815_v62, %v5102_v10 }
 0x8a6   :  { %v4780_v8 = vsub.f32 %v4744_v59, %v1837_v16 }
 0x8a8   :  { %v1853_v22 = vmul.f32 %v4780_v8, %v4780_v8 }
 0x8aa   :  { %v1861_v4 = vsel %vm139_vm2, %v1853_v22, 0.0 }
 0x8ab   :  { %1862 = vadd.xlane.f32.xlu1 %v1861_v4 }
 0x8ac   :  { %v1818_v30 = vpop.xlane.xlu2 %1817 }
 0x8ad   :  { %v1838_v47 = vmul.f32 %v1818_v30, %v5102_v10  ;;  %v4844_v30 = vld [vmem:[%s5087_s1 + $0x4] ss:$0 sm:$0xff] }
 0x8af   :  { %v4790_v31 = vsub.f32 %v4749_v17, %v1838_v47 }
 0x8b1   :  { %v1854_v55 = vmul.f32 %v4790_v31, %v4790_v31 }
 0x8b3   :  { %v1864_v34 = vsel %vm139_vm2, %v1854_v55, 0.0  ;;  %1835 = vadd.xlane.f32.xlu1 %v1834_v45 }
 0x8b4   :  { %1865 = vadd.xlane.f32.xlu0 %v1864_v34  ;;  %v4850_v34 = vld [vmem:[%s5087_s1 + $0x5] ss:$0 sm:$0xff] }
 0x8e0   :  { %v1821_v25 = vpop.xlane.xlu0 %1820 }
 0x8e1   :  { %v1839_v56 = vmul.f32 %v1821_v25, %v5102_v10 }
 0x8e3   :  { %v4799_v14 = vsub.f32 %v4754_v43, %v1839_v56 }
 0x8e5   :  { %v1855_v13 = vmul.f32 %v4799_v14, %v4799_v14 }
 0x8e7   :  { %v1867_v6 = vsel %vm139_vm2, %v1855_v13, 0.0 }
 0x8e8   :  { %v1824_v48 = vpop.xlane.xlu1 %1823  ;;  %1868 = vadd.xlane.f32.xlu2 %v1867_v6 }
 0x8e9   :  { %v1840_v42 = vmul.f32 %v1824_v48, %v5102_v10 }
 0x8eb   :  { %v4806_v29 = vsub.f32 %v4759_v50, %v1840_v42 }
 0x8ed   :  { %v1856_v38 = vmul.f32 %v4806_v29, %v4806_v29 }
 0x8ef   :  { %v1870_v35 = vsel %vm139_vm2, %v1856_v38, 0.0 }
 0x8f0   :  { %v1827_v57 = vpop.xlane.xlu2 %1826  ;;  %1871 = vadd.xlane.f32.xlu0 %v1870_v35 }
 0x8f1   :  { %v1841_v49 = vmul.f32 %v1827_v57, %v5102_v10 }
 0x8f3   :  { %v4813_v28 = vsub.f32 %v4764_v33, %v1841_v49 }
 0x8f5   :  { %v1857_v58 = vmul.f32 %v4813_v28, %v4813_v28 }
 0x8f7   :  { %v1873_v21 = vsel %vm139_vm2, %v1857_v58, 0.0 }
 0x8f8   :  { %1874 = vadd.xlane.f32.xlu1 %v1873_v21  ;;  %v1830_v0 = vpop.xlane.xlu0 %1829 }
 0x8f9   :  { %v1842_v63 = vmul.f32 %v1830_v0, %v5102_v10 }
 0x8fb   :  { %v4820_v5 = vsub.f32 %v4769_v2, %v1842_v63 }
 0x8fd   :  { %v1858_v7 = vmul.f32 %v4820_v5, %v4820_v5 }
 0x8ff   :  { %v1876_v51 = vsel %vm139_vm2, %v1858_v7, 0.0 }
 0x900   :  { %v1833_v3 = vpop.xlane.xlu2 %1832  ;;  %1877 = vadd.xlane.f32.xlu2 %v1876_v51 }
 0x901   :  { %v1843_v18 = vmul.f32 %v1833_v3, %v5102_v10 }
 0x903   :  { %v4827_v54 = vsub.f32 %v4774_v61, %v1843_v18 }
 0x905   :  { %v1859_v53 = vmul.f32 %v4827_v54, %v4827_v54 }
 0x907   :  { %v1879_v60 = vsel %vm139_vm2, %v1859_v53, 0.0 }
 0x908   :  { %1880 = vadd.xlane.f32.xlu0 %v1879_v60 }
 0x91e   :  { %v1863_v15 = vpop.xlane.xlu1 %1862 }
 0x91f   :  { %v1885_v9 = vmul.f32 %v1863_v15, %v5102_v10 }
 0x921   :  { %v1893_v20 = vadd.f32 1e-05, %v1885_v9 }
 0x923   :  { %3574 = vrsqrt.f32 %v1893_v20  ;;  %vm1907_vm3 = vweird.f32 %v1893_v20 }
 0x926   :  { %v1836_v19 = vpop.xlane.xlu1 %1835 }
 0x927   :  { %v1844_v36 = vmul.f32 %v1836_v19, %v5102_v10  ;;  %v1866_v52 = vpop.xlane.xlu0 %1865 }
 0x928   :  { %v1886_v46 = vmul.f32 %v1866_v52, %v5102_v10 }
 0x929   :  { %v3575_v23 = vpop.eup %3574  ;;  %v4836_v40 = vsub.f32 %v4787_v32, %v1844_v36 }
 0x92a   :  { %v1902_v26 = vmul.f32 %v3575_v23, %v1893_v20  ;;  %v1894_v41 = vadd.f32 1e-05, %v1886_v46  ;;  %vm1908_vm1 = vweird.f32 %v3575_v23 }
 0x92b   :  { %v1860_v27 = vmul.f32 %v4836_v40, %v4836_v40  ;;  %vm1909_vm4 = vmor %vm1907_vm3, %vm1908_vm1 }
 0x92c   :  { %v1903_v62 = vmul.f32 %v3575_v23, %v1902_v26  ;;  %3576 = vrsqrt.f32 %v1894_v41  ;;  %vm1917_vm6 = vweird.f32 %v1894_v41 }
 0x92d   :  { %v1882_v16 = vsel %vm139_vm2, %v1860_v27, 0.0 }
 0x92e   :  { %v1904_v12 = vmul.f32 0.5, %v1903_v62  ;;  %1883 = vadd.xlane.f32.xlu1 %v1882_v16 }
 0x930   :  { %v1905_v22 = vsub.f32 1.5, %v1904_v12 }
 0x932   :  { %v3577_v37 = vpop.eup %3576  ;;  %v1906_v44 = vmul.f32 %v3575_v23, %v1905_v22 }
 0x933   :  { %v1912_v4 = vmul.f32 %v3577_v37, %v1894_v41  ;;  %vm1918_vm5 = vweird.f32 %v3577_v37 }
 0x934   :  { %v1910_v47 = vsel %vm1909_vm4, %v3575_v23, %v1906_v44  ;;  %vm1919_vm7 = vmor %vm1917_vm6, %vm1918_vm5 }
 0x935   :  { %v1981_v55 = vmul.f32 %v1910_v47, %v4780_v8  ;;  %v1913_v45 = vmul.f32 %v3577_v37, %v1912_v4 }
 0x937   :  { %v1989_v25 = vmul.f32 %v1981_v55, %v4844_v30  ;;  %v1914_v56 = vmul.f32 0.5, %v1913_v45 }
 0x939   :  { %v1915_v13 = vsub.f32 1.5, %v1914_v56  ;;  %v1997_v6 = vadd.f32 %v1989_v25, %v4850_v34 }
 0x93b   :  { %v1916_v48 = vmul.f32 %v3577_v37, %v1915_v13  ;;  %3268 = vmatmul.msk.f32.vlgmr.msra.gmra.mxu2 %vm139_vm2, %v1997_v6 }
 0x93d   :  { %v1920_v42 = vsel %vm1919_vm7, %v3577_v37, %v1916_v48 }
 0x93e   :  { %v1982_v8 = vmul.f32 %v1920_v42, %v4790_v31 }
 0x940   :  { %v1990_v38 = vmul.f32 %v1982_v8, %v4844_v30 }
 0x942   :  { %v1998_v35 = vadd.f32 %v1990_v38, %v4850_v34 }
 0x944   :  { %3269 = vmatmul.msk.f32.gmra.mxu2 %vm139_vm2, %v1998_v35 }
 0x95b   :  { %v1869_v57 = vpop.xlane.xlu2 %1868 }
 0x95c   :  { %v1887_v49 = vmul.f32 %v1869_v57, %v5102_v10 }
 0x95e   :  { %v1895_v58 = vadd.f32 1e-05, %v1887_v49 }
 0x960   :  { %3578 = vrsqrt.f32 %v1895_v58  ;;  %vm1927_vm9 = vweird.f32 %v1895_v58 }
 0x963   :  { %v1872_v21 = vpop.xlane.xlu0 %1871 }
 0x964   :  { %v1888_v0 = vmul.f32 %v1872_v21, %v5102_v10 }
 0x966   :  { %v3579_v63 = vpop.eup %3578  ;;  %v1896_v7 = vadd.f32 1e-05, %v1888_v0 }
 0x967   :  { %v1922_v51 = vmul.f32 %v3579_v63, %v1895_v58  ;;  %vm1928_vm8 = vweird.f32 %v3579_v63 }
 0x968   :  { %3580 = vrsqrt.f32 %v1896_v7  ;;  %vm1929_vm10 = vmor %vm1927_vm9, %vm1928_vm8  ;;  %vm1937_vm12 = vweird.f32 %v1896_v7 }
 0x969   :  { %v1923_v3 = vmul.f32 %v3579_v63, %v1922_v51 }
 0x96b   :  { %v1924_v31 = vmul.f32 0.5, %v1923_v3  ;;  %v1875_v18 = vpop.xlane.xlu1 %1874 }
 0x96c   :  { %v1889_v53 = vmul.f32 %v1875_v18, %v5102_v10 }
 0x96d   :  { %v1925_v60 = vsub.f32 1.5, %v1924_v31 }
 0x96e   :  { %v3581_v1 = vpop.eup %3580  ;;  %v1897_v11 = vadd.f32 1e-05, %v1889_v53 }
 0x96f   :  { %v1926_v24 = vmul.f32 %v3579_v63, %v1925_v60  ;;  %v1932_v39 = vmul.f32 %v3581_v1, %v1896_v7  ;;  %vm1938_vm11 = vweird.f32 %v3581_v1 }
 0x970   :  { %3582 = vrsqrt.f32 %v1897_v11  ;;  %vm1939_vm13 = vmor %vm1937_vm12, %vm1938_vm11  ;;  %vm1947_vm1 = vweird.f32 %v1897_v11 }
 0x971   :  { %v1930_v15 = vsel %vm1929_vm10, %v3579_v63, %v1926_v24  ;;  %v1933_v9 = vmul.f32 %v3581_v1, %v1932_v39 }
 0x972   :  { %v1983_v20 = vmul.f32 %v1930_v15, %v4799_v14  ;;  %v2154_v15 = vld [vmem:[#allocation2 + $0x120] sm:$0xff] }
 0x973   :  { %v1934_v19 = vmul.f32 0.5, %v1933_v9  ;;  %v1878_v36 = vpop.xlane.xlu2 %1877  ;;  %2187 = vmatpush.msrb.mxu0 %v2154_v15  ;;  %v2153_v9 = vld [vmem:[#allocation2 + $0x118] sm:$0xff] }
 0x974   :  { %v1890_v52 = vmul.f32 %v1878_v36, %v5102_v10  ;;  %v1991_v46 = vmul.f32 %v1983_v20, %v4844_v30  ;;  %v2152_v36 = vld [vmem:[#allocation2 + $0x110] sm:$0xff] }
 0x975   :  { %v1935_v23 = vsub.f32 1.5, %v1934_v19  ;;  %2188 = vmatpush.msrb.mxu0 %v2153_v9 }
 0x976   :  { %v3583_v26 = vpop.eup %3582  ;;  %v1898_v41 = vadd.f32 1e-05, %v1890_v52  ;;  %v1999_v27 = vadd.f32 %v1991_v46, %v4850_v34  ;;  %v2151_v52 = vld [vmem:[#allocation2 + $0x108] sm:$0xff] }
 0x977   :  { %v1936_v62 = vmul.f32 %v3581_v1, %v1935_v23  ;;  %v1942_v16 = vmul.f32 %v3583_v26, %v1897_v11  ;;  %vm1948_vm0 = vweird.f32 %v3583_v26  ;;  %2189 = vmatpush.msrb.mxu0 %v2152_v36  ;;  %v2150_v23 = vld [vmem:[#allocation2 + $0x100] sm:$0xff] }
 0x978   :  { %3584 = vrsqrt.f32 %v1898_v41  ;;  %3270 = vmatmul.msk.f32.gmra.mxu2 %vm139_vm2, %v1999_v27  ;;  %vm1949_vm3 = vmor %vm1947_vm1, %vm1948_vm0  ;;  %vm1957_vm5 = vweird.f32 %v1898_v41  ;;  %v2148_v27 = vld [vmem:[#allocation2 + $0xf0] sm:$0xff]  ;;  %vm2287_vm0 = vcmask 293888  }
 0x979   :  { %v1940_v14 = vsel %vm1939_vm13, %v3581_v1, %v1936_v62  ;;  %v1943_v12 = vmul.f32 %v3583_v26, %v1942_v16  ;;  %2190 = vmatpush.msrb.mxu0 %v2151_v52  ;;  %v2147_v62 = vld [vmem:[#allocation2 + $0xe8] sm:$0xff]  ;;  %vm2294_vm13 = vcmask 1043456  }
 0x97a   :  { %v1984_v22 = vmul.f32 %v1940_v14, %v4806_v29 }
 0x97b   :  { %v1944_v37 = vmul.f32 0.5, %v1943_v12  ;;  %v1881_v44 = vpop.xlane.xlu0 %1880  ;;  %2191 = vmatpush.msrb.mxu0 %v2150_v23 }
 0x97c   :  { %v1891_v4 = vmul.f32 %v1881_v44, %v5102_v10  ;;  %v1992_v47 = vmul.f32 %v1984_v22, %v4844_v30  ;;  %v4890_v22 = vld [vmem:[%s5087_s1 + $0x6] ss:$0 sm:$0xff] }
 0x97d   :  { %v1945_v55 = vsub.f32 1.5, %v1944_v37 }
 0x97e   :  { %v3585_v45 = vpop.eup %3584  ;;  %v1899_v25 = vadd.f32 1e-05, %v1891_v4  ;;  %v2000_v56 = vadd.f32 %v1992_v47, %v4850_v34 }
 0x97f   :  { %v1946_v13 = vmul.f32 %v3583_v26, %v1945_v55  ;;  %v1952_v6 = vmul.f32 %v3585_v45, %v1898_v41  ;;  %vm1958_vm4 = vweird.f32 %v3585_v45  ;;  %v2149_v41 = vld [vmem:[#allocation2 + $0xf8] sm:$0xff] }
 0x980   :  { %3586 = vrsqrt.f32 %v1899_v25  ;;  %3271 = vmatmul.msk.f32.gmra.mxu2 %vm139_vm2, %v2000_v56  ;;  %vm1959_vm6 = vmor %vm1957_vm5, %vm1958_vm4  ;;  %vm1967_vm8 = vweird.f32 %v1899_v25  ;;  %2192 = vmatpush.msrb.mxu0 %v2149_v41 }
 0x981   :  { %v1950_v29 = vsel %vm1949_vm3, %v3583_v26, %v1946_v13  ;;  %v1953_v48 = vmul.f32 %v3585_v45, %v1952_v6 }
 0x982   :  { %v1985_v42 = vmul.f32 %v1950_v29, %v4813_v28  ;;  %2193 = vmatpush.msrb.mxu0 %v2148_v27 }
 0x983   :  { %v1954_v8 = vmul.f32 0.5, %v1953_v48 }
 0x984   :  { %v1993_v38 = vmul.f32 %v1985_v42, %v4844_v30  ;;  %2194 = vmatpush.msrb.mxu0 %v2147_v62 }
 0x985   :  { %v1955_v35 = vsub.f32 1.5, %v1954_v8 }
 0x986   :  { %v3587_v57 = vpop.eup %3586  ;;  %v2001_v49 = vadd.f32 %v1993_v38, %v4850_v34 }
 0x987   :  { %v1956_v58 = vmul.f32 %v3585_v45, %v1955_v35  ;;  %v1962_v21 = vmul.f32 %v3587_v57, %v1899_v25  ;;  %vm1968_vm7 = vweird.f32 %v3587_v57 }
 0x988   :  { %3272 = vmatmul.msk.f32.gmra.mxu2 %vm139_vm2, %v2001_v49  ;;  %vm1969_vm9 = vmor %vm1967_vm8, %vm1968_vm7 }
 0x989   :  { %v1960_v0 = vsel %vm1959_vm6, %v3585_v45, %v1956_v58  ;;  %v1963_v63 = vmul.f32 %v3587_v57, %v1962_v21 }
 0x98a   :  { %v1986_v7 = vmul.f32 %v1960_v0, %v4820_v5 }
 0x98b   :  { %v1964_v51 = vmul.f32 0.5, %v1963_v63 }
 0x98c   :  { %v1994_v28 = vmul.f32 %v1986_v7, %v4844_v30 }
 0x98d   :  { %v1965_v3 = vsub.f32 1.5, %v1964_v51 }
 0x98e   :  { %v2002_v31 = vadd.f32 %v1994_v28, %v4850_v34 }
 0x98f   :  { %v1966_v18 = vmul.f32 %v3587_v57, %v1965_v3 }
 0x990   :  { %3273 = vmatmul.msk.f32.gmra.mxu2 %vm139_vm2, %v2002_v31 }
 0x991   :  { %v1970_v53 = vsel %vm1969_vm9, %v3587_v57, %v1966_v18 }
 0x992   :  { %v1987_v60 = vmul.f32 %v1970_v53, %v4827_v54 }
 0x994   :  { %v1995_v1 = vmul.f32 %v1987_v60, %v4844_v30 }
 0x996   :  { %v2003_v11 = vadd.f32 %v1995_v1, %v4850_v34 }
 0x998   :  { %3274 = vmatmul.msk.f32.gmra.mxu2 %vm139_vm2, %v2003_v11 }
 0x9a1   :  { %v1884_v5 = vpop.xlane.xlu1 %1883 }
 0x9a2   :  { %v1892_v24 = vmul.f32 %v1884_v5, %v5102_v10 }
 0x9a4   :  { %v1900_v39 = vadd.f32 1e-05, %v1892_v24 }
 0x9a6   :  { %3588 = vrsqrt.f32 %v1900_v39  ;;  %vm1977_vm11 = vweird.f32 %v1900_v39 }
 0x9ac   :  { %v3589_v20 = vpop.eup %3588 }
 0x9ad   :  { %v1972_v19 = vmul.f32 %v3589_v20, %v1900_v39  ;;  %vm1978_vm10 = vweird.f32 %v3589_v20 }
 0x9ae   :  { %vm1979_vm12 = vmor %vm1977_vm11, %vm1978_vm10 }
 0x9af   :  { %v1973_v54 = vmul.f32 %v3589_v20, %v1972_v19 }
 0x9b1   :  { %v1974_v46 = vmul.f32 0.5, %v1973_v54 }
 0x9b3   :  { %v1975_v26 = vsub.f32 1.5, %v1974_v46 }
 0x9b5   :  { %v1976_v10 = vmul.f32 %v3589_v20, %v1975_v26 }
 0x9b7   :  { %v1980_v16 = vsel %vm1979_vm12, %v3589_v20, %v1976_v10 }
 0x9b8   :  { %v1988_v14 = vmul.f32 %v1980_v16, %v4836_v40 }
 0x9ba   :  { %v1996_v12 = vmul.f32 %v1988_v14, %v4844_v30 }
 0x9bc   :  { %v2004_v37 = vadd.f32 %v1996_v12, %v4850_v34 }
 0x9be   :  { %v2051_v44 = vpop.f32.mrf.mxu2  ;;  %3275 = vmatmul.msk.f32.gmra.mxu2 %vm139_vm2, %v2004_v37 }
 0x9bf   :  { %v2052_v4 = vadd.f32 %v2051_v44, %v4890_v22 }
 0x9c1   :  { %v2075_v47 = vmul.f32 %v2052_v4, %v2052_v4 }
 0x9c3   :  { %v2083_v55 = vmul.f32 %v2075_v47, %v2052_v4 }
 0x9c5   :  { %v2091_v45 = vmul.f32 0.044715, %v2083_v55 }
 0x9c7   :  { %v2099_v25 = vadd.f32 %v2091_v45, %v2052_v4  ;;  %v2054_v40 = vpop.f32.mrf.mxu2 }
 0x9c8   :  { %v2055_v56 = vadd.f32 %v2054_v40, %v4890_v22 }
 0x9c9   :  { %v2107_v30 = vmul.f32 0.7978846, %v2099_v25 }
 0x9ca   :  { %v2076_v13 = vmul.f32 %v2055_v56, %v2055_v56 }
 0x9cb   :  { %3590 = vtanh.f32 %v2107_v30 }
 0x9cc   :  { %v2084_v6 = vmul.f32 %v2076_v13, %v2055_v56 }
 0x9ce   :  { %v2092_v29 = vmul.f32 0.044715, %v2084_v6 }
 0x9d0   :  { %v2100_v48 = vadd.f32 %v2092_v29, %v2055_v56 }
 0x9d1   :  { %v3591_v42 = vpop.eup %3590 }
 0x9d2   :  { %v2123_v34 = vadd.f32 1.0, %v3591_v42  ;;  %v2108_v8 = vmul.f32 0.7978846, %v2100_v48 }
 0x9d4   :  { %v2131_v38 = vmul.f32 0.5, %v2123_v34  ;;  %3592 = vtanh.f32 %v2108_v8 }
 0x9d6   :  { %v2139_v35 = vmul.f32 %v2131_v38, %v2052_v4 }
 0x9d8   :  { %3276 = vmatmul.msk.f32.vlgmr.msrb.gmra.mxu0 %vm531_vm14, %v2139_v35 }
 0x9da   :  { %v3593_v57 = vpop.eup %3592 }
 0x9db   :  { %v2124_v49 = vadd.f32 1.0, %v3593_v57 }
 0x9dd   :  { %v2132_v58 = vmul.f32 0.5, %v2124_v49 }
 0x9df   :  { %v2140_v21 = vmul.f32 %v2132_v58, %v2055_v56 }
 0x9e1   :  { %3277 = vmatmul.msk.f32.gmra.mxu0 %vm531_vm14, %v2140_v21 }
 0x9fb   :  { %v2057_v0 = vpop.f32.mrf.mxu2 }
 0x9fc   :  { %v2058_v63 = vadd.f32 %v2057_v0, %v4890_v22 }
 0x9fe   :  { %v2077_v7 = vmul.f32 %v2058_v63, %v2058_v63 }
 0xa00   :  { %v2085_v51 = vmul.f32 %v2077_v7, %v2058_v63 }
 0xa02   :  { %v2093_v28 = vmul.f32 0.044715, %v2085_v51 }
 0xa03   :  { %v2060_v3 = vpop.f32.mrf.mxu2 }
 0xa04   :  { %v2101_v31 = vadd.f32 %v2093_v28, %v2058_v63  ;;  %v2061_v18 = vadd.f32 %v2060_v3, %v4890_v22 }
 0xa06   :  { %v2109_v53 = vmul.f32 0.7978846, %v2101_v31  ;;  %v2078_v60 = vmul.f32 %v2061_v18, %v2061_v18 }
 0xa08   :  { %3594 = vtanh.f32 %v2109_v53  ;;  %v2086_v1 = vmul.f32 %v2078_v60, %v2061_v18 }
 0xa0a   :  { %v2094_v11 = vmul.f32 0.044715, %v2086_v1 }
 0xa0b   :  { %v2063_v5 = vpop.f32.mrf.mxu2 }
 0xa0c   :  { %v2102_v24 = vadd.f32 %v2094_v11, %v2061_v18  ;;  %v2064_v39 = vadd.f32 %v2063_v5, %v4890_v22 }
 0xa0e   :  { %v3595_v15 = vpop.eup %3594  ;;  %v2110_v9 = vmul.f32 0.7978846, %v2102_v24  ;;  %v2079_v20 = vmul.f32 %v2064_v39, %v2064_v39 }
 0xa0f   :  { %v2125_v19 = vadd.f32 1.0, %v3595_v15  ;;  %v2278_v15 = vld [vmem:[#allocation5 + $0x80] sm:$0xf] }
 0xa10   :  { %3596 = vtanh.f32 %v2110_v9  ;;  %v2087_v36 = vmul.f32 %v2079_v20, %v2064_v39  ;;  %3287 = vmatpush.msk.msrb.mxu3 %vm2294_vm13, %v2278_v15  ;;  %v2274_v20 = vld [vmem:[#allocation5 + $0x40] sm:$0xff] }
 0xa11   :  { %v2133_v54 = vmul.f32 0.5, %v2125_v19  ;;  %v2272_v19 = vld [vmem:[#allocation5 + $0x20] sm:$0xff] }
 0xa12   :  { %v2095_v52 = vmul.f32 0.044715, %v2087_v36  ;;  %v2270_v36 = vld [vmem:[#allocation5] sm:$0xff] }
 0xa13   :  { %v2066_v46 = vpop.f32.mrf.mxu2  ;;  %v2141_v23 = vmul.f32 %v2133_v54, %v2058_v63  ;;  %v4914_v54 = vld [vmem:[%s5086_s0 + $0x40] sm:$0xff]  ;;  %v2359_v15 = vld [vmem:[#allocation5 + $0x100] sm:$0xff] }
 0xa14   :  { %v2103_v26 = vadd.f32 %v2095_v52, %v2064_v39  ;;  %v2067_v41 = vadd.f32 %v2066_v46, %v4890_v22  ;;  %v4921_v46 = vld [vmem:[%s5086_s0 + $0x48] sm:$0xff] }
 0xa15   :  { %3278 = vmatmul.msk.f32.gmra.mxu0 %vm531_vm14, %v2141_v23 }
 0xa16   :  { %v3597_v10 = vpop.eup %3596  ;;  %v2111_v27 = vmul.f32 0.7978846, %v2103_v26  ;;  %v2080_v62 = vmul.f32 %v2067_v41, %v2067_v41 }
 0xa17   :  { %v2126_v16 = vadd.f32 1.0, %v3597_v10 }
 0xa18   :  { %3598 = vtanh.f32 %v2111_v27  ;;  %v2088_v14 = vmul.f32 %v2080_v62, %v2067_v41  ;;  %v2228_v27 = vld [vmem:[%s5087_s1 + $0x7] ss:$0 sm:$0xff] }
 0xa19   :  { %v2134_v12 = vmul.f32 0.5, %v2126_v16 }
 0xa1a   :  { %v2096_v37 = vmul.f32 0.044715, %v2088_v14 }
 0xa1b   :  { %v2069_v44 = vpop.f32.mrf.mxu2  ;;  %v2142_v4 = vmul.f32 %v2134_v12, %v2061_v18 }
 0xa1c   :  { %v2104_v47 = vadd.f32 %v2096_v37, %v2067_v41  ;;  %v2070_v55 = vadd.f32 %v2069_v44, %v4890_v22 }
 0xa1d   :  { %3279 = vmatmul.msk.f32.gmra.mxu0 %vm531_vm14, %v2142_v4 }
 0xa1e   :  { %v3599_v45 = vpop.eup %3598  ;;  %v2112_v25 = vmul.f32 0.7978846, %v2104_v47  ;;  %v2081_v40 = vmul.f32 %v2070_v55, %v2070_v55 }
 0xa1f   :  { %v2127_v56 = vadd.f32 1.0, %v3599_v45 }
 0xa20   :  { %3600 = vtanh.f32 %v2112_v25  ;;  %v2089_v30 = vmul.f32 %v2081_v40, %v2070_v55  ;;  %v2399_v25 = vld [vmem:[#allocation5 + $0x240] sm:$0xff] }
 0xa21   :  { %v2135_v13 = vmul.f32 0.5, %v2127_v56 }
 0xa22   :  { %v2097_v6 = vmul.f32 0.044715, %v2089_v30  ;;  %v2410_v30 = vld [vmem:[#allocation5 + $0x298] sm:$0xff] }
 0xa23   :  { %v2143_v29 = vmul.f32 %v2135_v13, %v2064_v39  ;;  %v2391_v13 = vld [vmem:[#allocation5 + $0x200] sm:$0xff]  ;;  %2598 = vmatpush.msra.mxu0 %v2410_v30  ;;  %v2438_v30 = vld [vmem:[#allocation5 + $0x378] sm:$0xff] }
 0xa24   :  { %v2105_v48 = vadd.f32 %v2097_v6, %v2070_v55  ;;  %v2406_v6 = vld [vmem:[#allocation5 + $0x278] sm:$0xff] }
 0xa25   :  { %3280 = vmatmul.msk.f32.gmra.mxu0 %vm531_vm14, %v2143_v29  ;;  %v2402_v29 = vld [vmem:[#allocation5 + $0x258] sm:$0xff] }
 0xa26   :  { %v3601_v42 = vpop.eup %3600  ;;  %v2113_v34 = vmul.f32 0.7978846, %v2105_v48  ;;  %v2277_v48 = vld [vmem:[#allocation5 + $0x68] sm:$0xff]  ;;  %2599 = vmatpush.msra.mxu0 %v2406_v6  ;;  %v2350_v6 = vld [vmem:[#allocation5 + $0xb8] sm:$0xff] }
 0xa27   :  { %v2128_v8 = vadd.f32 1.0, %v3601_v42  ;;  %v2387_v42 = vld [vmem:[#allocation5 + $0x1e0] sm:$0xff] }
 0xa28   :  { %3602 = vtanh.f32 %v2113_v34  ;;  %v2435_v34 = vld [vmem:[#allocation5 + $0x360] sm:$0xff]  ;;  %2600 = vmatpush.msra.mxu0 %v2402_v29  ;;  %v2434_v29 = vld [vmem:[#allocation5 + $0x358] sm:$0xff] }
 0xa29   :  { %v2136_v38 = vmul.f32 0.5, %v2128_v8  ;;  %v2398_v8 = vld [vmem:[#allocation5 + $0x238] sm:$0xff] }
 0xa2a   :  { %2601 = vmatpush.msra.mxu0 %v2398_v8  ;;  %v2430_v8 = vld [vmem:[#allocation5 + $0x338] sm:$0xff] }
 0xa2b   :  { %v2144_v35 = vmul.f32 %v2136_v38, %v2067_v41  ;;  %v2275_v38 = vld [vmem:[#allocation5 + $0x48] sm:$0xff] }
 0xa2d   :  { %3281 = vmatmul.msk.f32.gmra.mxu0 %vm531_vm14, %v2144_v35  ;;  %v2383_v35 = vld [vmem:[#allocation5 + $0x1c0] sm:$0xff] }
 0xa2e   :  { %v3603_v57 = vpop.eup %3602 }
 0xa2f   :  { %v2129_v49 = vadd.f32 1.0, %v3603_v57  ;;  %v2431_v57 = vld [vmem:[#allocation5 + $0x340] sm:$0xff] }
 0xa31   :  { %v2137_v58 = vmul.f32 0.5, %v2129_v49  ;;  %v2394_v49 = vld [vmem:[#allocation5 + $0x218] sm:$0xff] }
 0xa32   :  { %2602 = vmatpush.msra.mxu0 %v2394_v49  ;;  %v2426_v49 = vld [vmem:[#allocation5 + $0x318] sm:$0xff] }
 0xa33   :  { %v2145_v21 = vmul.f32 %v2137_v58, %v2070_v55  ;;  %v2407_v55 = vld [vmem:[#allocation5 + $0x280] sm:$0xff]  ;;  %v2273_v58 = vld [vmem:[#allocation5 + $0x28] sm:$0xff] }
 0xa34   :  { %2460 = vmatpush.msrb.mxu2 %v2407_v55  ;;  %v2348_v55 = vld [vmem:[#allocation5 + $0xa8] sm:$0xff] }
 0xa35   :  { %3282 = vmatmul.msk.f32.gmra.mxu0 %vm531_vm14, %v2145_v21  ;;  %v2379_v21 = vld [vmem:[#allocation5 + $0x1a0] sm:$0xff] }
 0xa41   :  { %v2072_v0 = vpop.f32.mrf.mxu2 }
 0xa42   :  { %v2073_v63 = vadd.f32 %v2072_v0, %v4890_v22  ;;  %v2276_v22 = vld [vmem:[#allocation5 + $0x60] sm:$0xff]  ;;  %v2238_v0 = vld [vmem:[#allocation2 + $0x130] sm:$0xff] }
 0xa43   :  { %2313 = vmatpush.msrb.mxu3 %v2276_v22  ;;  %v2388_v22 = vld [vmem:[#allocation5 + $0x1e8] sm:$0xff] }
 0xa44   :  { %v2082_v7 = vmul.f32 %v2073_v63, %v2073_v63 }
 0xa45   :  { %2314 = vmatpush.msrb.mxu3 %v2274_v20  ;;  %v2384_v20 = vld [vmem:[#allocation5 + $0x1c8] sm:$0xff] }
 0xa46   :  { %v2090_v51 = vmul.f32 %v2082_v7, %v2073_v63  ;;  %v2271_v7 = vld [vmem:[#allocation5 + $0x8] sm:$0xff] }
 0xa47   :  { %2315 = vmatpush.msrb.mxu3 %v2272_v19  ;;  %v2380_v19 = vld [vmem:[#allocation5 + $0x1a8] sm:$0xff] }
 0xa48   :  { %v2098_v28 = vmul.f32 0.044715, %v2090_v51  ;;  %v2375_v51 = vld [vmem:[#allocation5 + $0x180] sm:$0xff] }
 0xa49   :  { %2316 = vmatpush.msrb.mxu3 %v2270_v36  ;;  %v2376_v36 = vld [vmem:[#allocation5 + $0x188] sm:$0xff] }
 0xa4a   :  { %v2106_v3 = vadd.f32 %v2098_v28, %v2073_v63  ;;  %3288 = vmatmul.msk.f32.vlgmr.msrb.gmra.mxu3 %vm2287_vm0, %v4914_v54  ;;  %v2408_v28 = vld [vmem:[#allocation5 + $0x288] sm:$0xff] }
 0xa4c   :  { %v2114_v31 = vmul.f32 0.7978846, %v2106_v3  ;;  %v2390_v3 = vld [vmem:[#allocation5 + $0x1f8] sm:$0xff] }
 0xa4d   :  { %2603 = vmatpush.msra.mxu0 %v2390_v3  ;;  %v2381_v3 = vld [vmem:[#allocation5 + $0x1b0] sm:$0xff] }
 0xa4e   :  { %3604 = vtanh.f32 %v2114_v31  ;;  %v2371_v31 = vld [vmem:[#allocation5 + $0x160] sm:$0xff] }
 0xa52   :  { %3289 = vmatmul.msk.f32.gmra.mxu3 %vm2287_vm0, %v4921_v46 }
 0xa54   :  { %v3605_v18 = vpop.eup %3604 }
 0xa55   :  { %v2130_v53 = vadd.f32 1.0, %v3605_v18  ;;  %v2196_v11 = vpop.f32.mrf.mxu0  ;;  %v2423_v18 = vld [vmem:[#allocation5 + $0x300] sm:$0xff] }
 0xa57   :  { %v2138_v60 = vmul.f32 0.5, %v2130_v53  ;;  %v2404_v53 = vld [vmem:[#allocation5 + $0x268] sm:$0xff] }
 0xa59   :  { %v2146_v1 = vmul.f32 %v2138_v60, %v2073_v63  ;;  %v2427_v63 = vld [vmem:[#allocation5 + $0x320] sm:$0xff]  ;;  %v2386_v60 = vld [vmem:[#allocation5 + $0x1d8] sm:$0xff] }
 0xa5a   :  { %2604 = vmatpush.msra.mxu0 %v2386_v60  ;;  %v2441_v60 = vld [vmem:[#allocation5 + $0x390] sm:$0xff] }
 0xa5b   :  { %3283 = vmatmul.msk.f32.gmra.mxu0 %vm531_vm14, %v2146_v1  ;;  %v2367_v1 = vld [vmem:[#allocation5 + $0x140] sm:$0xff] }
 0xa5e   :  { %v2199_v5 = vpop.f32.mrf.mxu0 }
 0xa92   :  { %v2202_v24 = vpop.f32.mrf.mxu0 }
 0xa93   :  { %v2222_v4 = vadd.f32 %v2202_v24, %v4754_v43  ;;  %v2237_v43 = vld [vmem:[#allocation2 + $0x128] sm:$0xff]  ;;  %v2363_v24 = vld [vmem:[#allocation5 + $0x120] sm:$0xff] }
 0xa95   :  { %v2231_v45 = vadd.f32 %v2228_v27, %v2222_v4  ;;  %v2352_v4 = vld [vmem:[#allocation5 + $0xc8] sm:$0xff] }
 0xa9a   :  { %v2205_v39 = vpop.f32.mrf.mxu0 }
 0xa9b   :  { %v2223_v37 = vadd.f32 %v2205_v39, %v4759_v50  ;;  %v2395_v50 = vld [vmem:[#allocation5 + $0x220] sm:$0xff]  ;;  %v2396_v39 = vld [vmem:[#allocation5 + $0x228] sm:$0xff] }
 0xa9d   :  { %v2232_v47 = vadd.f32 %v2228_v27, %v2223_v37  ;;  %v4946_v37 = vld [vmem:[%s5087_s1 + $0x20] ss:$8 sm:$0x3] }
 0xaa2   :  { %v2208_v9 = vpop.f32.mrf.mxu0 }
 0xaa3   :  { %v2224_v14 = vadd.f32 %v2208_v9, %v4764_v33  ;;  %v2403_v33 = vld [vmem:[#allocation5 + $0x260] sm:$0xff]  ;;  %v2392_v9 = vld [vmem:[#allocation5 + $0x208] sm:$0xff] }
 0xaa4   :  { %2461 = vmatpush.msrb.mxu2 %v2403_v33 }
 0xaa6   :  { %2462 = vmatpush.msrb.mxu2 %v2399_v25  ;;  %v2409_v25 = vld [vmem:[#allocation5 + $0x290] sm:$0xff] }
 0xaa8   :  { %2463 = vmatpush.msrb.mxu2 %v2395_v50  ;;  %v2358_v50 = vld [vmem:[#allocation5 + $0xf8] sm:$0xff] }
 0xaaa   :  { %v2211_v52 = vpop.f32.mrf.mxu0  ;;  %2464 = vmatpush.msrb.mxu2 %v2391_v13  ;;  %v2436_v13 = vld [vmem:[#allocation5 + $0x368] sm:$0xff] }
 0xaab   :  { %v2225_v62 = vadd.f32 %v2211_v52, %v4769_v2  ;;  %v2220_v2 = vadd.f32 %v2196_v11, %v4744_v59  ;;  %v2439_v59 = vld [vmem:[#allocation5 + $0x380] sm:$0xff]  ;;  %v2372_v52 = vld [vmem:[#allocation5 + $0x168] sm:$0xff] }
 0xaac   :  { %2491 = vmatpush.msra.mxu3 %v2439_v59  ;;  %2465 = vmatpush.msrb.mxu2 %v2387_v42  ;;  %v2419_v11 = vld [vmem:[#allocation5 + $0x2e0] sm:$0xff]  ;;  %v2401_v59 = vld [vmem:[#allocation5 + $0x250] sm:$0xff] }
 0xaad   :  { %v2234_v44 = vadd.f32 %v2228_v27, %v2225_v62  ;;  %v2229_v56 = vadd.f32 %v2228_v27, %v2220_v2  ;;  %v2374_v62 = vld [vmem:[#allocation5 + $0x178] sm:$0xff]  ;;  %v2411_v2 = vld [vmem:[#allocation5 + $0x2a0] sm:$0xff] }
 0xaae   :  { %2492 = vmatpush.msra.mxu3 %v2435_v34  ;;  %2466 = vmatpush.msrb.mxu2 %v2383_v35  ;;  %v2397_v34 = vld [vmem:[#allocation5 + $0x230] sm:$0xff]  ;;  %v2428_v35 = vld [vmem:[#allocation5 + $0x328] sm:$0xff] }
 0xab0   :  { %2493 = vmatpush.msra.mxu3 %v2431_v57  ;;  %2467 = vmatpush.msrb.mxu2 %v2379_v21  ;;  %v2393_v57 = vld [vmem:[#allocation5 + $0x210] sm:$0xff] }
 0xab1   :  { %v2389_v21 = vld [vmem:[#allocation5 + $0x1f0] sm:$0xff] }
 0xab2   :  { %v2214_v23 = vpop.f32.mrf.mxu0  ;;  %2494 = vmatpush.msra.mxu3 %v2427_v63  ;;  %2468 = vmatpush.msrb.mxu2 %v2375_v51  ;;  %v2420_v63 = vld [vmem:[#allocation5 + $0x2e8] sm:$0xff]  ;;  %v2418_v51 = vld [vmem:[#allocation5 + $0x2d8] sm:$0xff] }
 0xab3   :  { %v2226_v41 = vadd.f32 %v2214_v23, %v4774_v61  ;;  %v2233_v61 = vadd.f32 %v2228_v27, %v2224_v14  ;;  %v2368_v23 = vld [vmem:[#allocation5 + $0x148] sm:$0xff]  ;;  %v2355_v14 = vld [vmem:[#allocation5 + $0xe0] sm:$0xff] }
 0xab4   :  { %2469 = vmatpush.msrb.mxu2 %v2371_v31  ;;  %2495 = vmatpush.msra.mxu3 %v2423_v18  ;;  %v2414_v31 = vld [vmem:[#allocation5 + $0x2b8] sm:$0xff]  ;;  %v2412_v18 = vld [vmem:[#allocation5 + $0x2a8] sm:$0xff] }
 0xab5   :  { %v2235_v12 = vadd.f32 %v2228_v27, %v2226_v41  ;;  %v2356_v41 = vld [vmem:[#allocation5 + $0xe8] sm:$0xff] }
 0xab6   :  { %2470 = vmatpush.msrb.mxu2 %v2367_v1  ;;  %2496 = vmatpush.msra.mxu3 %v2419_v11  ;;  %v2373_v1 = vld [vmem:[#allocation5 + $0x170] sm:$0xff] }
 0xab7   :  { %v2437_v11 = vld [vmem:[#allocation5 + $0x370] sm:$0xff] }
 0xab8   :  { %2471 = vmatpush.msrb.mxu2 %v2363_v24  ;;  %v2433_v24 = vld [vmem:[#allocation5 + $0x350] sm:$0xff] }
 0xaba   :  { %2472 = vmatpush.msrb.mxu2 %v2359_v15  ;;  %v2429_v15 = vld [vmem:[#allocation5 + $0x330] sm:$0xff] }
 0xabc   :  { %2473 = vmatpush.msrb.mxu2 %v2355_v14 }
 0xad8   :  { %v2217_v26 = vpop.f32.mrf.mxu0 }
 0xad9   :  { %v2227_v10 = vadd.f32 %v2217_v26, %v4787_v32  ;;  %v2221_v32 = vadd.f32 %v2199_v5, %v4749_v17  ;;  %v2279_v17 = vld [vmem:[#allocation5 + $0x88] sm:$0xf] }
 0xada   :  { %v2400_v5 = vld [vmem:[#allocation5 + $0x248] sm:$0xff] }
 0xadb   :  { %v2236_v16 = vadd.f32 %v2228_v27, %v2227_v10  ;;  %v2230_v40 = vadd.f32 %v2228_v27, %v2221_v32  ;;  %v2364_v26 = vld [vmem:[#allocation5 + $0x128] sm:$0xff]  ;;  %v2382_v10 = vld [vmem:[#allocation5 + $0x1b8] sm:$0xff]  ;;  %v2351_v32 = vld [vmem:[#allocation5 + $0xc0] sm:$0xff] }
 0xadc   :  { %2605 = vmatpush.msra.mxu0 %v2382_v10  ;;  %v2378_v27 = vld [vmem:[#allocation5 + $0x198] sm:$0xff]  ;;  %2474 = vmatpush.msrb.mxu2 %v2351_v32  ;;  %v2284_v10 = vperm.slane %v4946_v37, 1 }
 0xadd   :  { %2253 = vmatpush.msrb.mxu1 %v2236_v16  ;;  %v2366_v16 = vld [vmem:[#allocation5 + $0x138] sm:$0xff] }
 0xade   :  { %2606 = vmatpush.msra.mxu0 %v2378_v27 }
 0xadf   :  { %2254 = vmatpush.msrb.mxu1 %v2235_v12  ;;  %v2362_v12 = vld [vmem:[#allocation5 + $0x118] sm:$0xff] }
 0xae0   :  { %2607 = vmatpush.msra.mxu0 %v2374_v62 }
 0xae1   :  { %2255 = vmatpush.msrb.mxu1 %v2234_v44  ;;  %v2283_v44 = vperm.slane %v4946_v37, 0 }
 0xae3   :  { %2256 = vmatpush.msrb.mxu1 %v2233_v61  ;;  %v2415_v61 = vld [vmem:[#allocation5 + $0x2c0] sm:$0xff] }
 0xae4   :  { %2497 = vmatpush.msra.mxu3 %v2415_v61 }
 0xae5   :  { %2257 = vmatpush.msrb.mxu1 %v2232_v47  ;;  %v2318_v47 = vpop.f32.mrf.mxu3 }
 0xae6   :  { %v4949_v33 = vadd.f32 %v2318_v47, %v2283_v44  ;;  %2498 = vmatpush.msra.mxu3 %v2411_v2 }
 0xae7   :  { %2258 = vmatpush.msrb.mxu1 %v2231_v45  ;;  %v2347_v45 = vld [vmem:[#allocation5 + $0xa0] sm:$0xff] }
 0xae8   :  { %2475 = vmatpush.msrb.mxu2 %v2347_v45  ;;  %2552 = vmatpush.msrb.mxu3 %v2409_v25 }
 0xae9   :  { %2259 = vmatpush.msrb.mxu1 %v2230_v40  ;;  %v2442_v40 = vld [vmem:[#allocation5 + $0x398] sm:$0xff]  ;;  %2476 = vmatmul.f32.vlgmr.msrb.gmra.mxu2 %v4949_v33 }
 0xaeb   :  { %2260 = vmatpush.msrb.mxu1 %v2229_v56  ;;  %v2440_v56 = vld [vmem:[#allocation5 + $0x388] sm:$0xff] }
 0xaec   :  { %3284 = vmatmul.msk.f32.vlgmr.msrb.gmra.mxu1 %vm531_vm14, %v2237_v43  ;;  %v2405_v43 = vld [vmem:[#allocation5 + $0x270] sm:$0xff]  ;;  %2537 = vmatpush.msra.mxu2 %v2440_v56 }
 0xaed   :  { %3290 = vmatpush.msk.msra.mxu1 %vm2294_vm13, %v2279_v17  ;;  %v2354_v17 = vld [vmem:[#allocation5 + $0xd8] sm:$0xff]  ;;  %2553 = vmatpush.msrb.mxu3 %v2405_v43  ;;  %v2321_v42 = vpop.f32.mrf.mxu3 }
 0xaee   :  { %2538 = vmatpush.msra.mxu2 %v2436_v13 }
 0xaef   :  { %2336 = vmatpush.msra.mxu1 %v2277_v48  ;;  %v2432_v48 = vld [vmem:[#allocation5 + $0x348] sm:$0xff]  ;;  %2554 = vmatpush.msrb.mxu3 %v2401_v59 }
 0xaf0   :  { %2539 = vmatpush.msra.mxu2 %v2432_v48 }
 0xaf1   :  { %2337 = vmatpush.msra.mxu1 %v2275_v38  ;;  %v4953_v38 = vadd.f32 %v2321_v42, %v2283_v44  ;;  %2555 = vmatpush.msrb.mxu3 %v2397_v34  ;;  %v4979_v44 = vld [vmem:[%s5087_s1 + $0x21] ss:$8 sm:$0xf] }
 0xaf2   :  { %2540 = vmatpush.msra.mxu2 %v2428_v35  ;;  %v2449_v61 = vperm.slane %v4979_v44, 3  ;;  %v2448_v48 = vperm.slane %v4979_v44, 2 }
 0xaf3   :  { %2338 = vmatpush.msra.mxu1 %v2273_v58  ;;  %v2424_v58 = vld [vmem:[#allocation5 + $0x308] sm:$0xff]  ;;  %2556 = vmatpush.msrb.mxu3 %v2393_v57 }
 0xaf4   :  { %3285 = vmatmul.msk.f32.gmra.mxu1 %vm531_vm14, %v2238_v0  ;;  %v2422_v0 = vld [vmem:[#allocation5 + $0x2f8] sm:$0xff]  ;;  %2479 = vmatmul.f32.gmra.mxu2 %v4953_v38 }
 0xaf5   :  { %2339 = vmatpush.msra.mxu1 %v2271_v7  ;;  %2541 = vmatpush.msra.mxu2 %v2424_v58  ;;  %v2385_v7 = vld [vmem:[#allocation5 + $0x1d0] sm:$0xff]  ;;  %v2447_v58 = vperm.slane %v4979_v44, 1 }
 0xaf6   :  { %2557 = vmatpush.msrb.mxu3 %v2389_v21 }
 0xaf7   :  { %2506 = vmatpush.msrb.mxu1 %v2408_v28  ;;  %v2416_v28 = vld [vmem:[#allocation5 + $0x2c8] sm:$0xff]  ;;  %2542 = vmatpush.msra.mxu2 %v2420_v63 }
 0xaf8   :  { %2558 = vmatpush.msrb.mxu3 %v2385_v7 }
 0xaf9   :  { %2507 = vmatpush.msrb.mxu1 %v2404_v53  ;;  %v2377_v53 = vld [vmem:[#allocation5 + $0x190] sm:$0xff]  ;;  %2543 = vmatpush.msra.mxu2 %v2416_v28 }
 0xafa   :  { %2559 = vmatpush.msrb.mxu3 %v2381_v3 }
 0xafb   :  { %2508 = vmatpush.msrb.mxu1 %v2400_v5  ;;  %2544 = vmatpush.msra.mxu2 %v2412_v18  ;;  %v2369_v5 = vld [vmem:[#allocation5 + $0x150] sm:$0xff] }
 0xafc   :  { %3291 = vmatmul.msk.f32.vlgmr.msra.gmra.mxu1 %vm2287_vm0, %v4914_v54  ;;  %v2360_v54 = vld [vmem:[#allocation5 + $0x108] sm:$0xff]  ;;  %2560 = vmatpush.msrb.mxu3 %v2377_v53 }
 0xafd   :  { %2509 = vmatpush.msrb.mxu1 %v2396_v39  ;;  %2583 = vmatpush.msrb.mxu2 %v2441_v60  ;;  %v2365_v39 = vld [vmem:[#allocation5 + $0x130] sm:$0xff] }
 0xafe   :  { %2561 = vmatpush.msrb.mxu3 %v2373_v1 }
 0xaff   :  { %2510 = vmatpush.msrb.mxu1 %v2392_v9  ;;  %2584 = vmatpush.msrb.mxu2 %v2437_v11  ;;  %v2361_v9 = vld [vmem:[#allocation5 + $0x110] sm:$0xff] }
 0xb00   :  { %2562 = vmatpush.msrb.mxu3 %v2369_v5 }
 0xb01   :  { %2511 = vmatpush.msrb.mxu1 %v2388_v22  ;;  %2585 = vmatpush.msrb.mxu2 %v2433_v24  ;;  %v2425_v22 = vld [vmem:[#allocation5 + $0x310] sm:$0xff] }
 0xb02   :  { %2563 = vmatpush.msrb.mxu3 %v2365_v39 }
 0xb03   :  { %2512 = vmatpush.msrb.mxu1 %v2384_v20  ;;  %2586 = vmatpush.msrb.mxu2 %v2429_v15  ;;  %v2357_v20 = vld [vmem:[#allocation5 + $0xf0] sm:$0xff] }
 0xb04   :  { %3292 = vmatmul.msk.f32.gmra.mxu1 %vm2287_vm0, %v4921_v46  ;;  %v2370_v46 = vld [vmem:[#allocation5 + $0x158] sm:$0xff]  ;;  %2564 = vmatpush.msrb.mxu3 %v2361_v9 }
 0xb05   :  { %2513 = vmatpush.msrb.mxu1 %v2380_v19  ;;  %2608 = vmatpush.msra.mxu0 %v2370_v46  ;;  %v2421_v19 = vld [vmem:[#allocation5 + $0x2f0] sm:$0xff] }
 0xb06   :  { %2587 = vmatpush.msrb.mxu2 %v2425_v22  ;;  %2565 = vmatpush.msrb.mxu3 %v2357_v20 }
 0xb07   :  { %2514 = vmatpush.msrb.mxu1 %v2376_v36  ;;  %2609 = vmatpush.msra.mxu0 %v2366_v16  ;;  %v2353_v36 = vld [vmem:[#allocation5 + $0xd0] sm:$0xff] }
 0xb08   :  { %2588 = vmatpush.msrb.mxu2 %v2421_v19  ;;  %2566 = vmatpush.msrb.mxu3 %v2353_v36 }
 0xb09   :  { %2515 = vmatpush.msrb.mxu1 %v2372_v52  ;;  %2610 = vmatpush.msra.mxu0 %v2362_v12 }
 0xb0b   :  { %2516 = vmatpush.msrb.mxu1 %v2368_v23  ;;  %2611 = vmatpush.msra.mxu0 %v2358_v50  ;;  %v2417_v23 = vld [vmem:[#allocation5 + $0x2d0] sm:$0xff] }
 0xb0c   :  { %2589 = vmatpush.msrb.mxu2 %v2417_v23 }
 0xb0d   :  { %2517 = vmatpush.msrb.mxu1 %v2364_v26  ;;  %2612 = vmatpush.msra.mxu0 %v2354_v17  ;;  %v2349_v26 = vld [vmem:[#allocation5 + $0xb0] sm:$0xff] }
 0xb0e   :  { %2567 = vmatpush.msrb.mxu3 %v2349_v26 }
 0xb0f   :  { %2518 = vmatpush.msrb.mxu1 %v2360_v54  ;;  %2613 = vmatpush.msra.mxu0 %v2350_v6  ;;  %v2413_v54 = vld [vmem:[#allocation5 + $0x2b0] sm:$0xff] }
 0xb10   :  { %2614 = vmatmul.f32.vlgmr.msra.gmra.mxu0 %v4949_v33  ;;  %2590 = vmatpush.msrb.mxu2 %v2413_v54 }
 0xb11   :  { %2519 = vmatpush.msrb.mxu1 %v2356_v41 }
 0xb13   :  { %2520 = vmatpush.msrb.mxu1 %v2352_v4 }
 0xb15   :  { %2521 = vmatpush.msrb.mxu1 %v2348_v55 }
 0xb16   :  { %2522 = vmatmul.f32.vlgmr.msrb.gmra.mxu1 %v4949_v33 }
 0xb17   :  { %2629 = vmatpush.msra.mxu1 %v2442_v40 }
 0xb18   :  { %2617 = vmatmul.f32.gmra.mxu0 %v4953_v38 }
 0xb19   :  { %2630 = vmatpush.msra.mxu1 %v2438_v30 }
 0xb1b   :  { %2631 = vmatpush.msra.mxu1 %v2434_v29 }
 0xb1d   :  { %2632 = vmatpush.msra.mxu1 %v2430_v8 }
 0xb1e   :  { %2525 = vmatmul.f32.gmra.mxu1 %v4953_v38 }
 0xb1f   :  { %2633 = vmatpush.msra.mxu1 %v2426_v49 }
 0xb21   :  { %2634 = vmatpush.msra.mxu1 %v2422_v0 }
 0xb23   :  { %2635 = vmatpush.msra.mxu1 %v2418_v51 }
 0xb25   :  { %2636 = vmatpush.msra.mxu1 %v2414_v31 }
 0xb69   :  { %v4959_v52 = vpop.f32.mrf.mxu1 }
 0xb6c   :  { %v4974_v12 = vpop.f32.mrf.mxu2 }
 0xb71   :  { %v4961_v41 = vpop.f32.mrf.mxu1 }
 0xb77   :  { %v4982_v32 = vpop.f32.mrf.mxu2 }
 0xb79   :  { %v2341_v27 = vpop.f32.mrf.mxu1 }
 0xb7a   :  { %v2342_v62 = vadd.f32 %v2341_v27, %v2284_v10 }
 0xb7c   :  { %3294 = vmatmul.msk.f32.vlgmr.msra.gmra.mxu3 %vm531_vm14, %v2342_v62  ;;  %3300 = vmatmul.msk.f32.vlgmr.msra.gmra.mxu1 %vm531_vm14, %v2342_v62 }
 0xb7d   :  { %3296 = vmatmul.msk.f32.vlgmr.msra.gmra.mxu2 %vm531_vm14, %v2342_v62 }
 0xb81   :  { %v2344_v46 = vpop.f32.mrf.mxu1 }
 0xb82   :  { %v2345_v16 = vadd.f32 %v2344_v46, %v2284_v10 }
 0xb84   :  { %3295 = vmatmul.msk.f32.gmra.mxu3 %vm531_vm14, %v2345_v16  ;;  %3301 = vmatmul.msk.f32.gmra.mxu1 %vm531_vm14, %v2345_v16 }
 0xb85   :  { %3297 = vmatmul.msk.f32.gmra.mxu2 %vm531_vm14, %v2345_v16 }
 0xb8c   :  { %2568 = vmatmul.f32.vlgmr.msrb.gmra.mxu3 %v4949_v33 }
 0xb8d   :  { %3298 = vmatmul.msk.f32.vlgmr.msrb.gmra.mxu2 %vm531_vm14, %v2342_v62  ;;  %v2615_v4 = vpop.f32.mrf.mxu0 }
 0xb8e   :  { %v2616_v47 = vadd.f32 %v2615_v4, %v2449_v61 }
 0xb93   :  { %v2523_v14 = vpop.f32.mrf.mxu1 }
 0xb94   :  { %2571 = vmatmul.f32.gmra.mxu3 %v4953_v38  ;;  %v2524_v28 = vadd.f32 %v2523_v14, %v2447_v58 }
 0xb95   :  { %3299 = vmatmul.msk.f32.gmra.mxu2 %vm531_vm14, %v2345_v16  ;;  %v2618_v33 = vpop.f32.mrf.mxu0 }
 0xb96   :  { %v2619_v40 = vadd.f32 %v2618_v33, %v2449_v61 }
 0xb9b   :  { %v2526_v37 = vpop.f32.mrf.mxu1 }
 0xb9c   :  { %v2527_v0 = vadd.f32 %v2526_v37, %v2447_v58 }
 0xbf9   :  { %v2638_v55 = vpop.f32.mrf.mxu1 }
 0xbfa   :  { %v2639_v2 = vadd.f32 %v2638_v55, %v2616_v47 }
 0xbfc   :  { %v3303_v45 = vmul.f32 -1.442695, %v2639_v2  ;;  %v5006_v2 = vld [vmem:[#allocation2 + $0x138] sm:$0xff] }
 0xbfe   :  { %3606 = vpow2.f32 %v3303_v45 }
 0xbff   :  { %v4984_v25 = vpop.f32.mrf.mxu3 }
 0xc00   :  { %v2546_v50 = vpop.f32.mrf.mxu2 }
 0xc01   :  { %v2641_v56 = vpop.f32.mrf.mxu1  ;;  %v2547_v18 = vadd.f32 %v2546_v50, %v2524_v28  ;;  %v2810_v50 = vld [vmem:[#allocation5 + $0x560] sm:$0xff] }
 0xc02   :  { %v2642_v43 = vadd.f32 %v2641_v56, %v2619_v40  ;;  %v2812_v40 = vld [vmem:[#allocation5 + $0x580] sm:$0xff] }
 0xc03   :  { %2840 = vmatpush.msrb.mxu0 %v2812_v40  ;;  %v2796_v28 = vld [vmem:[#allocation5 + $0x480] sm:$0xff]  ;;  %v2801_v40 = vld [vmem:[#allocation5 + $0x4c8] sm:$0xff] }
 0xc04   :  { %v3607_v30 = vpop.eup %3606  ;;  %v3305_v17 = vmul.f32 -1.442695, %v2642_v43  ;;  %v2808_v43 = vld [vmem:[#allocation5 + $0x540] sm:$0xff] }
 0xc05   :  { %v2661_v13 = vadd.f32 1.0, %v3607_v30  ;;  %2841 = vmatpush.msrb.mxu0 %v2810_v50  ;;  %v2797_v50 = vld [vmem:[#allocation5 + $0x488] sm:$0xff] }
 0xc06   :  { %3608 = vpow2.f32 %v3305_v17  ;;  %v2446_v17 = vperm.slane %v4979_v44, 0 }
 0xc07   :  { %3610 = vrcp.f32 %v2661_v13  ;;  %v4986_v6 = vpop.f32.mrf.mxu3  ;;  %vm2684_vm14 = vweird.f32 %v2661_v13  ;;  %v2688_v39 = vand.u32 2147483647, %v2661_v13  ;;  %v2690_v15 = vand.u32 2147483648, %v2661_v13  ;;  %2842 = vmatpush.msrb.mxu0 %v2808_v43  ;;  %v2793_v43 = vld [vmem:[#allocation5 + $0x448] sm:$0xff] }
 0xc08   :  { %v2549_v59 = vpop.f32.mrf.mxu2 }
 0xc09   :  { %v2550_v3 = vadd.f32 %v2549_v59, %v2527_v0  ;;  %v2691_v62 = vor.u32 1.1754944e-38, %v2690_v15  ;;  %vm2689_vm8 = vcmp.eq.f32.partialorder %v2688_v39, 8.507059e+37  ;;  %v2481_v59 = vadd.f32 %v4982_v32, %v2446_v17  ;;  %v2800_v32 = vld [vmem:[#allocation5 + $0x4c0] sm:$0xff] }
 0xc0a   :  { %v2820_v39 = vld [vmem:[#allocation5 + $0x600] sm:$0xff] }
 0xc0c   :  { %v3609_v29 = vpop.eup %3608 }
 0xc0d   :  { %v3611_v42 = vpop.eup %3610  ;;  %v2663_v34 = vadd.f32 1.0, %v3609_v29  ;;  %v2804_v29 = vld [vmem:[#allocation5 + $0x500] sm:$0xff] }
 0xc0e   :  { %v2680_v8 = vmul.f32 %v3611_v42, %v2661_v13  ;;  %vm2685_vm1 = vweird.f32 %v3611_v42  ;;  %v2806_v13 = vld [vmem:[#allocation5 + $0x520] sm:$0xff] }
 0xc0f   :  { %3612 = vrcp.f32 %v2663_v34  ;;  %v2569_v38 = vpop.f32.mrf.mxu3  ;;  %v2720_v24 = vand.u32 2147483648, %v2663_v34  ;;  %v2718_v20 = vand.u32 2147483647, %v2663_v34  ;;  %vm4991_vm4 = vmor %vm2684_vm14, %vm2685_vm1  ;;  %vm2714_vm5 = vweird.f32 %v2663_v34  ;;  %2843 = vmatpush.msrb.mxu0 %v2806_v13  ;;  %v2787_v13 = vld [vmem:[#allocation5 + $0x3e8] sm:$0xff] }
 0xc10   :  { %v2570_v35 = vadd.f32 %v2569_v38, %v2448_v48  ;;  %v2592_v57 = vpop.f32.mrf.mxu2  ;;  %v2681_v49 = vsub.f32 1.0, %v2680_v8  ;;  %v2478_v8 = vadd.f32 %v4974_v12, %v2446_v17  ;;  %v2504_v38 = vadd.f32 %v4986_v6, %v2481_v59  ;;  %v2798_v6 = vld [vmem:[#allocation5 + $0x4a0] sm:$0xff]  ;;  %v2789_v17 = vld [vmem:[#allocation5 + $0x408] sm:$0xff] }
 0xc11   :  { %v2721_v27 = vor.u32 1.1754944e-38, %v2720_v24  ;;  %vm2719_vm7 = vcmp.eq.f32.partialorder %v2718_v20, 8.507059e+37  ;;  %2844 = vmatpush.msrb.mxu0 %v2804_v29  ;;  %v2823_v24 = vld [vmem:[#allocation5 + $0x628] sm:$0xff]  ;;  %v2792_v20 = vld [vmem:[#allocation5 + $0x440] sm:$0xff] }
 0xc12   :  { %v2593_v21 = vadd.f32 %v2592_v57, %v2570_v35  ;;  %v2682_v7 = vmul.f32 %v3611_v42, %v2681_v49  ;;  %v2802_v35 = vld [vmem:[#allocation5 + $0x4e0] sm:$0xff]  ;;  %v2501_v57 = vadd.f32 %v4984_v25, %v2478_v8  ;;  %v2785_v59 = vld [vmem:[#allocation5 + $0x3c8] sm:$0xff] }
 0xc13   :  { %2845 = vmatpush.msrb.mxu0 %v2802_v35  ;;  %v2824_v25 = vld [vmem:[#allocation5 + $0x640] sm:$0xff] }
 0xc14   :  { %v3302_v63 = vmul.f32 -1.442695, %v2593_v21  ;;  %v2683_v11 = vadd.f32 %v3611_v42, %v2682_v7  ;;  %2873 = vmatpush.msrb.mxu1 %v2824_v25  ;;  %v2782_v29 = vld [vmem:[#allocation5 + $0x3a0] sm:$0xff] }
 0xc15   :  { %v3613_v51 = vpop.eup %3612  ;;  %2846 = vmatpush.msrb.mxu0 %v2800_v32  ;;  %v2814_v8 = vld [vmem:[#allocation5 + $0x5a0] sm:$0xff]  ;;  %v2963_v32 = vld [vmem:[#allocation2 + $0x200] sm:$0xff] }
 0xc16   :  { %v2710_v31 = vmul.f32 %v3613_v51, %v2663_v34  ;;  %3614 = vpow2.f32 %v3302_v63  ;;  %vm2715_vm3 = vweird.f32 %v3613_v51  ;;  %v2687_v54 = vsel %vm4991_vm4, %v3611_v42, %v2683_v11  ;;  %v5017_v42 = vld [vmem:[#allocation2 + $0x140] sm:$0xff]  ;;  %v2794_v11 = vld [vmem:[#allocation5 + $0x460] sm:$0xff] }
 0xc17   :  { %v2572_v53 = vpop.f32.mrf.mxu3  ;;  %3616 = vtanh.f32 %v2550_v3  ;;  %vm2716_vm6 = vmor %vm2714_vm5, %vm2715_vm3  ;;  %v2692_v37 = vsel %vm2689_vm8, %v2691_v62, %v2687_v54  ;;  %2847 = vmatpush.msrb.mxu0 %v2798_v6  ;;  %v2790_v54 = vld [vmem:[#allocation5 + $0x420] sm:$0xff]  ;;  %v2813_v62 = vld [vmem:[#allocation5 + $0x588] sm:$0xff] }
 0xc18   :  { %v2711_v60 = vsub.f32 1.0, %v2710_v31  ;;  %v2573_v1 = vadd.f32 %v2572_v53, %v2448_v48  ;;  %v2595_v5 = vpop.f32.mrf.mxu2  ;;  %3618 = vtanh.f32 %v2547_v18  ;;  %v2825_v18 = vld [vmem:[#allocation5 + $0x648] sm:$0xff]  ;;  %v2822_v53 = vld [vmem:[#allocation5 + $0x620] sm:$0xff]  ;;  %v2953_v6 = vld [vmem:[#allocation2 + $0x1b0] sm:$0xff] }
 0xc19   :  { %2874 = vmatpush.msrb.mxu1 %v2822_v53  ;;  %2848 = vmatpush.msrb.mxu0 %v2796_v28  ;;  %v2950_v25 = vld [vmem:[#allocation2 + $0x198] sm:$0xff]  ;;  %v2948_v28 = vld [vmem:[#allocation2 + $0x188] sm:$0xff]  ;;  %v2945_v53 = vld [vmem:[#allocation2 + $0x170] sm:$0xff] }
 0xc1a   :  { %v2596_v9 = vadd.f32 %v2595_v5, %v2573_v1  ;;  %v2712_v22 = vmul.f32 %v3613_v51, %v2711_v60 }
 0xc1b   :  { %2875 = vmatpush.msrb.mxu1 %v2820_v39  ;;  %2849 = vmatpush.msrb.mxu0 %v2794_v11  ;;  %v2942_v11 = vld [vmem:[#allocation2 + $0x158] sm:$0xff]  ;;  %v2960_v39 = vld [vmem:[#allocation2 + $0x1e8] sm:$0xff] }
 0xc1c   :  { %v3615_v36 = vpop.eup %3614  ;;  %v3304_v23 = vmul.f32 -1.442695, %v2596_v9  ;;  %v2713_v26 = vadd.f32 %v3613_v51, %v2712_v22 }
 0xc1d   :  { %v4997_v10 = vadd.f32 1.0, %v3615_v36  ;;  %v3617_v16 = vpop.eup %3616  ;;  %v2821_v36 = vld [vmem:[#allocation5 + $0x608] sm:$0xff]  ;;  %2850 = vmatpush.msrb.mxu0 %v2792_v20 }
 0xc1e   :  { %3620 = vpow2.f32 %v3304_v23  ;;  %v2717_v46 = vsel %vm2716_vm6, %v3613_v51, %v2713_v26  ;;  %v3619_v61 = vpop.eup %3618  ;;  %v2818_v23 = vld [vmem:[#allocation5 + $0x5e0] sm:$0xff]  ;;  %v2949_v51 = vld [vmem:[#allocation2 + $0x190] sm:$0xff]  ;;  %v3310_v20 = vld [vmem:[%s5087_s1 + $0x22] ss:$8 sm:$0x3] }
 0xc1f   :  { %3622 = vrcp.f32 %v4997_v10  ;;  %v2722_v14 = vsel %vm2719_vm7, %v2721_v27, %v2717_v46  ;;  %v5003_v47 = vmul.f32 %v3619_v61, %v2692_v37  ;;  %vm2669_vm10 = vweird.f32 %v4997_v10  ;;  %2876 = vmatpush.msrb.mxu1 %v2818_v23  ;;  %v2819_v27 = vld [vmem:[#allocation5 + $0x5e8] sm:$0xff]  ;;  %v2788_v46 = vld [vmem:[#allocation5 + $0x400] sm:$0xff]  ;;  %2851 = vmatpush.msrb.mxu0 %v2790_v54 }
 0xc20   :  { %v5000_v4 = vmul.f32 %v3617_v16, %v2722_v14  ;;  %v2675_v12 = vand.u32 2147483648, %v4997_v10  ;;  %v2673_v7 = vand.u32 2147483647, %v4997_v10  ;;  %v2811_v16 = vld [vmem:[#allocation5 + $0x568] sm:$0xff]  ;;  %v2786_v14 = vld [vmem:[#allocation5 + $0x3e0] sm:$0xff] }
 0xc21   :  { %2852 = vmatpush.msrb.mxu0 %v2788_v46  ;;  %v2809_v37 = vld [vmem:[#allocation5 + $0x548] sm:$0xff]  ;;  %v2784_v61 = vld [vmem:[#allocation5 + $0x3c0] sm:$0xff] }
 0xc22   :  { %2773 = vmatpush.msra.mxu3 %v5000_v4  ;;  %v2676_v1 = vor.u32 1.1754944e-38, %v2675_v12  ;;  %vm2674_vm1 = vcmp.eq.f32.partialorder %v2673_v7, 8.507059e+37  ;;  %v2954_v12 = vld [vmem:[#allocation2 + $0x1b8] sm:$0xff] }
 0xc23   :  { %2853 = vmatpush.msrb.mxu0 %v2786_v14 }
 0xc24   :  { %v3621_v55 = vpop.eup %3620  ;;  %2774 = vmatpush.msra.mxu3 %v5003_v47 }
 0xc25   :  { %v5008_v45 = vpop.eup %3622  ;;  %v2662_v33 = vadd.f32 1.0, %v3621_v55  ;;  %3308 = vmatmul.msk.f32.vlgmr.msra.gmra.mxu3 %vm1707_vm15, %v5006_v2  ;;  %v2807_v55 = vld [vmem:[#allocation5 + $0x528] sm:$0xff]  ;;  %2854 = vmatpush.msrb.mxu0 %v2784_v61 }
 0xc26   :  { %v2665_v56 = vmul.f32 %v5008_v45, %v4997_v10  ;;  %vm2670_vm9 = vweird.f32 %v5008_v45  ;;  %2919 = vmatpush.msrb.mxu3 %v2825_v18  ;;  %v2946_v18 = vld [vmem:[#allocation2 + $0x178] sm:$0xff] }
 0xc27   :  { %3624 = vrcp.f32 %v2662_v33  ;;  %v2705_v21 = vand.u32 2147483648, %v2662_v33  ;;  %v2703_v63 = vand.u32 2147483647, %v2662_v33  ;;  %vm5029_vm12 = vmor %vm2669_vm10, %vm2670_vm9  ;;  %vm2699_vm13 = vweird.f32 %v2662_v33  ;;  %2855 = vmatpush.msrb.mxu0 %v2782_v29 }
 0xc28   :  { %v2666_v30 = vsub.f32 1.0, %v2665_v56  ;;  %3626 = vtanh.f32 %v2504_v38  ;;  %2920 = vmatpush.msrb.mxu3 %v2823_v24  ;;  %v2795_v56 = vld [vmem:[#allocation5 + $0x468] sm:$0xff]  ;;  %v2941_v24 = vld [vmem:[#allocation2 + $0x150] sm:$0xff] }
 0xc29   :  { %3628 = vtanh.f32 %v2501_v57  ;;  %v2706_v60 = vor.u32 1.1754944e-38, %v2705_v21  ;;  %vm2704_vm14 = vcmp.eq.f32.partialorder %v2703_v63, 8.507059e+37  ;;  %v2815_v38 = vld [vmem:[#allocation5 + $0x5a8] sm:$0xff]  ;;  %v2964_v57 = vld [vmem:[#allocation2 + $0x208] sm:$0xff] }
 0xc2a   :  { %v2667_v48 = vmul.f32 %v5008_v45, %v2666_v30  ;;  %2921 = vmatpush.msrb.mxu3 %v2821_v36  ;;  %v2791_v30 = vld [vmem:[#allocation5 + $0x428] sm:$0xff]  ;;  %v2829_v36 = vperm.slane %v3310_v20, 0 }
 0xc2b   :  { %v2955_v21 = vld [vmem:[#allocation2 + $0x1c0] sm:$0xff] }
 0xc2c   :  { %v2668_v58 = vadd.f32 %v5008_v45, %v2667_v48  ;;  %2922 = vmatpush.msrb.mxu3 %v2819_v27  ;;  %v2816_v48 = vld [vmem:[#allocation5 + $0x5c0] sm:$0xff]  ;;  %v2951_v63 = vld [vmem:[#allocation2 + $0x1a0] sm:$0xff] }
 0xc2d   :  { %v3625_v34 = vpop.eup %3624  ;;  %3309 = vmatmul.msk.f32.gmra.mxu3 %vm1707_vm15, %v5017_v42  ;;  %2877 = vmatpush.msrb.mxu1 %v2816_v48 }
 0xc2e   :  { %v2695_v44 = vmul.f32 %v3625_v34, %v2662_v33  ;;  %vm2700_vm11 = vweird.f32 %v3625_v34  ;;  %v2672_v31 = vsel %vm5029_vm12, %v5008_v45, %v2668_v58  ;;  %v3627_v15 = vpop.eup %3626  ;;  %v2805_v45 = vld [vmem:[#allocation5 + $0x508] sm:$0xff] }
 0xc2f   :  { %vm2701_vm0 = vmor %vm2699_vm13, %vm2700_vm11  ;;  %v2677_v22 = vsel %vm2674_vm1, %v2676_v1, %v2672_v31  ;;  %v3629_v26 = vpop.eup %3628  ;;  %v2803_v33 = vld [vmem:[#allocation5 + $0x4e8] sm:$0xff]  ;;  %2878 = vmatpush.msrb.mxu1 %v2814_v8  ;;  %v3094_v8 = vld [vmem:[#allocation2 + $0x250] sm:$0xff] }
 0xc30   :  { %v2696_v49 = vsub.f32 1.0, %v2695_v44  ;;  %v5040_v10 = vmul.f32 %v3629_v26, %v2677_v22  ;;  %v2965_v44 = vld [vmem:[#allocation2 + $0x210] sm:$0xff]  ;;  %v2943_v1 = vld [vmem:[#allocation2 + $0x160] sm:$0xff] }
 0xc31   :  { %3037 = vmatpush.msra.mxu0 %v2965_v44  ;;  %2973 = vmatpush.msra.mxu1 %v2955_v21  ;;  %v2957_v22 = vld [vmem:[#allocation2 + $0x1d0] sm:$0xff] }
 0xc32   :  { %v2697_v0 = vmul.f32 %v3625_v34, %v2696_v49  ;;  %v2962_v49 = vld [vmem:[#allocation2 + $0x1f8] sm:$0xff] }
 0xc33   :  { %3038 = vmatpush.msra.mxu0 %v2964_v57  ;;  %2974 = vmatpush.msra.mxu1 %v2954_v12 }
 0xc34   :  { %v2698_v3 = vadd.f32 %v3625_v34, %v2697_v0  ;;  %v2952_v0 = vld [vmem:[#allocation2 + $0x1a8] sm:$0xff] }
 0xc35   :  { %3039 = vmatpush.msra.mxu0 %v2963_v32  ;;  %2975 = vmatpush.msra.mxu1 %v2953_v6 }
 0xc36   :  { %v2702_v5 = vsel %vm2701_vm0, %v3625_v34, %v2698_v3  ;;  %v2817_v34 = vld [vmem:[#allocation5 + $0x5c8] sm:$0xff] }
 0xc37   :  { %v2707_v9 = vsel %vm2704_vm14, %v2706_v60, %v2702_v5  ;;  %2923 = vmatpush.msrb.mxu3 %v2817_v34  ;;  %3040 = vmatpush.msra.mxu0 %v2962_v49  ;;  %v2947_v3 = vld [vmem:[#allocation2 + $0x180] sm:$0xff]  ;;  %v2944_v60 = vld [vmem:[#allocation2 + $0x168] sm:$0xff]  ;;  %v2961_v5 = vld [vmem:[#allocation2 + $0x1f0] sm:$0xff] }
 0xc38   :  { %v5037_v19 = vmul.f32 %v3627_v15, %v2707_v9  ;;  %2976 = vmatpush.msra.mxu1 %v2952_v0  ;;  %v2940_v15 = vld [vmem:[#allocation2 + $0x148] sm:$0xff]  ;;  %v2959_v9 = vld [vmem:[#allocation2 + $0x1e0] sm:$0xff] }
 0xc39   :  { %2924 = vmatpush.msrb.mxu3 %v2815_v38  ;;  %v3057_v34 = vld [vmem:[#allocation2 + $0x228] sm:$0xff]  ;;  %v3050_v49 = vld [vmem:[%s5087_s1 + $0x24] ss:$0 sm:$0xff] }
 0xc3a   :  { %2750 = vmatpush.msra.mxu2 %v5037_v19  ;;  %2977 = vmatpush.msra.mxu1 %v2951_v63 }
 0xc3b   :  { %3006 = vmatpush.msra.mxu3 %v2961_v5 }
 0xc3c   :  { %2751 = vmatpush.msra.mxu2 %v5040_v10  ;;  %2978 = vmatpush.msra.mxu1 %v2950_v25 }
 0xc3d   :  { %3306 = vmatmul.msk.f32.vlgmr.msra.gmra.mxu2 %vm1707_vm15, %v5006_v2  ;;  %v2799_v2 = vld [vmem:[#allocation5 + $0x4a8] sm:$0xff]  ;;  %3007 = vmatpush.msra.mxu3 %v2960_v39 }
 0xc3e   :  { %2886 = vmatpush.msrb.mxu2 %v2813_v62  ;;  %2979 = vmatpush.msra.mxu1 %v2949_v51  ;;  %v2830_v62 = vperm.slane %v3310_v20, 1 }
 0xc3f   :  { %3008 = vmatpush.msra.mxu3 %v2959_v9  ;;  %v3095_v9 = vld [vmem:[%s5087_s1 + $0x26] ss:$0 sm:$0xff] }
 0xc40   :  { %2887 = vmatpush.msrb.mxu2 %v2811_v16  ;;  %2980 = vmatpush.msra.mxu1 %v2948_v28 }
 0xc42   :  { %2888 = vmatpush.msrb.mxu2 %v2809_v37  ;;  %2981 = vmatpush.msra.mxu1 %v2947_v3 }
 0xc44   :  { %2889 = vmatpush.msrb.mxu2 %v2807_v55  ;;  %2982 = vmatpush.msra.mxu1 %v2946_v18  ;;  %v3092_v18 = vld [vmem:[#allocation2 + $0x240] sm:$0xff] }
 0xc45   :  { %3307 = vmatmul.msk.f32.gmra.mxu2 %vm1707_vm15, %v5017_v42  ;;  %v2783_v42 = vld [vmem:[#allocation5 + $0x3a8] sm:$0xff]  ;;  %vm2833_vm15 = vcmask 392192  }
 0xc46   :  { %2890 = vmatpush.msrb.mxu2 %v2805_v45  ;;  %2983 = vmatpush.msra.mxu1 %v2945_v53  ;;  %v3091_v53 = vld [vmem:[#allocation2 + $0x238] sm:$0xff] }
 0xc48   :  { %2891 = vmatpush.msrb.mxu2 %v2803_v33  ;;  %2984 = vmatpush.msra.mxu1 %v2944_v60  ;;  %v3059_v60 = vld [vmem:[%s5087_s1 + $0x25] ss:$0 sm:$0xff] }
 0xc4a   :  { %2892 = vmatpush.msrb.mxu2 %v2801_v40  ;;  %2985 = vmatpush.msra.mxu1 %v2943_v1 }
 0xc4c   :  { %2893 = vmatpush.msrb.mxu2 %v2799_v2  ;;  %2986 = vmatpush.msra.mxu1 %v2942_v11 }
 0xc4e   :  { %2894 = vmatpush.msrb.mxu2 %v2797_v50  ;;  %2987 = vmatpush.msra.mxu1 %v2941_v24 }
 0xc50   :  { %2895 = vmatpush.msrb.mxu2 %v2795_v56  ;;  %2988 = vmatpush.msra.mxu1 %v2940_v15 }
 0xc52   :  { %2896 = vmatpush.msrb.mxu2 %v2793_v43 }
 0xc54   :  { %2897 = vmatpush.msrb.mxu2 %v2791_v30 }
 0xc56   :  { %2898 = vmatpush.msrb.mxu2 %v2789_v17 }
 0xc58   :  { %2899 = vmatpush.msrb.mxu2 %v2787_v13 }
 0xc5a   :  { %2900 = vmatpush.msrb.mxu2 %v2785_v59 }
 0xc5c   :  { %2901 = vmatpush.msrb.mxu2 %v2783_v42  ;;  %v3058_v42 = vld [vmem:[#allocation2 + $0x230] sm:$0xff] }
 0xc5e   :  { %3323 = vmatpush.msra.mxu2 %v3058_v42 }
 0xc60   :  { %3324 = vmatpush.msra.mxu2 %v3057_v34 }
 0xca8   :  { %v2776_v35 = vpop.f32.mrf.mxu3 }
 0xca9   :  { %3311 = vmatmul.msk.f32.vlgmr.msrb.gmra.mxu1 %vm2833_vm15, %v2776_v35  ;;  %3313 = vmatmul.msk.f32.vlgmr.msrb.gmra.mxu3 %vm2833_vm15, %v2776_v35 }
 0xcb0   :  { %v2779_v58 = vpop.f32.mrf.mxu3 }
 0xcb1   :  { %3312 = vmatmul.msk.f32.gmra.mxu1 %vm2833_vm15, %v2779_v58  ;;  %3314 = vmatmul.msk.f32.gmra.mxu3 %vm2833_vm15, %v2779_v58 }
 0xcc0   :  { %v2753_v7 = vpop.f32.mrf.mxu2 }
 0xcc1   :  { %2856 = vmatmul.f32.vlgmr.msrb.gmra.mxu0 %v2753_v7  ;;  %2902 = vmatmul.f32.vlgmr.msrb.gmra.mxu2 %v2753_v7 }
 0xcc2   :  { %3078 = vmatpush.msrb.mxu0 %v3058_v42 }
 0xcc4   :  { %3079 = vmatpush.msrb.mxu0 %v3057_v34 }
 0xcc8   :  { %v2756_v31 = vpop.f32.mrf.mxu2 }
 0xcc9   :  { %2859 = vmatmul.f32.gmra.mxu0 %v2756_v31  ;;  %2905 = vmatmul.f32.gmra.mxu2 %v2756_v31  ;;  %v3093_v31 = vld [vmem:[#allocation2 + $0x248] sm:$0xff] }
 0xcd1   :  { %3317 = vmatmul.msk.f32.vlgmr.msra.gmra.mxu0 %vm139_vm2, %v4959_v52  ;;  %v2958_v52 = vld [vmem:[#allocation2 + $0x1d8] sm:$0xff] }
 0xcd2   :  { %3009 = vmatpush.msra.mxu3 %v2958_v52 }
 0xcd4   :  { %3010 = vmatpush.msra.mxu3 %v2957_v22 }
 0xcd9   :  { %3318 = vmatmul.msk.f32.gmra.mxu0 %vm139_vm2, %v4961_v41  ;;  %v2956_v41 = vld [vmem:[#allocation2 + $0x1c8] sm:$0xff] }
 0xcda   :  { %3011 = vmatpush.msra.mxu3 %v2956_v41 }
 0xcdc   :  { %3114 = vmatpush.msrb.mxu3 %v3094_v8 }
 0xcde   :  { %3115 = vmatpush.msrb.mxu3 %v3093_v31 }
 0xce0   :  { %3116 = vmatpush.msrb.mxu3 %v3092_v18 }
 0xce2   :  { %3117 = vmatpush.msrb.mxu3 %v3091_v53 }
 0xd26   :  { %v2880_v23 = vpop.f32.mrf.mxu1 }
 0xd2c   :  { %v2926_v46 = vpop.f32.mrf.mxu3 }
 0xd2e   :  { %v2883_v45 = vpop.f32.mrf.mxu1 }
 0xd34   :  { %v2929_v17 = vpop.f32.mrf.mxu3 }
 0xd3e   :  { %v2857_v26 = vpop.f32.mrf.mxu0 }
 0xd3f   :  { %v2858_v54 = vadd.f32 %v2857_v26, %v2829_v36 }
 0xd41   :  { %v2881_v27 = vadd.f32 %v2880_v23, %v2858_v54 }
 0xd43   :  { %v2932_v16 = vmax.f32 %v2881_v27, 0.0 }
 0xd44   :  { %v2903_v14 = vpop.f32.mrf.mxu2 }
 0xd45   :  { %v2936_v37 = vadd.f32 %v2932_v16, %v5040_v10  ;;  %v2904_v61 = vadd.f32 %v2903_v14, %v2830_v62 }
 0xd46   :  { %v2860_v55 = vpop.f32.mrf.mxu0 }
 0xd47   :  { %v2861_v33 = vadd.f32 %v2860_v55, %v2829_v36  ;;  %v2927_v40 = vadd.f32 %v2926_v46, %v2904_v61  ;;  %2989 = vmatmul.f32.vlgmr.msra.gmra.mxu1 %v2936_v37 }
 0xd49   :  { %v2933_v2 = vmax.f32 %v2927_v40, 0.0  ;;  %v2884_v50 = vadd.f32 %v2883_v45, %v2861_v33 }
 0xd4b   :  { %v2937_v56 = vadd.f32 %v2933_v2, %v5003_v47  ;;  %v2934_v43 = vmax.f32 %v2884_v50, 0.0  ;;  %v3056_v47 = vld [vmem:[#allocation2 + $0x220] sm:$0xff] }
 0xd4c   :  { %v2906_v30 = vpop.f32.mrf.mxu2  ;;  %3080 = vmatpush.msrb.mxu0 %v3056_v47  ;;  %3325 = vmatpush.msra.mxu2 %v3056_v47 }
 0xd4d   :  { %v2938_v13 = vadd.f32 %v2934_v43, %v5037_v19  ;;  %v2907_v59 = vadd.f32 %v2906_v30, %v2830_v62  ;;  %3315 = vmatmul.msk.f32.vlgmr.msra.gmra.mxu3 %vm2833_vm15, %v2937_v56  ;;  %v3055_v19 = vld [vmem:[#allocation2 + $0x218] sm:$0xff] }
 0xd4e   :  { %3081 = vmatpush.msrb.mxu0 %v3055_v19  ;;  %3326 = vmatpush.msra.mxu2 %v3055_v19  ;;  %v3042_v44 = vpop.f32.mrf.mxu0 }
 0xd4f   :  { %v2930_v29 = vadd.f32 %v2929_v17, %v2907_v59  ;;  %2992 = vmatmul.f32.gmra.mxu1 %v2938_v13 }
 0xd51   :  { %v2935_v10 = vmax.f32 %v2930_v29, 0.0 }
 0xd53   :  { %v2939_v48 = vadd.f32 %v2935_v10, %v5000_v4  ;;  %v2966_v4 = vld [vmem:[%s5087_s1 + $0x23] ss:$0 sm:$0xff] }
 0xd55   :  { %3316 = vmatmul.msk.f32.gmra.mxu3 %vm2833_vm15, %v2939_v48 }
 0xd56   :  { %v3045_v25 = vpop.f32.mrf.mxu0 }
 0xdc4   :  { %v2990_v38 = vpop.f32.mrf.mxu1 }
 0xdc5   :  { %v2991_v35 = vadd.f32 %v2990_v38, %v2966_v4 }
 0xdcc   :  { %v2993_v21 = vpop.f32.mrf.mxu1 }
 0xdcd   :  { %v2994_v6 = vadd.f32 %v2993_v21, %v2966_v4 }
 0xdd0   :  { %v3013_v57 = vpop.f32.mrf.mxu3 }
 0xdd1   :  { %v3014_v32 = vadd.f32 %v3013_v57, %v2991_v35 }
 0xdd3   :  { %v3048_v58 = vadd.f32 %v3042_v44, %v3014_v32 }
 0xdd5   :  { %v3051_v12 = vadd.f32 %v3050_v49, %v3048_v58 }
 0xdd7   :  { %v3053_v0 = vmax.f32 %v3051_v12, 0.0 }
 0xdd8   :  { %v3016_v63 = vpop.f32.mrf.mxu3 }
 0xdd9   :  { %v3017_v7 = vadd.f32 %v3016_v63, %v2994_v6  ;;  %3319 = vmatmul.msk.f32.vlgmr.msrb.gmra.mxu0 %vm139_vm2, %v3053_v0 }
 0xddb   :  { %v3049_v51 = vadd.f32 %v3045_v25, %v3017_v7 }
 0xddd   :  { %v3052_v28 = vadd.f32 %v3050_v49, %v3049_v51 }
 0xddf   :  { %v3054_v3 = vmax.f32 %v3052_v28, 0.0 }
 0xde1   :  { %3320 = vmatmul.msk.f32.vlgmr.msra.gmra.mxu2 %vm139_vm2, %v3054_v3 }
 0xe56   :  { %v3083_v1 = vpop.f32.mrf.mxu0 }
 0xe57   :  { %v3084_v11 = vadd.f32 %v3083_v1, %v3059_v60 }
 0xe59   :  { %v3089_v5 = vmax.f32 %v3084_v11, 0.0 }
 0xe5b   :  { %3321 = vmatmul.msk.f32.vlgmr.msrb.gmra.mxu3 %vm139_vm2, %v3089_v5 }
 0xe64   :  { %v3086_v24 = vpop.f32.mrf.mxu2 }
 0xe65   :  { %v3087_v39 = vadd.f32 %v3086_v24, %v3059_v60 }
 0xe67   :  { %v3090_v15 = vmax.f32 %v3087_v39, 0.0 }
 0xe69   :  { %3322 = vmatmul.msk.f32.gmra.mxu3 %vm139_vm2, %v3090_v15 }
 0xede   :  { %v3119_v52 = vpop.f32.mrf.mxu3 }
 0xedf   :  { %v3120_v22 = vadd.f32 %v3119_v52, %v3095_v9 }
 0xee1   :  { %3125 = vst [vmem:[#allocation7] sm:$0xff] %v3120_v22 }
 0xeec   :  { %v3122_v41 = vpop.f32.mrf.mxu3 }
 0xeed   :  { %v3123_v20 = vadd.f32 %v3122_v41, %v3095_v9 }
 0xeef   :  { %3126 = vst [vmem:[#allocation7 + $0x8] sm:$0xff] %v3123_v20 }
 0xef0   :  { %3139 = dma.vmem_to_hbm [thread:$0]  %s3132_s12, 256, %s3134_s15, [#allocation4], %s3709_s23, %s3709_s23, %s3710_s24  }
 0xef1   :  { %3706 = dma.done.wait [#allocation4], 256  }
 0xef2   :  { %3707 = vsyncadd [#allocation4], 4294967040 }
 0xef3   :  { %3144 = vsyncpa [#allocation3], 1 }
 0xef4   :  { %3145 = vsyncpa [#allocation6], 1 }
 0xef5   :  { %3146 = vsyncpa [#allocation4], 1 }

</bundles_post_ra>
